<compile_context>
chip_gen: v6e
topology: v6e:2x2x1
jax: 0.10.0
libtpu: 0.0.40
codegen_flags: <defaults>
</compile_context>

<pallas_src>
import functools

import jax
import jax.numpy as jnp
from jax import lax
from jax.experimental import pallas as pl
from jax.experimental.pallas import tpu as pltpu


def _cnn_embed_kernel(x_ref, bns_ref, bnb_ref,
                      w1_ref, b1_ref, w2_ref, b2_ref,
                      wout_ref, bout_ref, o_ref,
                      *, NB, C, use_swish):
    # x_ref   : (NB, T, F)   NB batch elements per grid step
    # bns/bnb : (1, F)       folded eval-mode BatchNorm scale / shift
    # w1_ref  : (9, C)       conv1 weights, row k = di*3+dj
    # b1_ref  : (1, C)
    # w2_ref  : (9*C, C)     conv2 weights, row = (di*3+dj)*C + c_in
    # b2_ref  : (1, C)
    # wout_ref: (f_out*C, out_dim)  Linear weight, row = v*C + c
    # bout_ref: (1, out_dim)
    # o_ref   : (NB, t_out, out_dim)
    _, T, F = x_ref.shape
    H1, W1 = T - 2, F - 2
    H1p, W1p = H1 // 2, W1 // 2
    H3, W3 = H1p - 2, W1p - 2
    t_out, f_out = H3 // 2, W3 // 2

    # weight / affine loads hoisted out of the batch loop (stay in vregs/VMEM)
    bns = bns_ref[...]
    bnb = bnb_ref[...]
    w1m = w1_ref[...]
    b1r = b1_ref[...]
    w2m = w2_ref[...]
    b2r = b2_ref[...]
    wout = wout_ref[...]
    bout = bout_ref[...]

    def act(a):
        if use_swish:
            return a * jax.nn.sigmoid(a)       # Swish (EUP sigmoid)
        return jnp.maximum(a, 0.0)

    def pool2x2(a, ho, wo):
        # a: (H, W, C) -> (ho, wo, C), 2x2 average pool, floor mode.
        t = a[:2 * ho].reshape(ho, 2, a.shape[1], C)
        t = t[:, 0] + t[:, 1]                          # (ho, W, C)
        t = t[:, :2 * wo].reshape(ho, wo, 2, C)
        return (t[:, :, 0] + t[:, :, 1]) * 0.25        # (ho, wo, C)

    for nb in range(NB):
        x = x_ref[nb].astype(jnp.float32)              # (T, F)
        x = x * bns + bnb                              # eval-mode BatchNorm

        # ---- conv1: im2col (pixels, 9) @ (9, C), shifted views hoisted ----
        shifts1 = [x[di:di + H1, dj:dj + W1]
                   for di in range(3) for dj in range(3)]
        cols1 = jnp.stack(shifts1, axis=-1)            # (H1, W1, 9)
        a1 = jnp.dot(cols1.reshape(H1 * W1, 9), w1m,
                     preferred_element_type=jnp.float32)
        a1 = act(a1 + b1r).reshape(H1, W1, C)          # bias added once
        p1 = pool2x2(a1, H1p, W1p)                     # (H1p, W1p, C)

        # ---- conv2: im2col (pixels, 9C) @ (9C, C), shifted views hoisted ----
        shifts2 = [p1[di:di + H3, dj:dj + W3, :]
                   for di in range(3) for dj in range(3)]
        cols2 = jnp.concatenate(shifts2, axis=-1)      # (H3, W3, 9*C)
        a2 = jnp.dot(cols2.reshape(H3 * W3, 9 * C), w2m,
                     preferred_element_type=jnp.float32)
        a2 = act(a2 + b2r).reshape(H3, W3, C)
        p2 = pool2x2(a2, t_out, f_out)                 # (t_out, f_out, C)

        # ---- fused output projection: one lane-dense matmul ----
        feat = p2.reshape(t_out, f_out * C)            # lane index = v*C + c
        out = jnp.dot(feat, wout,
                      preferred_element_type=jnp.float32) + bout
        o_ref[nb] = out.astype(o_ref.dtype)


def cnn_embedding_avepool(x, x_mask, params, *, cnn_dim, out_dim,
                          subsampling_rate=4, cnn_swish=True, bn_eps=1e-5,
                          batch_block=2):
    """x: (B, T, idim) float32, x_mask: (B, 1, T). Returns (out, mask_return)."""
    assert subsampling_rate == 4, "only subsampling_rate == 4 implemented"
    B, T, F = x.shape
    C = cnn_dim

    H1, W1 = T - 2, F - 2
    H1p, W1p = H1 // 2, W1 // 2
    H3, W3 = H1p - 2, W1p - 2
    t_out, f_out = H3 // 2, W3 // 2
    assert t_out > 0 and f_out > 0, "input too small for two conv+pool stages"

    NB = max(1, min(batch_block, B))
    Bpad = ((B + NB - 1) // NB) * NB
    x_in = jnp.pad(x, ((0, Bpad - B), (0, 0), (0, 0))) if Bpad != B else x

    # --- fold eval-mode BatchNorm into a per-feature affine ---
    bn_scale = (params["bn_gamma"] /
                jnp.sqrt(params["bn_var"] + bn_eps)).reshape(1, F).astype(jnp.float32)
    bn_shift = (params["bn_beta"] -
                params["bn_mean"] * bn_scale[0]).reshape(1, F).astype(jnp.float32)

    # --- conv weights as VMEM matmul matrices (matching the im2col ordering) ---
    # w1m[di*3+dj, c]            = w1[c, 0, di, dj]
    w1m = params["w1"][:, 0].transpose(1, 2, 0).reshape(9, C).astype(jnp.float32)
    b1r = params["b1"].reshape(1, C).astype(jnp.float32)
    # w2m[(di*3+dj)*C + c_in, c_out] = w2[c_out, c_in, di, dj]
    w2m = params["w2"].transpose(2, 3, 1, 0).reshape(9 * C, C).astype(jnp.float32)
    b2r = params["b2"].reshape(1, C).astype(jnp.float32)
    # Linear weight reordered so feature row index v*C + c matches the
    # channels-last pooled layout (PyTorch hidden index is c*f_out + v).
    woutk = (params["w_out"].T.reshape(C, f_out, out_dim)
             .transpose(1, 0, 2).reshape(f_out * C, out_dim).astype(jnp.float32))
    boutr = params["b_out"].reshape(1, out_dim).astype(jnp.float32)

    # --- advisory cost estimate ---
    flops_elem = (2 * H1 * W1 * 9 * C
                  + 2 * H3 * W3 * 9 * C * C
                  + 2 * t_out * f_out * C * out_dim
                  + 4 * T * F
                  + 4 * H1 * W1 * C + 4 * H3 * W3 * C)
    transc_elem = H1 * W1 * C + H3 * W3 * C
    bytes_acc = 4 * (Bpad * T * F + Bpad * t_out * out_dim
                     + 2 * F + 9 * C + C + 9 * C * C + C
                     + f_out * C * out_dim + out_dim)
    cost = pl.CostEstimate(flops=int(Bpad * flops_elem),
                           transcendentals=int(Bpad * transc_elem),
                           bytes_accessed=int(bytes_acc))

    kernel = functools.partial(_cnn_embed_kernel, NB=NB, C=C,
                               use_swish=cnn_swish)

    out = pl.pallas_call(
        kernel,
        out_shape=jax.ShapeDtypeStruct((Bpad, t_out, out_dim), x.dtype),
        grid_spec=pltpu.PrefetchScalarGridSpec(
            num_scalar_prefetch=0,
            grid=(Bpad // NB,),
            in_specs=[
                # NB batch elements of x per grid step
                pl.BlockSpec((NB, T, F), lambda b: (b, 0, 0)),
                # BN affine + all weights: constant index maps -> VMEM-resident
                pl.BlockSpec((1, F), lambda b: (0, 0)),
                pl.BlockSpec((1, F), lambda b: (0, 0)),
                pl.BlockSpec((9, C), lambda b: (0, 0)),
                pl.BlockSpec((1, C), lambda b: (0, 0)),
                pl.BlockSpec((9 * C, C), lambda b: (0, 0)),
                pl.BlockSpec((1, C), lambda b: (0, 0)),
                pl.BlockSpec((f_out * C, out_dim), lambda b: (0, 0)),
                pl.BlockSpec((1, out_dim), lambda b: (0, 0)),
            ],
            out_specs=pl.BlockSpec((NB, t_out, out_dim), lambda b: (b, 0, 0)),
        ),
        compiler_params=pltpu.CompilerParams(
            dimension_semantics=("parallel",),
            vmem_limit_bytes=32 * 1024 * 1024,   # safe on v5e/v6e/v7x
        ),
        cost_estimate=cost,
    )(x_in, bn_scale, bn_shift, w1m, b1r, w2m, b2r, woutk, boutr)

    out = out[:B]
    # mask subsampling is pure strided indexing (no compute) -> plain JAX
    mask_return = x_mask[:, :, :-3:2][:, :, :-3:2]
    return out, mask_return


# ---------------------------------------------------------------------------
# Pure-JAX reference (eval mode), used only to validate the kernel.
# ---------------------------------------------------------------------------
def _reference_forward(x, x_mask, params, *, cnn_swish=True, bn_eps=1e-5):
    scale = params["bn_gamma"] / jnp.sqrt(params["bn_var"] + bn_eps)
    shift = params["bn_beta"] - params["bn_mean"] * scale
    h = x * scale[None, None, :] + shift[None, None, :]
    h = h[:, None, :, :]

    def conv(a, w, b):
        y = lax.conv_general_dilated(
            a, w, window_strides=(1, 1), padding="VALID",
            dimension_numbers=("NCHW", "OIHW", "NCHW"),
            precision=lax.Precision.HIGHEST)
        return y + b[None, :, None, None]

    def act(a):
        return a * jax.nn.sigmoid(a) if cnn_swish else jnp.maximum(a, 0.0)

    def avgpool(a):
        y = lax.reduce_window(a, 0.0, lax.add, (1, 1, 2, 2), (1, 1, 2, 2), "VALID")
        return y * 0.25

    h = avgpool(act(conv(h, params["w1"], params["b1"])))
    h = avgpool(act(conv(h, params["w2"], params["b2"])))
    b_, c_, t_, f_ = h.shape
    feat = jnp.transpose(h, (0, 2, 1, 3)).reshape(b_, t_, c_ * f_)
    out = jnp.dot(feat, params["w_out"].T, precision=lax.Precision.HIGHEST) \
        + params["b_out"][None, None, :]
    mask = x_mask[:, :, :-3:2][:, :, :-3:2]
    return out, mask


if __name__ == "__main__":
    # Small demo config: mel_dim=16, cnn_dim=4, d_model_e=32, subsampling_rate=4.
    # B=4 with NB=2 per grid step -> 2 parallel grid steps (feeds both v7x TCs).
    B, T, F = 4, 16, 16
    C, out_dim = 4, 32

    f_out = ((F - 2) // 2 - 2) // 2
    t_out = ((T - 2) // 2 - 2) // 2
    hidden_dim = C * f_out

    key = jax.random.PRNGKey(0)
    keys = jax.random.split(key, 12)
    x = jax.random.normal(keys[0], (B, T, F), dtype=jnp.float32)
    x_mask = jnp.ones((B, 1, T), dtype=jnp.bool_)

    params = {
        "bn_gamma": 1.0 + 0.1 * jax.random.normal(keys[1], (F,), jnp.float32),
        "bn_beta": 0.1 * jax.random.normal(keys[2], (F,), jnp.float32),
        "bn_mean": 0.1 * jax.random.normal(keys[3], (F,), jnp.float32),
        "bn_var": 1.0 + 0.1 * jnp.abs(jax.random.normal(keys[4], (F,), jnp.float32)),
        "w1": 0.1 * jax.random.normal(keys[5], (C, 1, 3, 3), jnp.float32),
        "b1": 0.1 * jax.random.normal(keys[6], (C,), jnp.float32),
        "w2": 0.1 * jax.random.normal(keys[7], (C, C, 3, 3), jnp.float32),
        "b2": 0.1 * jax.random.normal(keys[8], (C,), jnp.float32),
        "w_out": 0.1 * jax.random.normal(keys[9], (out_dim, hidden_dim), jnp.float32),
        "b_out": 0.1 * jax.random.normal(keys[10], (out_dim,), jnp.float32),
    }

    out, mask_ret = cnn_embedding_avepool(
        x, x_mask, params, cnn_dim=C, out_dim=out_dim,
        subsampling_rate=4, cnn_swish=True, batch_block=2)
    out = jax.block_until_ready(out)
    mask_ret = jax.block_until_ready(mask_ret)

    ref_out, ref_mask = _reference_forward(x, x_mask, params, cnn_swish=True)

    assert out.shape == ref_out.shape == (B, t_out, out_dim), out.shape
    assert mask_ret.shape == ref_mask.shape == (B, 1, t_out), mask_ret.shape
    assert jnp.allclose(out, ref_out, atol=1e-3, rtol=1e-3), \
        float(jnp.max(jnp.abs(out - ref_out)))
    assert jnp.array_equal(mask_ret, ref_mask)

    print("KERNEL_OK")
</pallas_src>

<mosaic_0001>
module attributes {stable_mosaic.version = 11 : i64} {
  func.func @_cnn_embed_kernel(%arg0: i32, %arg1: memref<2x16x16xf32, #tpu.memory_space<vmem>>, %arg2: memref<1x16xf32, #tpu.memory_space<vmem>>, %arg3: memref<1x16xf32, #tpu.memory_space<vmem>>, %arg4: memref<9x4xf32, #tpu.memory_space<vmem>>, %arg5: memref<1x4xf32, #tpu.memory_space<vmem>>, %arg6: memref<36x4xf32, #tpu.memory_space<vmem>>, %arg7: memref<1x4xf32, #tpu.memory_space<vmem>>, %arg8: memref<8x32xf32, #tpu.memory_space<vmem>>, %arg9: memref<1x32xf32, #tpu.memory_space<vmem>>, %arg10: memref<2x2x32xf32, #tpu.memory_space<vmem>>) attributes {dimension_semantics = [#tpu.dimension_semantics<parallel>], iteration_bounds = array<i64: 2>, scalar_prefetch = 0 : i64, scratch_operands = 0 : i64, tpu.core_type = #tpu.core_type<tc>, window_params = [{transform_indices = @transform_0, window_bounds = array<i64: 2, 16, 16>}, {pipeline_mode = #tpu.pipeline_mode<synchronous>, transform_indices = @transform_1, window_bounds = array<i64: 1, 16>}, {pipeline_mode = #tpu.pipeline_mode<synchronous>, transform_indices = @transform_2, window_bounds = array<i64: 1, 16>}, {pipeline_mode = #tpu.pipeline_mode<synchronous>, transform_indices = @transform_3, window_bounds = array<i64: 9, 4>}, {pipeline_mode = #tpu.pipeline_mode<synchronous>, transform_indices = @transform_4, window_bounds = array<i64: 1, 4>}, {pipeline_mode = #tpu.pipeline_mode<synchronous>, transform_indices = @transform_5, window_bounds = array<i64: 36, 4>}, {pipeline_mode = #tpu.pipeline_mode<synchronous>, transform_indices = @transform_6, window_bounds = array<i64: 1, 4>}, {pipeline_mode = #tpu.pipeline_mode<synchronous>, transform_indices = @transform_7, window_bounds = array<i64: 8, 32>}, {pipeline_mode = #tpu.pipeline_mode<synchronous>, transform_indices = @transform_8, window_bounds = array<i64: 1, 32>}, {transform_indices = @transform_9, window_bounds = array<i64: 2, 2, 32>}]} {
    %c0 = arith.constant 0 : index
    %c0_0 = arith.constant 0 : index
    %0 = vector.load %arg2[%c0, %c0_0] : memref<1x16xf32, #tpu.memory_space<vmem>>, vector<1x16xf32>
    %c0_1 = arith.constant 0 : index
    %c0_2 = arith.constant 0 : index
    %1 = vector.load %arg3[%c0_1, %c0_2] : memref<1x16xf32, #tpu.memory_space<vmem>>, vector<1x16xf32>
    %c0_3 = arith.constant 0 : index
    %c0_4 = arith.constant 0 : index
    %2 = vector.load %arg4[%c0_3, %c0_4] : memref<9x4xf32, #tpu.memory_space<vmem>>, vector<9x4xf32>
    %c0_5 = arith.constant 0 : index
    %c0_6 = arith.constant 0 : index
    %3 = vector.load %arg5[%c0_5, %c0_6] : memref<1x4xf32, #tpu.memory_space<vmem>>, vector<1x4xf32>
    %c0_7 = arith.constant 0 : index
    %c0_8 = arith.constant 0 : index
    %4 = vector.load %arg6[%c0_7, %c0_8] : memref<36x4xf32, #tpu.memory_space<vmem>>, vector<36x4xf32>
    %c0_9 = arith.constant 0 : index
    %c0_10 = arith.constant 0 : index
    %5 = vector.load %arg7[%c0_9, %c0_10] : memref<1x4xf32, #tpu.memory_space<vmem>>, vector<1x4xf32>
    %c0_11 = arith.constant 0 : index
    %c0_12 = arith.constant 0 : index
    %6 = vector.load %arg8[%c0_11, %c0_12] : memref<8x32xf32, #tpu.memory_space<vmem>>, vector<8x32xf32>
    %c0_13 = arith.constant 0 : index
    %c0_14 = arith.constant 0 : index
    %7 = vector.load %arg9[%c0_13, %c0_14] : memref<1x32xf32, #tpu.memory_space<vmem>>, vector<1x32xf32>
    %c0_15 = arith.constant 0 : index
    %c0_16 = arith.constant 0 : index
    %c0_17 = arith.constant 0 : index
    %8 = vector.load %arg1[%c0_15, %c0_16, %c0_17] : memref<2x16x16xf32, #tpu.memory_space<vmem>>, vector<1x16x16xf32>
    %9 = vector.shape_cast %8 : vector<1x16x16xf32> to vector<16x16xf32>
    %10 = vector.broadcast %0 : vector<1x16xf32> to vector<16x16xf32>
    %11 = arith.mulf %9, %10 : vector<16x16xf32>
    %12 = vector.broadcast %1 : vector<1x16xf32> to vector<16x16xf32>
    %13 = arith.addf %11, %12 : vector<16x16xf32>
    %14 = vector.extract_strided_slice %13 {offsets = [0, 0], sizes = [14, 14], strides = [1, 1]} : vector<16x16xf32> to vector<14x14xf32>
    %15 = vector.extract_strided_slice %13 {offsets = [0, 1], sizes = [14, 14], strides = [1, 1]} : vector<16x16xf32> to vector<14x14xf32>
    %16 = vector.extract_strided_slice %13 {offsets = [0, 2], sizes = [14, 14], strides = [1, 1]} : vector<16x16xf32> to vector<14x14xf32>
    %17 = vector.extract_strided_slice %13 {offsets = [1, 0], sizes = [14, 14], strides = [1, 1]} : vector<16x16xf32> to vector<14x14xf32>
    %18 = vector.extract_strided_slice %13 {offsets = [1, 1], sizes = [14, 14], strides = [1, 1]} : vector<16x16xf32> to vector<14x14xf32>
    %19 = vector.extract_strided_slice %13 {offsets = [1, 2], sizes = [14, 14], strides = [1, 1]} : vector<16x16xf32> to vector<14x14xf32>
    %20 = vector.extract_strided_slice %13 {offsets = [2, 0], sizes = [14, 14], strides = [1, 1]} : vector<16x16xf32> to vector<14x14xf32>
    %21 = vector.extract_strided_slice %13 {offsets = [2, 1], sizes = [14, 14], strides = [1, 1]} : vector<16x16xf32> to vector<14x14xf32>
    %22 = vector.extract_strided_slice %13 {offsets = [2, 2], sizes = [14, 14], strides = [1, 1]} : vector<16x16xf32> to vector<14x14xf32>
    %23 = vector.shape_cast %14 : vector<14x14xf32> to vector<14x14x1xf32>
    %24 = vector.shape_cast %15 : vector<14x14xf32> to vector<14x14x1xf32>
    %25 = vector.shape_cast %16 : vector<14x14xf32> to vector<14x14x1xf32>
    %26 = vector.shape_cast %17 : vector<14x14xf32> to vector<14x14x1xf32>
    %27 = vector.shape_cast %18 : vector<14x14xf32> to vector<14x14x1xf32>
    %28 = vector.shape_cast %19 : vector<14x14xf32> to vector<14x14x1xf32>
    %29 = vector.shape_cast %20 : vector<14x14xf32> to vector<14x14x1xf32>
    %30 = vector.shape_cast %21 : vector<14x14xf32> to vector<14x14x1xf32>
    %31 = vector.shape_cast %22 : vector<14x14xf32> to vector<14x14x1xf32>
    %32 = tpu.concatenate %23, %24, %25, %26, %27, %28, %29, %30, %31 in 2 : vector<14x14x1xf32>, vector<14x14x1xf32>, vector<14x14x1xf32>, vector<14x14x1xf32>, vector<14x14x1xf32>, vector<14x14x1xf32>, vector<14x14x1xf32>, vector<14x14x1xf32>, vector<14x14x1xf32> -> vector<14x14x9xf32>
    %33 = vector.shape_cast %32 : vector<14x14x9xf32> to vector<196x9xf32>
    %cst = arith.constant dense<0.000000e+00> : vector<196x4xf32>
    %34 = tpu.matmul %33, %2, %cst {dimension_numbers = #tpu.dot_dimension_numbers<[1], [0], [0], [1], [0, 0, 1, 1], [], []>} : vector<196x9xf32>, vector<9x4xf32>, vector<196x4xf32> -> vector<196x4xf32>
    %35 = vector.broadcast %3 : vector<1x4xf32> to vector<196x4xf32>
    %36 = arith.addf %34, %35 : vector<196x4xf32>
    %37 = arith.negf %36 : vector<196x4xf32>
    %38 = math.exp %37 : vector<196x4xf32>
    %cst_18 = arith.constant 1.000000e+00 : f32
    %39 = vector.broadcast %cst_18 : f32 to vector<196x4xf32>
    %40 = arith.addf %39, %38 : vector<196x4xf32>
    %41 = arith.divf %39, %40 : vector<196x4xf32>
    %42 = arith.mulf %36, %41 : vector<196x4xf32>
    %43 = vector.shape_cast %42 : vector<196x4xf32> to vector<14x14x4xf32>
    %44 = vector.shape_cast %43 : vector<14x14x4xf32> to vector<7x2x14x4xf32>
    %45 = vector.extract_strided_slice %44 {offsets = [0, 0, 0, 0], sizes = [7, 1, 14, 4], strides = [1, 1, 1, 1]} : vector<7x2x14x4xf32> to vector<7x1x14x4xf32>
    %46 = vector.shape_cast %45 : vector<7x1x14x4xf32> to vector<7x14x4xf32>
    %47 = vector.extract_strided_slice %44 {offsets = [0, 1, 0, 0], sizes = [7, 1, 14, 4], strides = [1, 1, 1, 1]} : vector<7x2x14x4xf32> to vector<7x1x14x4xf32>
    %48 = vector.shape_cast %47 : vector<7x1x14x4xf32> to vector<7x14x4xf32>
    %49 = arith.addf %46, %48 : vector<7x14x4xf32>
    %50 = vector.shape_cast %49 : vector<7x14x4xf32> to vector<7x7x2x4xf32>
    %51 = vector.extract_strided_slice %50 {offsets = [0, 0, 0, 0], sizes = [7, 7, 1, 4], strides = [1, 1, 1, 1]} : vector<7x7x2x4xf32> to vector<7x7x1x4xf32>
    %52 = vector.shape_cast %51 : vector<7x7x1x4xf32> to vector<7x7x4xf32>
    %53 = vector.extract_strided_slice %50 {offsets = [0, 0, 1, 0], sizes = [7, 7, 1, 4], strides = [1, 1, 1, 1]} : vector<7x7x2x4xf32> to vector<7x7x1x4xf32>
    %54 = vector.shape_cast %53 : vector<7x7x1x4xf32> to vector<7x7x4xf32>
    %55 = arith.addf %52, %54 : vector<7x7x4xf32>
    %cst_19 = arith.constant 2.500000e-01 : f32
    %56 = vector.broadcast %cst_19 : f32 to vector<7x7x4xf32>
    %57 = arith.mulf %55, %56 : vector<7x7x4xf32>
    %58 = vector.extract_strided_slice %57 {offsets = [0, 0, 0], sizes = [5, 5, 4], strides = [1, 1, 1]} : vector<7x7x4xf32> to vector<5x5x4xf32>
    %59 = vector.extract_strided_slice %57 {offsets = [0, 1, 0], sizes = [5, 5, 4], strides = [1, 1, 1]} : vector<7x7x4xf32> to vector<5x5x4xf32>
    %60 = vector.extract_strided_slice %57 {offsets = [0, 2, 0], sizes = [5, 5, 4], strides = [1, 1, 1]} : vector<7x7x4xf32> to vector<5x5x4xf32>
    %61 = vector.extract_strided_slice %57 {offsets = [1, 0, 0], sizes = [5, 5, 4], strides = [1, 1, 1]} : vector<7x7x4xf32> to vector<5x5x4xf32>
    %62 = vector.extract_strided_slice %57 {offsets = [1, 1, 0], sizes = [5, 5, 4], strides = [1, 1, 1]} : vector<7x7x4xf32> to vector<5x5x4xf32>
    %63 = vector.extract_strided_slice %57 {offsets = [1, 2, 0], sizes = [5, 5, 4], strides = [1, 1, 1]} : vector<7x7x4xf32> to vector<5x5x4xf32>
    %64 = vector.extract_strided_slice %57 {offsets = [2, 0, 0], sizes = [5, 5, 4], strides = [1, 1, 1]} : vector<7x7x4xf32> to vector<5x5x4xf32>
    %65 = vector.extract_strided_slice %57 {offsets = [2, 1, 0], sizes = [5, 5, 4], strides = [1, 1, 1]} : vector<7x7x4xf32> to vector<5x5x4xf32>
    %66 = vector.extract_strided_slice %57 {offsets = [2, 2, 0], sizes = [5, 5, 4], strides = [1, 1, 1]} : vector<7x7x4xf32> to vector<5x5x4xf32>
    %67 = tpu.concatenate %58, %59, %60, %61, %62, %63, %64, %65, %66 in 2 : vector<5x5x4xf32>, vector<5x5x4xf32>, vector<5x5x4xf32>, vector<5x5x4xf32>, vector<5x5x4xf32>, vector<5x5x4xf32>, vector<5x5x4xf32>, vector<5x5x4xf32>, vector<5x5x4xf32> -> vector<5x5x36xf32>
    %68 = vector.shape_cast %67 : vector<5x5x36xf32> to vector<25x36xf32>
    %cst_20 = arith.constant dense<0.000000e+00> : vector<25x4xf32>
    %69 = tpu.matmul %68, %4, %cst_20 {dimension_numbers = #tpu.dot_dimension_numbers<[1], [0], [0], [1], [0, 0, 1, 1], [], []>} : vector<25x36xf32>, vector<36x4xf32>, vector<25x4xf32> -> vector<25x4xf32>
    %70 = vector.broadcast %5 : vector<1x4xf32> to vector<25x4xf32>
    %71 = arith.addf %69, %70 : vector<25x4xf32>
    %72 = arith.negf %71 : vector<25x4xf32>
    %73 = math.exp %72 : vector<25x4xf32>
    %cst_21 = arith.constant 1.000000e+00 : f32
    %74 = vector.broadcast %cst_21 : f32 to vector<25x4xf32>
    %75 = arith.addf %74, %73 : vector<25x4xf32>
    %76 = arith.divf %74, %75 : vector<25x4xf32>
    %77 = arith.mulf %71, %76 : vector<25x4xf32>
    %78 = vector.shape_cast %77 : vector<25x4xf32> to vector<5x5x4xf32>
    %79 = vector.extract_strided_slice %78 {offsets = [0, 0, 0], sizes = [4, 5, 4], strides = [1, 1, 1]} : vector<5x5x4xf32> to vector<4x5x4xf32>
    %80 = vector.shape_cast %79 : vector<4x5x4xf32> to vector<2x2x5x4xf32>
    %81 = vector.extract_strided_slice %80 {offsets = [0, 0, 0, 0], sizes = [2, 1, 5, 4], strides = [1, 1, 1, 1]} : vector<2x2x5x4xf32> to vector<2x1x5x4xf32>
    %82 = vector.shape_cast %81 : vector<2x1x5x4xf32> to vector<2x5x4xf32>
    %83 = vector.extract_strided_slice %80 {offsets = [0, 1, 0, 0], sizes = [2, 1, 5, 4], strides = [1, 1, 1, 1]} : vector<2x2x5x4xf32> to vector<2x1x5x4xf32>
    %84 = vector.shape_cast %83 : vector<2x1x5x4xf32> to vector<2x5x4xf32>
    %85 = arith.addf %82, %84 : vector<2x5x4xf32>
    %86 = vector.extract_strided_slice %85 {offsets = [0, 0, 0], sizes = [2, 4, 4], strides = [1, 1, 1]} : vector<2x5x4xf32> to vector<2x4x4xf32>
    %87 = vector.shape_cast %86 : vector<2x4x4xf32> to vector<2x2x2x4xf32>
    %88 = vector.extract_strided_slice %87 {offsets = [0, 0, 0, 0], sizes = [2, 2, 1, 4], strides = [1, 1, 1, 1]} : vector<2x2x2x4xf32> to vector<2x2x1x4xf32>
    %89 = vector.shape_cast %88 : vector<2x2x1x4xf32> to vector<2x2x4xf32>
    %90 = vector.extract_strided_slice %87 {offsets = [0, 0, 1, 0], sizes = [2, 2, 1, 4], strides = [1, 1, 1, 1]} : vector<2x2x2x4xf32> to vector<2x2x1x4xf32>
    %91 = vector.shape_cast %90 : vector<2x2x1x4xf32> to vector<2x2x4xf32>
    %92 = arith.addf %89, %91 : vector<2x2x4xf32>
    %cst_22 = arith.constant 2.500000e-01 : f32
    %93 = vector.broadcast %cst_22 : f32 to vector<2x2x4xf32>
    %94 = arith.mulf %92, %93 : vector<2x2x4xf32>
    %95 = vector.shape_cast %94 : vector<2x2x4xf32> to vector<2x8xf32>
    %cst_23 = arith.constant dense<0.000000e+00> : vector<2x32xf32>
    %96 = tpu.matmul %95, %6, %cst_23 {dimension_numbers = #tpu.dot_dimension_numbers<[1], [0], [0], [1], [0, 0, 1, 1], [], []>} : vector<2x8xf32>, vector<8x32xf32>, vector<2x32xf32> -> vector<2x32xf32>
    %97 = vector.broadcast %7 : vector<1x32xf32> to vector<2x32xf32>
    %98 = arith.addf %96, %97 : vector<2x32xf32>
    %c0_24 = arith.constant 0 : index
    %c0_25 = arith.constant 0 : index
    %c0_26 = arith.constant 0 : index
    %99 = vector.load %arg10[%c0_24, %c0_25, %c0_26] : memref<2x2x32xf32, #tpu.memory_space<vmem>>, vector<1x2x32xf32>
    %100 = vector.shape_cast %99 : vector<1x2x32xf32> to vector<2x32xf32>
    %101 = vector.shape_cast %98 : vector<2x32xf32> to vector<1x2x32xf32>
    tpu.vector_store %arg10[%c0_24, %c0_25, %c0_26], %101 {strides = array<i32>} : memref<2x2x32xf32, #tpu.memory_space<vmem>>, vector<1x2x32xf32>,
    %c1 = arith.constant 1 : index
    %c0_27 = arith.constant 0 : index
    %c0_28 = arith.constant 0 : index
    %102 = vector.load %arg1[%c1, %c0_27, %c0_28] : memref<2x16x16xf32, #tpu.memory_space<vmem>>, vector<1x16x16xf32>
    %103 = vector.shape_cast %102 : vector<1x16x16xf32> to vector<16x16xf32>
    %104 = vector.broadcast %0 : vector<1x16xf32> to vector<16x16xf32>
    %105 = arith.mulf %103, %104 : vector<16x16xf32>
    %106 = vector.broadcast %1 : vector<1x16xf32> to vector<16x16xf32>
    %107 = arith.addf %105, %106 : vector<16x16xf32>
    %108 = vector.extract_strided_slice %107 {offsets = [0, 0], sizes = [14, 14], strides = [1, 1]} : vector<16x16xf32> to vector<14x14xf32>
    %109 = vector.extract_strided_slice %107 {offsets = [0, 1], sizes = [14, 14], strides = [1, 1]} : vector<16x16xf32> to vector<14x14xf32>
    %110 = vector.extract_strided_slice %107 {offsets = [0, 2], sizes = [14, 14], strides = [1, 1]} : vector<16x16xf32> to vector<14x14xf32>
    %111 = vector.extract_strided_slice %107 {offsets = [1, 0], sizes = [14, 14], strides = [1, 1]} : vector<16x16xf32> to vector<14x14xf32>
    %112 = vector.extract_strided_slice %107 {offsets = [1, 1], sizes = [14, 14], strides = [1, 1]} : vector<16x16xf32> to vector<14x14xf32>
    %113 = vector.extract_strided_slice %107 {offsets = [1, 2], sizes = [14, 14], strides = [1, 1]} : vector<16x16xf32> to vector<14x14xf32>
    %114 = vector.extract_strided_slice %107 {offsets = [2, 0], sizes = [14, 14], strides = [1, 1]} : vector<16x16xf32> to vector<14x14xf32>
    %115 = vector.extract_strided_slice %107 {offsets = [2, 1], sizes = [14, 14], strides = [1, 1]} : vector<16x16xf32> to vector<14x14xf32>
    %116 = vector.extract_strided_slice %107 {offsets = [2, 2], sizes = [14, 14], strides = [1, 1]} : vector<16x16xf32> to vector<14x14xf32>
    %117 = vector.shape_cast %108 : vector<14x14xf32> to vector<14x14x1xf32>
    %118 = vector.shape_cast %109 : vector<14x14xf32> to vector<14x14x1xf32>
    %119 = vector.shape_cast %110 : vector<14x14xf32> to vector<14x14x1xf32>
    %120 = vector.shape_cast %111 : vector<14x14xf32> to vector<14x14x1xf32>
    %121 = vector.shape_cast %112 : vector<14x14xf32> to vector<14x14x1xf32>
    %122 = vector.shape_cast %113 : vector<14x14xf32> to vector<14x14x1xf32>
    %123 = vector.shape_cast %114 : vector<14x14xf32> to vector<14x14x1xf32>
    %124 = vector.shape_cast %115 : vector<14x14xf32> to vector<14x14x1xf32>
    %125 = vector.shape_cast %116 : vector<14x14xf32> to vector<14x14x1xf32>
    %126 = tpu.concatenate %117, %118, %119, %120, %121, %122, %123, %124, %125 in 2 : vector<14x14x1xf32>, vector<14x14x1xf32>, vector<14x14x1xf32>, vector<14x14x1xf32>, vector<14x14x1xf32>, vector<14x14x1xf32>, vector<14x14x1xf32>, vector<14x14x1xf32>, vector<14x14x1xf32> -> vector<14x14x9xf32>
    %127 = vector.shape_cast %126 : vector<14x14x9xf32> to vector<196x9xf32>
    %cst_29 = arith.constant dense<0.000000e+00> : vector<196x4xf32>
    %128 = tpu.matmul %127, %2, %cst_29 {dimension_numbers = #tpu.dot_dimension_numbers<[1], [0], [0], [1], [0, 0, 1, 1], [], []>} : vector<196x9xf32>, vector<9x4xf32>, vector<196x4xf32> -> vector<196x4xf32>
    %129 = vector.broadcast %3 : vector<1x4xf32> to vector<196x4xf32>
    %130 = arith.addf %128, %129 : vector<196x4xf32>
    %131 = arith.negf %130 : vector<196x4xf32>
    %132 = math.exp %131 : vector<196x4xf32>
    %cst_30 = arith.constant 1.000000e+00 : f32
    %133 = vector.broadcast %cst_30 : f32 to vector<196x4xf32>
    %134 = arith.addf %133, %132 : vector<196x4xf32>
    %135 = arith.divf %133, %134 : vector<196x4xf32>
    %136 = arith.mulf %130, %135 : vector<196x4xf32>
    %137 = vector.shape_cast %136 : vector<196x4xf32> to vector<14x14x4xf32>
    %138 = vector.shape_cast %137 : vector<14x14x4xf32> to vector<7x2x14x4xf32>
    %139 = vector.extract_strided_slice %138 {offsets = [0, 0, 0, 0], sizes = [7, 1, 14, 4], strides = [1, 1, 1, 1]} : vector<7x2x14x4xf32> to vector<7x1x14x4xf32>
    %140 = vector.shape_cast %139 : vector<7x1x14x4xf32> to vector<7x14x4xf32>
    %141 = vector.extract_strided_slice %138 {offsets = [0, 1, 0, 0], sizes = [7, 1, 14, 4], strides = [1, 1, 1, 1]} : vector<7x2x14x4xf32> to vector<7x1x14x4xf32>
    %142 = vector.shape_cast %141 : vector<7x1x14x4xf32> to vector<7x14x4xf32>
    %143 = arith.addf %140, %142 : vector<7x14x4xf32>
    %144 = vector.shape_cast %143 : vector<7x14x4xf32> to vector<7x7x2x4xf32>
    %145 = vector.extract_strided_slice %144 {offsets = [0, 0, 0, 0], sizes = [7, 7, 1, 4], strides = [1, 1, 1, 1]} : vector<7x7x2x4xf32> to vector<7x7x1x4xf32>
    %146 = vector.shape_cast %145 : vector<7x7x1x4xf32> to vector<7x7x4xf32>
    %147 = vector.extract_strided_slice %144 {offsets = [0, 0, 1, 0], sizes = [7, 7, 1, 4], strides = [1, 1, 1, 1]} : vector<7x7x2x4xf32> to vector<7x7x1x4xf32>
    %148 = vector.shape_cast %147 : vector<7x7x1x4xf32> to vector<7x7x4xf32>
    %149 = arith.addf %146, %148 : vector<7x7x4xf32>
    %cst_31 = arith.constant 2.500000e-01 : f32
    %150 = vector.broadcast %cst_31 : f32 to vector<7x7x4xf32>
    %151 = arith.mulf %149, %150 : vector<7x7x4xf32>
    %152 = vector.extract_strided_slice %151 {offsets = [0, 0, 0], sizes = [5, 5, 4], strides = [1, 1, 1]} : vector<7x7x4xf32> to vector<5x5x4xf32>
    %153 = vector.extract_strided_slice %151 {offsets = [0, 1, 0], sizes = [5, 5, 4], strides = [1, 1, 1]} : vector<7x7x4xf32> to vector<5x5x4xf32>
    %154 = vector.extract_strided_slice %151 {offsets = [0, 2, 0], sizes = [5, 5, 4], strides = [1, 1, 1]} : vector<7x7x4xf32> to vector<5x5x4xf32>
    %155 = vector.extract_strided_slice %151 {offsets = [1, 0, 0], sizes = [5, 5, 4], strides = [1, 1, 1]} : vector<7x7x4xf32> to vector<5x5x4xf32>
    %156 = vector.extract_strided_slice %151 {offsets = [1, 1, 0], sizes = [5, 5, 4], strides = [1, 1, 1]} : vector<7x7x4xf32> to vector<5x5x4xf32>
    %157 = vector.extract_strided_slice %151 {offsets = [1, 2, 0], sizes = [5, 5, 4], strides = [1, 1, 1]} : vector<7x7x4xf32> to vector<5x5x4xf32>
    %158 = vector.extract_strided_slice %151 {offsets = [2, 0, 0], sizes = [5, 5, 4], strides = [1, 1, 1]} : vector<7x7x4xf32> to vector<5x5x4xf32>
    %159 = vector.extract_strided_slice %151 {offsets = [2, 1, 0], sizes = [5, 5, 4], strides = [1, 1, 1]} : vector<7x7x4xf32> to vector<5x5x4xf32>
    %160 = vector.extract_strided_slice %151 {offsets = [2, 2, 0], sizes = [5, 5, 4], strides = [1, 1, 1]} : vector<7x7x4xf32> to vector<5x5x4xf32>
    %161 = tpu.concatenate %152, %153, %154, %155, %156, %157, %158, %159, %160 in 2 : vector<5x5x4xf32>, vector<5x5x4xf32>, vector<5x5x4xf32>, vector<5x5x4xf32>, vector<5x5x4xf32>, vector<5x5x4xf32>, vector<5x5x4xf32>, vector<5x5x4xf32>, vector<5x5x4xf32> -> vector<5x5x36xf32>
    %162 = vector.shape_cast %161 : vector<5x5x36xf32> to vector<25x36xf32>
    %cst_32 = arith.constant dense<0.000000e+00> : vector<25x4xf32>
    %163 = tpu.matmul %162, %4, %cst_32 {dimension_numbers = #tpu.dot_dimension_numbers<[1], [0], [0], [1], [0, 0, 1, 1], [], []>} : vector<25x36xf32>, vector<36x4xf32>, vector<25x4xf32> -> vector<25x4xf32>
    %164 = vector.broadcast %5 : vector<1x4xf32> to vector<25x4xf32>
    %165 = arith.addf %163, %164 : vector<25x4xf32>
    %166 = arith.negf %165 : vector<25x4xf32>
    %167 = math.exp %166 : vector<25x4xf32>
    %cst_33 = arith.constant 1.000000e+00 : f32
    %168 = vector.broadcast %cst_33 : f32 to vector<25x4xf32>
    %169 = arith.addf %168, %167 : vector<25x4xf32>
    %170 = arith.divf %168, %169 : vector<25x4xf32>
    %171 = arith.mulf %165, %170 : vector<25x4xf32>
    %172 = vector.shape_cast %171 : vector<25x4xf32> to vector<5x5x4xf32>
    %173 = vector.extract_strided_slice %172 {offsets = [0, 0, 0], sizes = [4, 5, 4], strides = [1, 1, 1]} : vector<5x5x4xf32> to vector<4x5x4xf32>
    %174 = vector.shape_cast %173 : vector<4x5x4xf32> to vector<2x2x5x4xf32>
    %175 = vector.extract_strided_slice %174 {offsets = [0, 0, 0, 0], sizes = [2, 1, 5, 4], strides = [1, 1, 1, 1]} : vector<2x2x5x4xf32> to vector<2x1x5x4xf32>
    %176 = vector.shape_cast %175 : vector<2x1x5x4xf32> to vector<2x5x4xf32>
    %177 = vector.extract_strided_slice %174 {offsets = [0, 1, 0, 0], sizes = [2, 1, 5, 4], strides = [1, 1, 1, 1]} : vector<2x2x5x4xf32> to vector<2x1x5x4xf32>
    %178 = vector.shape_cast %177 : vector<2x1x5x4xf32> to vector<2x5x4xf32>
    %179 = arith.addf %176, %178 : vector<2x5x4xf32>
    %180 = vector.extract_strided_slice %179 {offsets = [0, 0, 0], sizes = [2, 4, 4], strides = [1, 1, 1]} : vector<2x5x4xf32> to vector<2x4x4xf32>
    %181 = vector.shape_cast %180 : vector<2x4x4xf32> to vector<2x2x2x4xf32>
    %182 = vector.extract_strided_slice %181 {offsets = [0, 0, 0, 0], sizes = [2, 2, 1, 4], strides = [1, 1, 1, 1]} : vector<2x2x2x4xf32> to vector<2x2x1x4xf32>
    %183 = vector.shape_cast %182 : vector<2x2x1x4xf32> to vector<2x2x4xf32>
    %184 = vector.extract_strided_slice %181 {offsets = [0, 0, 1, 0], sizes = [2, 2, 1, 4], strides = [1, 1, 1, 1]} : vector<2x2x2x4xf32> to vector<2x2x1x4xf32>
    %185 = vector.shape_cast %184 : vector<2x2x1x4xf32> to vector<2x2x4xf32>
    %186 = arith.addf %183, %185 : vector<2x2x4xf32>
    %cst_34 = arith.constant 2.500000e-01 : f32
    %187 = vector.broadcast %cst_34 : f32 to vector<2x2x4xf32>
    %188 = arith.mulf %186, %187 : vector<2x2x4xf32>
    %189 = vector.shape_cast %188 : vector<2x2x4xf32> to vector<2x8xf32>
    %cst_35 = arith.constant dense<0.000000e+00> : vector<2x32xf32>
    %190 = tpu.matmul %189, %6, %cst_35 {dimension_numbers = #tpu.dot_dimension_numbers<[1], [0], [0], [1], [0, 0, 1, 1], [], []>} : vector<2x8xf32>, vector<8x32xf32>, vector<2x32xf32> -> vector<2x32xf32>
    %191 = vector.broadcast %7 : vector<1x32xf32> to vector<2x32xf32>
    %192 = arith.addf %190, %191 : vector<2x32xf32>
    %c1_36 = arith.constant 1 : index
    %c0_37 = arith.constant 0 : index
    %c0_38 = arith.constant 0 : index
    %193 = vector.load %arg10[%c1_36, %c0_37, %c0_38] : memref<2x2x32xf32, #tpu.memory_space<vmem>>, vector<1x2x32xf32>
    %194 = vector.shape_cast %193 : vector<1x2x32xf32> to vector<2x32xf32>
    %195 = vector.shape_cast %192 : vector<2x32xf32> to vector<1x2x32xf32>
    tpu.vector_store %arg10[%c1_36, %c0_37, %c0_38], %195 {strides = array<i32>} : memref<2x2x32xf32, #tpu.memory_space<vmem>>, vector<1x2x32xf32>,
    return
  }
  func.func @transform_0(%arg0: i32) -> (i32, i32, i32) {
    %c0_i32 = arith.constant 0 : i32
    %c0_i32_0 = arith.constant 0 : i32
    %c0_i32_1 = arith.constant 0 : i32
    return %arg0, %c0_i32, %c0_i32_0 : i32, i32, i32
  }
  func.func @transform_1(%arg0: i32) -> (i32, i32) {
    %c0_i32 = arith.constant 0 : i32
    %c0_i32_0 = arith.constant 0 : i32
    %c0_i32_1 = arith.constant 0 : i32
    return %c0_i32, %c0_i32_0 : i32, i32
  }
  func.func @transform_2(%arg0: i32) -> (i32, i32) {
    %c0_i32 = arith.constant 0 : i32
    %c0_i32_0 = arith.constant 0 : i32
    %c0_i32_1 = arith.constant 0 : i32
    return %c0_i32, %c0_i32_0 : i32, i32
  }
  func.func @transform_3(%arg0: i32) -> (i32, i32) {
    %c0_i32 = arith.constant 0 : i32
    %c0_i32_0 = arith.constant 0 : i32
    %c0_i32_1 = arith.constant 0 : i32
    return %c0_i32, %c0_i32_0 : i32, i32
  }
  func.func @transform_4(%arg0: i32) -> (i32, i32) {
    %c0_i32 = arith.constant 0 : i32
    %c0_i32_0 = arith.constant 0 : i32
    %c0_i32_1 = arith.constant 0 : i32
    return %c0_i32, %c0_i32_0 : i32, i32
  }
  func.func @transform_5(%arg0: i32) -> (i32, i32) {
    %c0_i32 = arith.constant 0 : i32
    %c0_i32_0 = arith.constant 0 : i32
    %c0_i32_1 = arith.constant 0 : i32
    return %c0_i32, %c0_i32_0 : i32, i32
  }
  func.func @transform_6(%arg0: i32) -> (i32, i32) {
    %c0_i32 = arith.constant 0 : i32
    %c0_i32_0 = arith.constant 0 : i32
    %c0_i32_1 = arith.constant 0 : i32
    return %c0_i32, %c0_i32_0 : i32, i32
  }
  func.func @transform_7(%arg0: i32) -> (i32, i32) {
    %c0_i32 = arith.constant 0 : i32
    %c0_i32_0 = arith.constant 0 : i32
    %c0_i32_1 = arith.constant 0 : i32
    return %c0_i32, %c0_i32_0 : i32, i32
  }
  func.func @transform_8(%arg0: i32) -> (i32, i32) {
    %c0_i32 = arith.constant 0 : i32
    %c0_i32_0 = arith.constant 0 : i32
    %c0_i32_1 = arith.constant 0 : i32
    return %c0_i32, %c0_i32_0 : i32, i32
  }
  func.func @transform_9(%arg0: i32) -> (i32, i32, i32) {
    %c0_i32 = arith.constant 0 : i32
    %c0_i32_0 = arith.constant 0 : i32
    %c0_i32_1 = arith.constant 0 : i32
    return %arg0, %c0_i32, %c0_i32_0 : i32, i32, i32
  }
}

</mosaic_0001>

<bundles_post_ra>
// kernel: tpu_custom_call.1
= control target key start
LH: loop header
LB: loop body
LE: loop exit
PB: predicated region body
PF: predicated region fallthrough
CT: control target
= control target key end

     0   :  { %14 = vsyncpa [#allocation3], 0  ;;  %s12932_s0 = inlined_call_operand.hbm [shape: f32[4,16,16], index: 0, kind: input, shape index: {}]   ;;  %s12933_s1 = inlined_call_operand.vmem [shape: f32[1,16], index: 1, kind: input, shape index: {}]   ;;  %s12934_s2 = inlined_call_operand.vmem [shape: f32[1,16], index: 2, kind: input, shape index: {}]   ;;  %s12935_s3 = inlined_call_operand.vmem [shape: f32[9,4], index: 3, kind: input, shape index: {}]   ;;  %s12936_s4 = inlined_call_operand.vmem [shape: f32[1,4], index: 4, kind: input, shape index: {}]   ;;  %s12937_s5 = inlined_call_operand.vmem [shape: f32[36,4], index: 5, kind: input, shape index: {}]   ;;  %s12938_s6 = inlined_call_operand.vmem [shape: f32[1,4], index: 6, kind: input, shape index: {}]   ;;  %s12939_s7 = inlined_call_operand.vmem [shape: f32[8,32], index: 7, kind: input, shape index: {}]   ;;  %s12940_s8 = inlined_call_operand.vmem [shape: f32[1,32], index: 8, kind: input, shape index: {}]   ;;  %s12941_s9 = inlined_call_operand.hbm [shape: f32[4,2,32], index: 9, kind: output, shape index: {}]  }
   0x1   :  { %16 = vsyncpa [#allocation3 + $0x1], 0 }
   0x2   :  { %17 = vsyncpa [#allocation4], 0 }
   0x3   :  { %19 = vsyncpa [#allocation4 + $0x1], 0  ;;  %s9698_s30 = smov 0   ;;  %s9700_s10 = smov 0  }
   0x4   :  { %s9702_s11 = smov 0   ;;  %s9704_s12 = smov 0  }
   0x5 LB: > { %12955 = sst [smem:[#allocation8_spill]] %s9625_s11  ;;  %s9719_s13 = sadd.s32 4294967295, %s9629_s12   ;;  %s9629_s12 = sphi %s9704_s12, %s13057_s12   ;;  %s9625_s11 = sphi %s9702_s11, %s13054_s11   ;;  %s9621_s10 = sphi %s9700_s10, %s13056_s10   ;;  %s9617_s30 = sphi %s9698_s30, %s13055_s30  }
   0x6   : > { %s8717_s14 = sadd.s32 4294967294, %s9629_s12   ;;  %s9723_s15 = sadd.s32 1, %s9629_s12  }
   0x7   : > { %s32_s16 = sadd.s32 1, %s9625_s11  ;;  %s29_s17 = ssub.s32 %s9629_s12, %s9723_s15 }
   0x8   : > { %p39_p0 = scmp.ne.s32.totalorder %s9625_s11, %s9621_s10  ;;  %p30_p1 = scmp.eq.s32.totalorder %s29_s17, 0 }
   0x9   : > { %p40_p2 = scmp.eq.s32.totalorder %s9629_s12, 0  ;;  %p45_p3 = scmp.ne.s32.totalorder %s9621_s10, %s9617_s30 }
   0xa   : > { %p46_p4 = scmp.eq.s32.totalorder %s9719_s13, 0  ;;  %p237_p7 = scmp.eq.s32.totalorder %s9719_s13, 1 }
   0xb   : > { %s9735_s18 = scalar_select %p30_p1, %s9625_s11, %s32_s16  }
   0xc   : > { %p9737_p5 = por %p40_p2, %p39_p0  ;;  %p9741_p6 = por %p46_p4, %p45_p3 }
   0xd   : > { %12956 = sst [smem:[#allocation9_spill]] %s9735_s18  ;;  %p243_p8 = scmp.eq.s32.totalorder %s8717_s14, 1 }
   0xe   : > { %s12958_s20 = scalar_select %p9741_p6, 1, 0 }
   0xf   : > { %p9255_p10 = scmp.lt.s32.totalorder %s9629_s12, 2  ;;  %p9748_p11 = por %p237_p7, %p39_p0 }
  0x10   : > { %p9752_p12 = por %p243_p8, %p45_p3  ;;  %s287_s23 = sand.u32 1, %s9625_s11  }
  0x11   : > { %s12959_s21 = scalar_select %p9748_p11, 1, 0 }
  0x12   : > { %s12960_s22 = scalar_select %p9752_p12, 1, 0 }
  0x13   : > { %s8965_s24 = sshll.u32 %s9629_s12, 9  ;;  %s8720_s25 = sshll.u32 %s287_s23, 5 }
  0x14   : > { %s9761_s28 = scalar_lea.hbm %s12932_s0, %s8965_s24  ;;  %s291_s29 = scalar_lea.vmem [#allocation2], %s8720_s25 }
  0x15   : > { %s299_s14 = sshll.u32 %s291_s29, 4  ;;  %p9765_p13 = pnand %p9255_p10, %p9737_p5  ;;  %s9769_s14 = int_to_ptr.vmem [resolvable:$true] %s299_s14 }
  0x16   : > { %s9771_s17 = scalar_lea.sflag [#allocation3], %s287_s23  ;;  %s9537_s18 = scalar_lea.hbm %s9761_s28, 512 }
  0x17   : > { %p9538_p0 = scmp.ne.s32.totalorder %s9761_s28, %s9537_s18  ;;  %p9539_p1 = pneg %p9765_p13 }
  0x18   : > { %s9542_s25 = scalar_lea.hbm %s12932_s0, 1024  ;;  %p9543_p4 = scmp.lt.s32.totalorder %s9761_s28, %s12932_s0 }
  0x19   : > { %p9540_p2 = pnand %p9539_p1, %p9538_p0  ;;  %p9544_p5 = scmp.lt.s32.totalorder %s9542_s25, %s9537_s18 }
  0x1b   : > { %p9541_p3 = pneg %p9540_p2  ;;  %p9545_p7 = por %p9544_p5, %p9543_p4 }
  0x1d   : > { %p9546_p8 = pnand %p9545_p7, %p9541_p3 }
  0x1f   : > { %9549 = shalt.err (!%p9546_p8)
}
  0x20   : > { %s9550_s23 = scalar_lea.vmem %s9769_s14, 512  ;;  %s9631_s29 = smov [#allocation2]  }
  0x21   : > { %p9551_p10 = scmp.ne.s32.totalorder %s9769_s14, %s9550_s23  ;;  %s9555_s11 = sshll.u32 %s9631_s29, 4  ;;  %s9556_s11 = int_to_ptr.vmem [resolvable:$false] %s9555_s11 }
  0x22   : > { %s9557_s24 = scalar_lea.vmem %s9556_s11, 1024  ;;  %p9558_p2 = scmp.lt.s32.totalorder %s9769_s14, %s9556_s11 }
  0x23   : > { %p9553_p9 = pnand %p9551_p10, %p9539_p1  ;;  %p9559_p12 = scmp.lt.s32.totalorder %s9557_s24, %s9550_s23 }
  0x25   : > { %p9554_p0 = pneg %p9553_p9  ;;  %p9560_p11 = por %p9559_p12, %p9558_p2 }
  0x27   : > { %p9561_p6 = pnand %p9560_p11, %p9554_p0 }
  0x29   : > { %9564 = shalt.err (!%p9561_p6)
}
  0x2a   : > { %s9632_s18 = smov 128   ;;  %s9633_s26 = smov 8  }
  0x2b   : > { %9250 = dma.hbm_to_vmem [thread:$0]  (!%p9765_p13), %s9761_s28, 512, %s9769_s14, %s9771_s17, %s9632_s18, %s9632_s18, %s9633_s26  }
  0x2c   : > { %p8724_p9 = scmp.ge.s32.totalorder %s9629_s12, 1  ;;  %p307_p1 = scmp.lt.s32.totalorder %s9629_s12, 3 }
  0x2e   : > { %p308_p3 = pnand %p8724_p9, %p307_p1 }
  0x2f   : > { %s9795_s11 = sand.u32 (!%p308_p3), 1, %s9621_s10   ;;  %p12962_p6 = scmp.ne.s32.totalorder (!%p308_p3), %s12958_s20, 0 }
  0x30   : > { %311 = sbr.rel (%p308_p3) target bundleno = 2227 (0x8b3), region = 56  ;;  %s8725_s25 = sshll.u32 (!%p308_p3), %s9795_s11, 5 }
  0x31   : > { %s314_s19 = scalar_lea.sflag (!%p308_p3), [#allocation3], %s9795_s11  ;;  %s9799_s27 = scalar_lea.vmem (!%p308_p3), [#allocation2], %s8725_s25 }
  0x35   : > { %9608 = dma.done.wait (%p12962_p6), %s314_s19, 512  }
  0x36   : > { %9610 = vsyncadd (%p12962_p6), %s314_s19, 4294966784  ;;  %v385_v0 = vlaneseq  ;;  %v9810_v2 = vld [vmem:[%s12933_s1] ss:$0 sm:$0xff]  ;;  %v357_v13 = vld [vmem:[%s12935_s3 + $0x8] sm:$0x1]  ;;  %vm12950_vm0 = vcmask 1040384  }
  0x37   : > { %v9815_v3 = vld [vmem:[%s12934_s2] ss:$0 sm:$0xff]  ;;  %v9634_v14 = vmov 0.0   ;;  %vm9635_vm1 = vmmov 0   ;;  %v368_v26 = vld [vmem:[%s9799_s27 + $0x8] sm:$0xff]  ;;  %vm817_vm2 = vcmask 7168  }
  0x38   : > { %v9805_v1 = vshrl.u32 %v385_v0, 7  ;;  %v367_v4 = vld [vmem:[%s9799_s27] sm:$0xff]  ;;  %9043 = vmatprep.subr.mxu0 %v9634_v14  ;;  %9047 = vmatprep.mubr.msk.f32.mxu0 %vm9635_vm1, %v9634_v14  ;;  %v376_v27 = vmul.f32 %v9810_v2, %v368_v26  ;;  %vm846_vm3 = vcmask 15360   ;;  %vm875_vm4 = vcmask 23552   ;;  %s9637_s25 = smov 4   ;;  %s9638_s19 = smov 8  }
  0x39   : > { %v375_v5 = vmul.f32 %v9810_v2, %v367_v4  ;;  %9044 = vmatpush3.msk.msra.mxu0 %vm12950_vm0, %v357_v13  ;;  %v356_v15 = vld [vmem:[%s12935_s3] sm:$0xff]  ;;  %v9636_v40 = vmov 1983009808   ;;  %vm904_vm5 = vcmask 31744   ;;  %vm933_vm6 = vcmask 39936   ;;  %s9639_s28 = smov 12  }
  0x3a   : > { %v9820_v6 = vsub.s32 0, %v9805_v1  ;;  %v9826_v8 = vsub.s32 1, %v9805_v1  ;;  %v9833_v11 = vsub.s32 2, %v9805_v1  ;;  %9045 = vmatprep.subr.mxu0 %v9634_v14  ;;  %v9849_v16 = vsub.s32 3, %v9805_v1  ;;  %s9640_s14 = smov 20   ;;  %s9641_s16 = smov 16  }
  0x3b   : > { %v9823_v7 = vadd.f32 %v9815_v3, %v375_v5  ;;  %9046 = vmatpush3.msra.mxu0 %v356_v15  ;;  %v9854_v18 = vsub.s32 4, %v9805_v1  ;;  %v9859_v20 = vsub.s32 5, %v9805_v1  ;;  %v9864_v22 = vsub.s32 6, %v9805_v1  ;;  %s9642_s17 = smov 24   ;;  %s9643_s20 = smov 32  }
  0x3c   : > { %v9869_v24 = vsub.s32 7, %v9805_v1  ;;  %v9876_v28 = vadd.f32 %v9815_v3, %v376_v27  ;;  %v1079_v41 = vunpack.c.l.s4 %v9636_v40  ;;  %vm962_vm7 = vcmask 48128   ;;  %s12952_s23 = smov 28   ;;  %s8726_s18 = sshll.u32 %s9795_s11, 2 }
  0x3d   : > { %v388_v9 = vrot.slane %v9823_v7, %v9820_v6  ;;  %v399_v10 = vrot.slane %v9823_v7, %v9826_v8  ;;  %v410_v12 = vrot.slane %v9823_v7, %v9833_v11  ;;  %v421_v17 = vrot.slane %v9823_v7, %v9849_v16  ;;  %s12125_s29 = scalar_lea.vmem [#allocation5], %s8726_s18  ;;  %s8966_s18 = sshll.u32 %s9719_s13, 6 }
  0x3e   : > { %v432_v19 = vrot.slane %v9823_v7, %v9854_v18  ;;  %v443_v21 = vrot.slane %v9823_v7, %v9859_v20  ;;  %v454_v23 = vrot.slane %v9823_v7, %v9864_v22  ;;  %v465_v25 = vrot.slane %v9823_v7, %v9869_v24  ;;  %s8631_s13 = scalar_lea.sflag [#allocation4], %s9795_s11  ;;  %p13050_p12 = scmp.ne.s32.totalorder %s12959_s21, 0 }
  0x3f   : > { %653 = vbcast.lane.b32.xlu1 %v388_v9, 258  ;;  %390 = vbcast.lane.b32.xlu0 %v388_v9, 256  ;;  %v476_v29 = vrot.slane %v9876_v28, %v9820_v6  ;;  %v487_v30 = vrot.slane %v9876_v28, %v9826_v8  ;;  %v498_v31 = vrot.slane %v9876_v28, %v9833_v11  ;;  %v1080_v46 = vunpack.c.0.s8 %v1079_v41 }
  0x40   : > { %v509_v42 = vrot.slane %v9876_v28, %v9849_v16  ;;  %vm991_vm8 = vcmask 56320   ;;  %vm1020_vm9 = vcmask 64512   ;;  %v520_v59 = vrot.slane %v9876_v28, %v9854_v18 }
  0x41   : > { %v9900_v50 = vsub.s32 %v1080_v46, %v9805_v1  ;;  %vm12949_vm10 = vcmask 72704   ;;  %vm12948_vm11 = vcmask 1041409   ;;  %vm12947_vm12 = vcmask 1042434  }
  0x42   : > { %vm12946_vm13 = vcmask 1043459   ;;  %vm12945_vm14 = vcmask 1044484   ;;  %vm4143_vm15 = vcmask 1043456   ;;  %vm12951_vm0 = vcmask 293888  }
  0x43   : > { %401 = vbcast.lane.b32.xlu1 %v399_v10, 256  ;;  %541 = vbcast.lane.b32.xlu0 %v388_v9, 257 }
  0x47   : > { %661 = vbcast.lane.b32.xlu1 %v399_v10, 258  ;;  %549 = vbcast.lane.b32.xlu0 %v399_v10, 257 }
  0x4b   : > { %394 = vbcast.lane.b32.xlu1 %v388_v9, 264  ;;  %412 = vbcast.lane.b32.xlu0 %v410_v12, 256 }
  0x4f   : > { %557 = vbcast.lane.b32.xlu1 %v410_v12, 257  ;;  %545 = vbcast.lane.b32.xlu0 %v388_v9, 265 }
  0x53   : > { %669 = vbcast.lane.b32.xlu1 %v410_v12, 258  ;;  %657 = vbcast.lane.b32.xlu0 %v388_v9, 266 }
  0x57   : > { %553 = vbcast.lane.b32.xlu1 %v399_v10, 265  ;;  %405 = vbcast.lane.b32.xlu0 %v399_v10, 264 }
  0x5b   : > { %416 = vbcast.lane.b32.xlu1 %v410_v12, 264  ;;  %665 = vbcast.lane.b32.xlu0 %v399_v10, 266 }
  0x5f   : > { %423 = vbcast.lane.b32.xlu1 %v421_v17, 256  ;;  %561 = vbcast.lane.b32.xlu0 %v410_v12, 265 }
  0x63   : > { %565 = vbcast.lane.b32.xlu1 %v421_v17, 257  ;;  %673 = vbcast.lane.b32.xlu0 %v410_v12, 266 }
  0x67   : > { %427 = vbcast.lane.b32.xlu1 %v421_v17, 264  ;;  %677 = vbcast.lane.b32.xlu0 %v421_v17, 258 }
  0x6b   : > { %434 = vbcast.lane.b32.xlu1 %v432_v19, 256  ;;  %569 = vbcast.lane.b32.xlu0 %v421_v17, 265 }
  0x6f   : > { %573 = vbcast.lane.b32.xlu1 %v432_v19, 257  ;;  %681 = vbcast.lane.b32.xlu0 %v421_v17, 266 }
  0x73   : > { %438 = vbcast.lane.b32.xlu1 %v432_v19, 264  ;;  %685 = vbcast.lane.b32.xlu0 %v432_v19, 258 }
  0x77   : > { %689 = vbcast.lane.b32.xlu1 %v432_v19, 266  ;;  %577 = vbcast.lane.b32.xlu0 %v432_v19, 265 }
  0x7b   : > { %581 = vbcast.lane.b32.xlu1 %v443_v21, 257  ;;  %445 = vbcast.lane.b32.xlu0 %v443_v21, 256 }
  0x7f   : > { %449 = vbcast.lane.b32.xlu1 %v443_v21, 264  ;;  %693 = vbcast.lane.b32.xlu0 %v443_v21, 258 }
  0x83   : > { %456 = vbcast.lane.b32.xlu1 %v454_v23, 256  ;;  %585 = vbcast.lane.b32.xlu0 %v443_v21, 265 }
  0x87   : > { %589 = vbcast.lane.b32.xlu1 %v454_v23, 257  ;;  %697 = vbcast.lane.b32.xlu0 %v443_v21, 266 }
  0x8b   : > { %460 = vbcast.lane.b32.xlu1 %v454_v23, 264  ;;  %701 = vbcast.lane.b32.xlu0 %v454_v23, 258 }
  0x8f   : > { %467 = vbcast.lane.b32.xlu1 %v465_v25, 256  ;;  %593 = vbcast.lane.b32.xlu0 %v454_v23, 265 }
  0x93   : > { %597 = vbcast.lane.b32.xlu1 %v465_v25, 257  ;;  %705 = vbcast.lane.b32.xlu0 %v454_v23, 266 }
  0x97   : > { %471 = vbcast.lane.b32.xlu1 %v465_v25, 264  ;;  %709 = vbcast.lane.b32.xlu0 %v465_v25, 258 }
  0x9b   : > { %478 = vbcast.lane.b32.xlu1 %v476_v29, 256  ;;  %601 = vbcast.lane.b32.xlu0 %v465_v25, 265 }
  0x9f   : > { %605 = vbcast.lane.b32.xlu1 %v476_v29, 257  ;;  %713 = vbcast.lane.b32.xlu0 %v465_v25, 266 }
  0xa3   : > { %482 = vbcast.lane.b32.xlu1 %v476_v29, 264  ;;  %717 = vbcast.lane.b32.xlu0 %v476_v29, 258 }
  0xa7   : > { %721 = vbcast.lane.b32.xlu1 %v476_v29, 266  ;;  %609 = vbcast.lane.b32.xlu0 %v476_v29, 265 }
  0xab   : > { %613 = vbcast.lane.b32.xlu1 %v487_v30, 257  ;;  %489 = vbcast.lane.b32.xlu0 %v487_v30, 256 }
  0xaf   : > { %493 = vbcast.lane.b32.xlu1 %v487_v30, 264  ;;  %725 = vbcast.lane.b32.xlu0 %v487_v30, 258 }
  0xb1   : > { %v654_v32 = vpop.permute.xlu1 %653  ;;  %v391_v33 = vpop.permute.xlu0 %390 }
  0xb3   : > { %500 = vbcast.lane.b32.xlu1 %v498_v31, 256  ;;  %617 = vbcast.lane.b32.xlu0 %v487_v30, 265 }
  0xb5   : > { %v9884_v34 = vpop.permute.xlu1 %401  ;;  %v542_v35 = vpop.permute.xlu0 %541 }
  0xb6   : > { %v818_v36 = vsel %vm817_vm2, %v391_v33, %v542_v35  ;;  %v531_v35 = vrot.slane %v9876_v28, %v9859_v20 }
  0xb7   : > { %621 = vbcast.lane.b32.xlu1 %v498_v31, 257  ;;  %729 = vbcast.lane.b32.xlu0 %v487_v30, 266  ;;  %v847_v39 = vsel %vm846_vm3, %v818_v36, %v654_v32 }
  0xb8   : > { %v876_v43 = vsel %vm875_vm4, %v847_v39, %v9884_v34 }
  0xb9   : > { %v9887_v37 = vpop.permute.xlu1 %661  ;;  %v550_v38 = vpop.permute.xlu0 %549 }
  0xba   : > { %v905_v47 = vsel %vm904_vm5, %v876_v43, %v550_v38  ;;  %v820_v23 = vsel %vm817_vm2, %v9884_v34, %v550_v38 }
  0xbb   : > { %504 = vbcast.lane.b32.xlu1 %v498_v31, 264  ;;  %733 = vbcast.lane.b32.xlu0 %v498_v31, 258  ;;  %v934_v51 = vsel %vm933_vm6, %v905_v47, %v9887_v37  ;;  %v849_v26 = vsel %vm846_vm3, %v820_v23, %v9887_v37 }
  0xbd   : > { %v395_v44 = vpop.permute.xlu1 %394  ;;  %v9894_v45 = vpop.permute.xlu0 %412 }
  0xbe   : > { %v963_v52 = vsel %vm962_vm7, %v934_v51, %v9894_v45 }
  0xbf   : > { %511 = vbcast.lane.b32.xlu1 %v509_v42, 256  ;;  %625 = vbcast.lane.b32.xlu0 %v498_v31, 265 }
  0xc1   : > { %v9897_v48 = vpop.permute.xlu1 %557  ;;  %v546_v49 = vpop.permute.xlu0 %545 }
  0xc2   : > { %v992_v53 = vsel %vm991_vm8, %v963_v52, %v9897_v48  ;;  %v819_v3 = vsel %vm817_vm2, %v395_v44, %v546_v49 }
  0xc3   : > { %629 = vbcast.lane.b32.xlu1 %v509_v42, 257  ;;  %737 = vbcast.lane.b32.xlu0 %v498_v31, 266  ;;  %v878_v31 = vsel %vm875_vm4, %v849_v26, %v9894_v45 }
  0xc4   : > { %v907_v33 = vsel %vm904_vm5, %v878_v31, %v9897_v48 }
  0xc5   : > { %v9908_v54 = vpop.permute.xlu1 %669  ;;  %v658_v55 = vpop.permute.xlu0 %657 }
  0xc6   : > { %v1021_v56 = vsel %vm1020_vm9, %v992_v53, %v9908_v54  ;;  %v848_v5 = vsel %vm846_vm3, %v819_v3, %v658_v55  ;;  %v936_v36 = vsel %vm933_vm6, %v907_v33, %v9908_v54 }
  0xc7   : > { %v1077_v57 = vcombine.high %v1021_v56, %v1021_v56  ;;  %v1084_v58 = vrot.slane %v1021_v56, %v9900_v50  ;;  %515 = vbcast.lane.b32.xlu1 %v509_v42, 264  ;;  %741 = vbcast.lane.b32.xlu0 %v509_v42, 258 }
  0xc9   : > { %v1091_v60 = vrot.slane %v1077_v57, %v9900_v50  ;;  %v1092_v61 = vcombine.high %v1084_v58, %v1084_v58  ;;  %v554_v62 = vpop.permute.xlu1 %553  ;;  %v406_v63 = vpop.permute.xlu0 %405 }
  0xca   : > { %v877_v10 = vsel %vm875_vm4, %v848_v5, %v406_v63 }
  0xcb   : > { %v1093_v0 = vcombine.high %v1091_v60, %v1091_v60  ;;  %v1545_v2 = vcombine.low %v1084_v58, %v1092_v61  ;;  %522 = vbcast.lane.b32.xlu1 %v520_v59, 256  ;;  %633 = vbcast.lane.b32.xlu0 %v509_v42, 265  ;;  %v906_v15 = vsel %vm904_vm5, %v877_v10, %v554_v62 }
  0xcc   : > { %v766_v10 = vrot.slane %v9876_v28, %v9864_v22 }
  0xcd   : > { %v1546_v4 = vcombine.low %v1091_v60, %v1093_v0  ;;  %v9918_v7 = vpop.permute.xlu1 %416  ;;  %v666_v9 = vpop.permute.xlu0 %665  ;;  %v1553_v12 = vrot.slane %v1545_v2, %v9900_v50  ;;  %v822_v60 = vsel %vm817_vm2, %v9894_v45, %v9897_v48 }
  0xce   : > { %v935_v25 = vsel %vm933_vm6, %v906_v15, %v666_v9  ;;  %v851_v0 = vsel %vm846_vm3, %v822_v60, %v9908_v54 }
  0xcf   : > { %637 = vbcast.lane.b32.xlu1 %v520_v59, 257  ;;  %745 = vbcast.lane.b32.xlu0 %v509_v42, 266  ;;  %v1560_v13 = vrot.slane %v1546_v4, %v9900_v50  ;;  %v964_v27 = vsel %vm962_vm7, %v935_v25, %v9918_v7  ;;  %v821_v42 = vsel %vm817_vm2, %v406_v63, %v554_v62 }
  0xd0   : > { %v850_v46 = vsel %vm846_vm3, %v821_v42, %v666_v9 }
  0xd1   : > { %v9924_v17 = vpop.permute.xlu1 %423  ;;  %v562_v19 = vpop.permute.xlu0 %561  ;;  %v1561_v21 = vcombine.low %v1553_v12, %v1560_v13  ;;  %v879_v57 = vsel %vm875_vm4, %v850_v46, %v9918_v7 }
  0xd2   : > { %v993_v32 = vsel %vm991_vm8, %v964_v27, %v562_v19  ;;  %v965_v39 = vsel %vm962_vm7, %v936_v36, %v9924_v17  ;;  %v880_v48 = vsel %vm875_vm4, %v851_v0, %v9924_v17  ;;  %v823_v54 = vsel %vm817_vm2, %v9918_v7, %v562_v19 }
  0xd3   : > { %526 = vbcast.lane.b32.xlu1 %v520_v59, 264  ;;  %749 = vbcast.lane.b32.xlu0 %v520_v59, 258 }
  0xd4   : > { %9048 = vmatmul.mubr.msk.f32.vlgmr.msra.gmra.mxu0 %vm12949_vm10, %v1561_v21 }
  0xd5   : > { %v9934_v29 = vpop.permute.xlu1 %565  ;;  %v674_v30 = vpop.permute.xlu0 %673  ;;  %9050 = vmatprep.mubr.msk.f32.mxu0 %vm9635_vm1, %v9634_v14 }
  0xd6   : > { %v1022_v34 = vsel %vm1020_vm9, %v993_v32, %v674_v30  ;;  %v994_v43 = vsel %vm991_vm8, %v965_v39, %v9934_v29  ;;  %v909_v12 = vsel %vm904_vm5, %v880_v48, %v9934_v29  ;;  %v852_v27 = vsel %vm846_vm3, %v823_v54, %v674_v30 }
  0xd7   : > { %753 = vbcast.lane.b32.xlu1 %v520_v59, 266  ;;  %641 = vbcast.lane.b32.xlu0 %v520_v59, 265  ;;  %v1094_v37 = vcombine.high %v1022_v34, %v1022_v34  ;;  %v1101_v38 = vrot.slane %v1022_v34, %v9900_v50  ;;  %v908_v59 = vsel %vm904_vm5, %v879_v57, %v562_v19 }
  0xd8   : > { %v937_v61 = vsel %vm933_vm6, %v908_v59, %v674_v30 }
  0xd9   : > { %v9951_v40 = vpop.permute.xlu1 %427  ;;  %v9953_v41 = vpop.permute.xlu0 %677  ;;  %v1109_v44 = vcombine.high %v1101_v38, %v1101_v38  ;;  %v1108_v49 = vrot.slane %v1094_v37, %v9900_v50 }
  0xda   : > { %v1023_v47 = vsel %vm1020_vm9, %v994_v43, %v9953_v41  ;;  %v966_v2 = vsel %vm962_vm7, %v937_v61, %v9951_v40  ;;  %v938_v21 = vsel %vm933_vm6, %v909_v12, %v9953_v41  ;;  %v881_v30 = vsel %vm875_vm4, %v852_v27, %v9951_v40 }
  0xdb   : > { %645 = vbcast.lane.b32.xlu1 %v531_v35, 257  ;;  %533 = vbcast.lane.b32.xlu0 %v531_v35, 256  ;;  %v1110_v51 = vcombine.high %v1023_v47, %v1023_v47  ;;  %v1117_v52 = vrot.slane %v1023_v47, %v9900_v50  ;;  %v1562_v53 = vcombine.low %v1101_v38, %v1109_v44 }
  0xdc   : > { %v824_v44 = vsel %vm817_vm2, %v9924_v17, %v9934_v29 }
  0xdd   : > { %v9963_v55 = vpop.permute.xlu1 %434  ;;  %v9965_v56 = vpop.permute.xlu0 %569  ;;  %v1563_v58 = vcombine.low %v1108_v49, %v1117_v52  ;;  %v1124_v62 = vrot.slane %v1110_v51, %v9900_v50  ;;  %v1125_v3 = vcombine.high %v1117_v52, %v1117_v52  ;;  %v1570_v45 = vrot.slane %v1562_v53, %v9900_v50 }
  0xde   : > { %v995_v9 = vsel %vm991_vm8, %v966_v2, %v9965_v56  ;;  %v967_v7 = vsel %vm962_vm7, %v938_v21, %v9963_v55  ;;  %v910_v38 = vsel %vm904_vm5, %v881_v30, %v9965_v56  ;;  %v853_v59 = vsel %vm846_vm3, %v824_v44, %v9953_v41 }
  0xdf   : > { %537 = vbcast.lane.b32.xlu1 %v531_v35, 264  ;;  %757 = vbcast.lane.b32.xlu0 %v531_v35, 258  ;;  %v1577_v63 = vrot.slane %v1563_v58, %v9900_v50  ;;  %v1126_v23 = vcombine.high %v1124_v62, %v1124_v62  ;;  %v1579_v31 = vcombine.low %v1125_v3, %v1124_v62 }
  0xe0   : > { %v882_v60 = vsel %vm875_vm4, %v853_v59, %v9963_v55  ;;  %v825_v21 = vsel %vm817_vm2, %v9951_v40, %v9965_v56 }
  0xe1   : > { %v9980_v4 = vpop.permute.xlu1 %573  ;;  %v9982_v5 = vpop.permute.xlu0 %681  ;;  %v1578_v15 = vcombine.low %v1570_v45, %v1577_v63  ;;  %v1587_v51 = vrot.slane %v1579_v31, %v9900_v50 }
  0xe2   : > { %v1024_v13 = vsel %vm1020_vm9, %v995_v9, %v9982_v5  ;;  %v996_v33 = vsel %vm991_vm8, %v967_v7, %v9980_v4  ;;  %v939_v46 = vsel %vm933_vm6, %v910_v38, %v9982_v5  ;;  %v911_v0 = vsel %vm904_vm5, %v882_v60, %v9980_v4 }
  0xe3   : > { %761 = vbcast.lane.b32.xlu1 %v531_v35, 266  ;;  %v1127_v25 = vcombine.high %v1024_v13, %v1024_v13  ;;  %v1134_v26 = vrot.slane %v1024_v13, %v9900_v50  ;;  %649 = vbcast.lane.b32.xlu0 %v531_v35, 265  ;;  %v793_v9 = vrot.slane %v9876_v28, %v9869_v24 }
  0xe4   : > { %9051 = vmatmul.mubr.msk.f32.gmra.mxu0 %vm12949_vm10, %v1578_v15  ;;  %v854_v28 = vsel %vm846_vm3, %v825_v21, %v9982_v5 }
  0xe5   : > { %v10004_v19 = vpop.permute.xlu1 %438  ;;  %v10006_v32 = vpop.permute.xlu0 %685  ;;  %v1141_v34 = vrot.slane %v1127_v25, %v9900_v50  ;;  %v1142_v36 = vcombine.high %v1134_v26, %v1134_v26  ;;  %v1580_v37 = vcombine.low %v1126_v23, %v1134_v26  ;;  %9053 = vmatprep.mubr.msk.f32.mxu0 %vm9635_vm1, %v9634_v14 }
  0xe6   : > { %v1025_v35 = vsel %vm1020_vm9, %v996_v33, %v10006_v32  ;;  %v968_v53 = vsel %vm962_vm7, %v939_v46, %v10004_v19  ;;  %v940_v45 = vsel %vm933_vm6, %v911_v0, %v10006_v32  ;;  %v883_v33 = vsel %vm875_vm4, %v854_v28, %v10004_v19 }
  0xe7   : > { %776 = vbcast.lane.b32.xlu1 %v766_v10, 257  ;;  %v1143_v39 = vcombine.high %v1025_v35, %v1025_v35  ;;  %v1150_v42 = vrot.slane %v1025_v35, %v9900_v50  ;;  %768 = vbcast.lane.b32.xlu0 %v766_v10, 256  ;;  %v1594_v43 = vrot.slane %v1580_v37, %v9900_v50 }
  0xe8   : > { %v1596_v52 = vcombine.low %v1142_v36, %v1141_v34 }
  0xe9   : > { %v10026_v47 = vpop.permute.xlu1 %689  ;;  %v10028_v49 = vpop.permute.xlu0 %577  ;;  %v1157_v57 = vrot.slane %v1143_v39, %v9900_v50  ;;  %v1158_v58 = vcombine.high %v1150_v42, %v1150_v42  ;;  %v1595_v29 = vcombine.low %v1587_v51, %v1594_v43  ;;  %v826_v39 = vsel %vm817_vm2, %v9963_v55, %v9980_v4 }
  0xea   : > { %v997_v17 = vsel %vm991_vm8, %v968_v53, %v10028_v49  ;;  %v1604_v48 = vrot.slane %v1596_v52, %v9900_v50  ;;  %v912_v5 = vsel %vm904_vm5, %v883_v33, %v10028_v49  ;;  %v855_v44 = vsel %vm846_vm3, %v826_v39, %v10006_v32 }
  0xeb   : > { %772 = vbcast.lane.b32.xlu1 %v766_v10, 264  ;;  %v1159_v61 = vcombine.high %v1157_v57, %v1157_v57  ;;  %v1597_v62 = vcombine.low %v1150_v42, %v1158_v58  ;;  %v1026_v63 = vsel %vm1020_vm9, %v997_v17, %v10026_v47  ;;  %784 = vbcast.lane.b32.xlu0 %v766_v10, 258 }
  0xec   : > { %v1167_v2 = vrot.slane %v1026_v63, %v9900_v50  ;;  %9054 = vmatmul.mubr.msk.f32.gmra.mxu0 %vm12949_vm10, %v1595_v29  ;;  %v1160_v23 = vcombine.high %v1026_v63, %v1026_v63  ;;  %v941_v52 = vsel %vm933_vm6, %v912_v5, %v10026_v47 }
  0xed   : > { %v10046_v41 = vpop.permute.xlu1 %581  ;;  %v10048_v3 = vpop.permute.xlu0 %445  ;;  %9056 = vmatprep.mubr.msk.f32.mxu0 %vm9635_vm1, %v9634_v14  ;;  %v1613_v54 = vcombine.low %v1157_v57, %v1159_v61  ;;  %v1611_v15 = vrot.slane %v1597_v62, %v9900_v50 }
  0xee   : > { %v1175_v12 = vcombine.high %v1167_v2, %v1167_v2  ;;  %v969_v13 = vsel %vm962_vm7, %v940_v45, %v10048_v3  ;;  %v1174_v37 = vrot.slane %v1160_v23, %v9900_v50  ;;  %v884_v51 = vsel %vm875_vm4, %v855_v44, %v10048_v3 }
  0xef   : > { %788 = vbcast.lane.b32.xlu1 %v766_v10, 266  ;;  %780 = vbcast.lane.b32.xlu0 %v766_v10, 265  ;;  %v1612_v27 = vcombine.low %v1604_v48, %v1611_v15  ;;  %v998_v7 = vsel %vm991_vm8, %v969_v13, %v10046_v41  ;;  %v1621_v40 = vrot.slane %v1613_v54, %v9900_v50 }
  0xf0   : > { %v1614_v25 = vcombine.low %v1167_v2, %v1175_v12  ;;  %v913_v58 = vsel %vm904_vm5, %v884_v51, %v10046_v41  ;;  %v827_v54 = vsel %vm817_vm2, %v10004_v19, %v10028_v49 }
  0xf1   : > { %v10063_v26 = vpop.permute.xlu1 %449  ;;  %v10065_v31 = vpop.permute.xlu0 %693  ;;  %9057 = vmatmul.mubr.msk.f32.gmra.mxu0 %vm12949_vm10, %v1612_v27  ;;  %v856_v19 = vsel %vm846_vm3, %v827_v54, %v10026_v47  ;;  %v828_v47 = vsel %vm817_vm2, %v10048_v3, %v10046_v41 }
  0xf2   : > { %v1027_v10 = vsel %vm1020_vm9, %v998_v7, %v10065_v31  ;;  %v1628_v56 = vrot.slane %v1614_v25, %v9900_v50  ;;  %9059 = vmatprep.mubr.msk.f32.mxu0 %vm9635_vm1, %v9634_v14  ;;  %v970_v55 = vsel %vm962_vm7, %v941_v52, %v10063_v26  ;;  %v942_v60 = vsel %vm933_vm6, %v913_v58, %v10065_v31 }
  0xf3   : > { %803 = vbcast.lane.b32.xlu1 %v793_v9, 257  ;;  %v1176_v34 = vcombine.high %v1027_v10, %v1027_v10  ;;  %v1183_v36 = vrot.slane %v1027_v10, %v9900_v50  ;;  %795 = vbcast.lane.b32.xlu0 %v793_v9, 256  ;;  %v885_v7 = vsel %vm875_vm4, %v856_v19, %v10063_v26 }
  0xf4   : > { %v1629_v38 = vcombine.low %v1621_v40, %v1628_v56 }
  0xf5   : > { %v10084_v30 = vpop.permute.xlu1 %456  ;;  %v10086_v35 = vpop.permute.xlu0 %585  ;;  %v1190_v42 = vrot.slane %v1176_v34, %v9900_v50  ;;  %v1191_v43 = vcombine.high %v1183_v36, %v1183_v36  ;;  %v1630_v46 = vcombine.low %v1174_v37, %v1183_v36  ;;  %v857_v37 = vsel %vm846_vm3, %v828_v47, %v10065_v31 }
  0xf6   : > { %9060 = vmatmul.mubr.msk.f32.gmra.mxu0 %vm12949_vm10, %v1629_v38  ;;  %v999_v32 = vsel %vm991_vm8, %v970_v55, %v10086_v35  ;;  %v971_v63 = vsel %vm962_vm7, %v942_v60, %v10084_v30  ;;  %v914_v56 = vsel %vm904_vm5, %v885_v7, %v10086_v35 }
  0xf7   : > { %v1631_v53 = vcombine.low %v1191_v43, %v1190_v42  ;;  %799 = vbcast.lane.b32.xlu1 %v793_v9, 264  ;;  %811 = vbcast.lane.b32.xlu0 %v793_v9, 258  ;;  %v1638_v17 = vrot.slane %v1630_v46, %v9900_v50  ;;  %v1192_v0 = vcombine.high %v1190_v42, %v1190_v42 }
  0xf8   : > { %9062 = vmatprep.mubr.msk.f32.mxu0 %vm9635_vm1, %v9634_v14  ;;  %v886_v46 = vsel %vm875_vm4, %v857_v37, %v10084_v30 }
  0xf9   : > { %v10101_v4 = vpop.permute.xlu1 %589  ;;  %v10103_v57 = vpop.permute.xlu0 %697  ;;  %v1645_v29 = vrot.slane %v1631_v53, %v9900_v50 }
  0xfa   : > { %v1028_v59 = vsel %vm1020_vm9, %v999_v32, %v10103_v57  ;;  %v1000_v12 = vsel %vm991_vm8, %v971_v63, %v10101_v4  ;;  %v943_v36 = vsel %vm933_vm6, %v914_v56, %v10103_v57  ;;  %v915_v3 = vsel %vm904_vm5, %v886_v46, %v10101_v4 }
  0xfb   : > { %v1193_v61 = vcombine.high %v1028_v59, %v1028_v59  ;;  %v1200_v62 = vrot.slane %v1028_v59, %v9900_v50  ;;  %807 = vbcast.lane.b32.xlu0 %v793_v9, 265  ;;  %815 = vbcast.lane.b32.xlu1 %v793_v9, 266  ;;  %v1646_v45 = vcombine.low %v1638_v17, %v1645_v29 }
  0xfd   : > { %v10120_v2 = vpop.permute.xlu1 %460  ;;  %v10122_v48 = vpop.permute.xlu0 %701  ;;  %v1207_v13 = vrot.slane %v1193_v61, %v9900_v50  ;;  %v1208_v15 = vcombine.high %v1200_v62, %v1200_v62  ;;  %v1647_v9 = vcombine.low %v1192_v0, %v1200_v62  ;;  %9063 = vmatmul.mubr.msk.f32.gmra.mxu0 %vm12949_vm10, %v1646_v45  ;;  %v829_v0 = vsel %vm817_vm2, %v10063_v26, %v10086_v35 }
  0xfe   : > { %v1029_v21 = vsel %vm1020_vm9, %v1000_v12, %v10122_v48  ;;  %9065 = vmatprep.mubr.msk.f32.mxu0 %vm9635_vm1, %v9634_v14  ;;  %v972_v38 = vsel %vm962_vm7, %v943_v36, %v10120_v2  ;;  %v944_v52 = vsel %vm933_vm6, %v915_v3, %v10122_v48  ;;  %v830_v35 = vsel %vm817_vm2, %v10084_v30, %v10101_v4 }
  0xff   : > { %v1648_v23 = vcombine.low %v1208_v15, %v1207_v13  ;;  %v1209_v25 = vcombine.high %v1029_v21, %v1029_v21  ;;  %v1216_v27 = vrot.slane %v1029_v21, %v9900_v50  ;;  %v1655_v33 = vrot.slane %v1647_v9, %v9900_v50 }
 0x100   : > { %v858_v13 = vsel %vm846_vm3, %v829_v0, %v10103_v57  ;;  %v859_v7 = vsel %vm846_vm3, %v830_v35, %v10122_v48 }
 0x101   : > { %v10138_v49 = vpop.permute.xlu1 %467  ;;  %v594_v28 = vpop.permute.xlu0 %593  ;;  %v1223_v10 = vrot.slane %v1209_v25, %v9900_v50  ;;  %v1224_v40 = vcombine.high %v1216_v27, %v1216_v27  ;;  %v1662_v34 = vrot.slane %v1648_v23, %v9900_v50  ;;  %v887_v23 = vsel %vm875_vm4, %v858_v13, %v10120_v2 }
 0x102   : > { %v1001_v41 = vsel %vm991_vm8, %v972_v38, %v594_v28  ;;  %v973_v58 = vsel %vm962_vm7, %v944_v52, %v10138_v49  ;;  %v916_v26 = vsel %vm904_vm5, %v887_v23, %v594_v28  ;;  %v888_v30 = vsel %vm875_vm4, %v859_v7, %v10138_v49 }
 0x103   : > { %v1225_v5 = vcombine.high %v1223_v10, %v1223_v10  ;;  %v1664_v39 = vcombine.low %v1216_v27, %v1224_v40  ;;  %v1663_v43 = vcombine.low %v1655_v33, %v1662_v34  ;;  %v831_v47 = vsel %vm817_vm2, %v10120_v2, %v594_v28 }
 0x105   : > { %v10156_v42 = vpop.permute.xlu1 %597  ;;  %v706_v44 = vpop.permute.xlu0 %705  ;;  %v1665_v51 = vcombine.low %v1223_v10, %v1225_v5  ;;  %9066 = vmatmul.mubr.msk.f32.gmra.mxu0 %vm12949_vm10, %v1663_v43  ;;  %v1672_v29 = vrot.slane %v1664_v39, %v9900_v50 }
 0x106   : > { %v1030_v31 = vsel %vm1020_vm9, %v1001_v41, %v706_v44  ;;  %9068 = vmatprep.mubr.msk.f32.mxu0 %vm9635_vm1, %v9634_v14  ;;  %v1002_v60 = vsel %vm991_vm8, %v973_v58, %v10156_v42  ;;  %v945_v57 = vsel %vm933_vm6, %v916_v26, %v706_v44  ;;  %v917_v48 = vsel %vm904_vm5, %v888_v30, %v10156_v42 }
 0x107   : > { %v1226_v53 = vcombine.high %v1030_v31, %v1030_v31  ;;  %v1233_v55 = vrot.slane %v1030_v31, %v9900_v50  ;;  %v1679_v32 = vrot.slane %v1665_v51, %v9900_v50  ;;  %v860_v46 = vsel %vm846_vm3, %v831_v47, %v706_v44 }
 0x109   : > { %v10173_v59 = vpop.permute.xlu1 %471  ;;  %v10175_v17 = vpop.permute.xlu0 %709  ;;  %v1241_v61 = vcombine.high %v1233_v55, %v1233_v55  ;;  %v1680_v63 = vcombine.low %v1672_v29, %v1679_v32  ;;  %v1240_v45 = vrot.slane %v1226_v53, %v9900_v50 }
 0x10a   : > { %v1031_v62 = vsel %vm1020_vm9, %v1002_v60, %v10175_v17  ;;  %v974_v10 = vsel %vm962_vm7, %v945_v57, %v10173_v59  ;;  %v946_v37 = vsel %vm933_vm6, %v917_v48, %v10175_v17  ;;  %v889_v44 = vsel %vm875_vm4, %v860_v46, %v10173_v59 }
 0x10b   : > { %v1242_v54 = vcombine.high %v1031_v62, %v1031_v62  ;;  %v1249_v12 = vrot.slane %v1031_v62, %v9900_v50  ;;  %v1681_v15 = vcombine.low %v1233_v55, %v1241_v61  ;;  %9069 = vmatmul.mubr.msk.f32.gmra.mxu0 %vm12949_vm10, %v1680_v63  ;;  %v832_v61 = vsel %vm817_vm2, %v10138_v49, %v10156_v42 }
 0x10c   : > { %9071 = vmatprep.mubr.msk.f32.mxu0 %vm9635_vm1, %v9634_v14  ;;  %v861_v23 = vsel %vm846_vm3, %v832_v61, %v10175_v17 }
 0x10d   : > { %v10190_v9 = vpop.permute.xlu1 %478  ;;  %v10192_v21 = vpop.permute.xlu0 %601  ;;  %v1682_v25 = vcombine.low %v1240_v45, %v1249_v12  ;;  %v1256_v27 = vrot.slane %v1242_v54, %v9900_v50  ;;  %v1257_v40 = vcombine.high %v1249_v12, %v1249_v12  ;;  %v1689_v34 = vrot.slane %v1681_v15, %v9900_v50 }
 0x10e   : > { %v1003_v4 = vsel %vm991_vm8, %v974_v10, %v10192_v21  ;;  %v975_v2 = vsel %vm962_vm7, %v946_v37, %v10190_v9  ;;  %v918_v32 = vsel %vm904_vm5, %v889_v44, %v10192_v21 }
 0x10f   : > { %v1696_v19 = vrot.slane %v1682_v25, %v9900_v50  ;;  %v1258_v38 = vcombine.high %v1256_v27, %v1256_v27  ;;  %v1698_v51 = vcombine.low %v1257_v40, %v1256_v27  ;;  %v890_v25 = vsel %vm875_vm4, %v861_v23, %v10190_v9 }
 0x111   : > { %v10209_v56 = vpop.permute.xlu1 %605  ;;  %v10211_v33 = vpop.permute.xlu0 %713  ;;  %v1697_v5 = vcombine.low %v1689_v34, %v1696_v19  ;;  %v1706_v45 = vrot.slane %v1698_v51, %v9900_v50 }
 0x112   : > { %v1032_v36 = vsel %vm1020_vm9, %v1003_v4, %v10211_v33  ;;  %v1004_v3 = vsel %vm991_vm8, %v975_v2, %v10209_v56  ;;  %v947_v62 = vsel %vm933_vm6, %v918_v32, %v10211_v33  ;;  %v919_v27 = vsel %vm904_vm5, %v890_v25, %v10209_v56 }
 0x113   : > { %v1259_v39 = vcombine.high %v1032_v36, %v1032_v36  ;;  %v1266_v43 = vrot.slane %v1032_v36, %v9900_v50  ;;  %9072 = vmatmul.mubr.msk.f32.gmra.mxu0 %vm12949_vm10, %v1697_v5  ;;  %v834_v32 = vsel %vm817_vm2, %v10190_v9, %v10209_v56 }
 0x114   : > { %9074 = vmatprep.mubr.msk.f32.mxu0 %vm9635_vm1, %v9634_v14 }
 0x115   : > { %v10231_v28 = vpop.permute.xlu1 %482  ;;  %v10233_v41 = vpop.permute.xlu0 %717  ;;  %v1273_v31 = vrot.slane %v1259_v39, %v9900_v50  ;;  %v1274_v52 = vcombine.high %v1266_v43, %v1266_v43  ;;  %v1699_v53 = vcombine.low %v1258_v38, %v1266_v43  ;;  %v833_v39 = vsel %vm817_vm2, %v10173_v59, %v10192_v21 }
 0x116   : > { %v1033_v55 = vsel %vm1020_vm9, %v1004_v3, %v10233_v41  ;;  %v976_v12 = vsel %vm962_vm7, %v947_v62, %v10231_v28  ;;  %v948_v10 = vsel %vm933_vm6, %v919_v27, %v10233_v41  ;;  %v862_v46 = vsel %vm846_vm3, %v833_v39, %v10211_v33 }
 0x117   : > { %v1275_v58 = vcombine.high %v1033_v55, %v1033_v55  ;;  %v1282_v29 = vrot.slane %v1033_v55, %v9900_v50  ;;  %v1713_v60 = vrot.slane %v1699_v53, %v9900_v50  ;;  %v1715_v54 = vcombine.low %v1274_v52, %v1273_v31 }
 0x118   : > { %v891_v31 = vsel %vm875_vm4, %v862_v46, %v10231_v28 }
 0x119   : > { %v10253_v63 = vpop.permute.xlu1 %721  ;;  %v10255_v0 = vpop.permute.xlu0 %609  ;;  %v1289_v13 = vrot.slane %v1275_v58, %v9900_v50  ;;  %v1290_v15 = vcombine.high %v1282_v29, %v1282_v29  ;;  %v1714_v42 = vcombine.low %v1706_v45, %v1713_v60  ;;  %v1723_v40 = vrot.slane %v1715_v54, %v9900_v50 }
 0x11a   : > { %v1005_v49 = vsel %vm991_vm8, %v976_v12, %v10255_v0  ;;  %v920_v21 = vsel %vm904_vm5, %v891_v31, %v10255_v0  ;;  %v863_v60 = vsel %vm846_vm3, %v834_v32, %v10233_v41 }
 0x11b   : > { %v1291_v26 = vcombine.high %v1289_v13, %v1289_v13  ;;  %v1716_v35 = vcombine.low %v1282_v29, %v1290_v15  ;;  %v1034_v57 = vsel %vm1020_vm9, %v1005_v49, %v10253_v63  ;;  %9075 = vmatmul.mubr.msk.f32.gmra.mxu0 %vm12949_vm10, %v1714_v42  ;;  %v949_v45 = vsel %vm933_vm6, %v920_v21, %v10253_v63 }
 0x11c   : > { %v1299_v19 = vrot.slane %v1034_v57, %v9900_v50  ;;  %9077 = vmatprep.mubr.msk.f32.mxu0 %vm9635_vm1, %v9634_v14  ;;  %v1292_v48 = vcombine.high %v1034_v57, %v1034_v57 }
 0x11d   : > { %v10273_v17 = vpop.permute.xlu1 %613  ;;  %v10275_v7 = vpop.permute.xlu0 %489  ;;  %v1732_v34 = vcombine.low %v1289_v13, %v1291_v26  ;;  %v1730_v47 = vrot.slane %v1716_v35, %v9900_v50 }
 0x11e   : > { %v1307_v30 = vcombine.high %v1299_v19, %v1299_v19  ;;  %v977_v4 = vsel %vm962_vm7, %v948_v10, %v10275_v7  ;;  %v1306_v33 = vrot.slane %v1292_v48, %v9900_v50  ;;  %v892_v62 = vsel %vm875_vm4, %v863_v60, %v10275_v7 }
 0x11f   : > { %v1731_v37 = vcombine.low %v1723_v40, %v1730_v47  ;;  %v1006_v43 = vsel %vm991_vm8, %v977_v4, %v10273_v17  ;;  %v1740_v2 = vrot.slane %v1732_v34, %v9900_v50  ;;  %v921_v13 = vsel %vm904_vm5, %v892_v62, %v10273_v17 }
 0x120   : > { %v1733_v36 = vcombine.low %v1299_v19, %v1307_v30  ;;  %v835_v40 = vsel %vm817_vm2, %v10231_v28, %v10255_v0 }
 0x121   : > { %v10285_v5 = vpop.permute.xlu1 %493  ;;  %v10287_v38 = vpop.permute.xlu0 %725  ;;  %9078 = vmatmul.mubr.msk.f32.gmra.mxu0 %vm12949_vm10, %v1731_v37  ;;  %v864_v28 = vsel %vm846_vm3, %v835_v40, %v10253_v63  ;;  %v836_v63 = vsel %vm817_vm2, %v10275_v7, %v10273_v17 }
 0x122   : > { %v1035_v51 = vsel %vm1020_vm9, %v1006_v43, %v10287_v38  ;;  %v1747_v3 = vrot.slane %v1733_v36, %v9900_v50  ;;  %9080 = vmatprep.mubr.msk.f32.mxu0 %vm9635_vm1, %v9634_v14  ;;  %v978_v9 = vsel %vm962_vm7, %v949_v45, %v10285_v5  ;;  %v950_v42 = vsel %vm933_vm6, %v921_v13, %v10287_v38 }
 0x123   : > { %v1308_v52 = vcombine.high %v1035_v51, %v1035_v51  ;;  %v1315_v59 = vrot.slane %v1035_v51, %v9900_v50  ;;  %v893_v46 = vsel %vm875_vm4, %v864_v28, %v10285_v5 }
 0x124   : > { %v1748_v55 = vcombine.low %v1740_v2, %v1747_v3 }
 0x125   : > { %v10309_v53 = vpop.permute.xlu1 %500  ;;  %v10311_v44 = vpop.permute.xlu0 %617  ;;  %v1322_v58 = vrot.slane %v1308_v52, %v9900_v50  ;;  %v1323_v29 = vcombine.high %v1315_v59, %v1315_v59  ;;  %v1749_v61 = vcombine.low %v1306_v33, %v1315_v59  ;;  %v865_v33 = vsel %vm846_vm3, %v836_v63, %v10287_v38 }
 0x126   : > { %9081 = vmatmul.mubr.msk.f32.gmra.mxu0 %vm12949_vm10, %v1748_v55  ;;  %v1007_v41 = vsel %vm991_vm8, %v978_v9, %v10311_v44  ;;  %v979_v35 = vsel %vm962_vm7, %v950_v42, %v10309_v53  ;;  %v922_v3 = vsel %vm904_vm5, %v893_v46, %v10311_v44 }
 0x127   : > { %v1750_v54 = vcombine.low %v1323_v29, %v1322_v58  ;;  %9083 = vmatprep.mubr.msk.f32.mxu0 %vm9635_vm1, %v9634_v14  ;;  %v1757_v23 = vrot.slane %v1749_v61, %v9900_v50  ;;  %v1324_v57 = vcombine.high %v1322_v58, %v1322_v58  ;;  %v894_v61 = vsel %vm875_vm4, %v865_v33, %v10309_v53 }
 0x129   : > { %v10328_v56 = vpop.permute.xlu1 %621  ;;  %v10330_v12 = vpop.permute.xlu0 %729  ;;  %v1764_v49 = vrot.slane %v1750_v54, %v9900_v50 }
 0x12a   : > { %v1036_v15 = vsel %vm1020_vm9, %v1007_v41, %v10330_v12  ;;  %v1008_v34 = vsel %vm991_vm8, %v979_v35, %v10328_v56  ;;  %v951_v59 = vsel %vm933_vm6, %v922_v3, %v10330_v12  ;;  %v923_v7 = vsel %vm904_vm5, %v894_v61, %v10328_v56 }
 0x12b   : > { %v1325_v25 = vcombine.high %v1036_v15, %v1036_v15  ;;  %v1332_v26 = vrot.slane %v1036_v15, %v9900_v50  ;;  %v1765_v19 = vcombine.low %v1757_v23, %v1764_v49 }
 0x12d   : > { %v10345_v27 = vpop.permute.xlu1 %504  ;;  %v10347_v10 = vpop.permute.xlu0 %733  ;;  %v1339_v30 = vrot.slane %v1325_v25, %v9900_v50  ;;  %v1340_v4 = vcombine.high %v1332_v26, %v1332_v26  ;;  %v1766_v47 = vcombine.low %v1324_v57, %v1332_v26  ;;  %9084 = vmatmul.mubr.msk.f32.gmra.mxu0 %vm12949_vm10, %v1765_v19  ;;  %v837_v57 = vsel %vm817_vm2, %v10285_v5, %v10311_v44 }
 0x12e   : > { %v1037_v48 = vsel %vm1020_vm9, %v1008_v34, %v10347_v10  ;;  %9086 = vmatprep.mubr.msk.f32.mxu0 %vm9635_vm1, %v9634_v14  ;;  %v980_v55 = vsel %vm962_vm7, %v951_v59, %v10345_v27  ;;  %v952_v45 = vsel %vm933_vm6, %v923_v7, %v10347_v10  ;;  %v838_v44 = vsel %vm817_vm2, %v10309_v53, %v10328_v56 }
 0x12f   : > { %v1767_v36 = vcombine.low %v1340_v4, %v1339_v30  ;;  %v1341_v37 = vcombine.high %v1037_v48, %v1037_v48  ;;  %v1348_v39 = vrot.slane %v1037_v48, %v9900_v50  ;;  %v1774_v31 = vrot.slane %v1766_v47, %v9900_v50 }
 0x130   : > { %v866_v30 = vsel %vm846_vm3, %v837_v57, %v10330_v12  ;;  %v867_v46 = vsel %vm846_vm3, %v838_v44, %v10347_v10 }
 0x131   : > { %v10363_v0 = vpop.permute.xlu1 %511  ;;  %v626_v43 = vpop.permute.xlu0 %625  ;;  %v1355_v51 = vrot.slane %v1341_v37, %v9900_v50  ;;  %v1356_v2 = vcombine.high %v1348_v39, %v1348_v39  ;;  %v1781_v52 = vrot.slane %v1767_v36, %v9900_v50  ;;  %v895_v36 = vsel %vm875_vm4, %v866_v30, %v10345_v27 }
 0x132   : > { %v1009_v17 = vsel %vm991_vm8, %v980_v55, %v626_v43  ;;  %v981_v13 = vsel %vm962_vm7, %v952_v45, %v10363_v0  ;;  %v924_v5 = vsel %vm904_vm5, %v895_v36, %v626_v43  ;;  %v896_v53 = vsel %vm875_vm4, %v867_v46, %v10363_v0 }
 0x133   : > { %v1357_v21 = vcombine.high %v1355_v51, %v1355_v51  ;;  %v1783_v32 = vcombine.low %v1348_v39, %v1356_v2  ;;  %v1782_v29 = vcombine.low %v1774_v31, %v1781_v52  ;;  %v839_v63 = vsel %vm817_vm2, %v10345_v27, %v626_v43 }
 0x135   : > { %v10381_v58 = vpop.permute.xlu1 %629  ;;  %v738_v60 = vpop.permute.xlu0 %737  ;;  %v1784_v62 = vcombine.low %v1355_v51, %v1357_v21  ;;  %9087 = vmatmul.mubr.msk.f32.gmra.mxu0 %vm12949_vm10, %v1782_v29  ;;  %v1791_v49 = vrot.slane %v1783_v32, %v9900_v50 }
 0x136   : > { %v1038_v38 = vsel %vm1020_vm9, %v1009_v17, %v738_v60  ;;  %9089 = vmatprep.mubr.msk.f32.mxu0 %vm9635_vm1, %v9634_v14  ;;  %v1010_v42 = vsel %vm991_vm8, %v981_v13, %v10381_v58  ;;  %v953_v12 = vsel %vm933_vm6, %v924_v5, %v738_v60  ;;  %v925_v10 = vsel %vm904_vm5, %v896_v53, %v10381_v58 }
 0x137   : > { %v1358_v54 = vcombine.high %v1038_v38, %v1038_v38  ;;  %v1365_v9 = vrot.slane %v1038_v38, %v9900_v50  ;;  %v1798_v41 = vrot.slane %v1784_v62, %v9900_v50  ;;  %v868_v61 = vsel %vm846_vm3, %v839_v63, %v738_v60 }
 0x139   : > { %v10398_v15 = vpop.permute.xlu1 %515  ;;  %v10400_v23 = vpop.permute.xlu0 %741  ;;  %v1373_v25 = vcombine.high %v1365_v9, %v1365_v9  ;;  %v1799_v35 = vcombine.low %v1791_v49, %v1798_v41  ;;  %v1372_v19 = vrot.slane %v1358_v54, %v9900_v50 }
 0x13a   : > { %v1039_v26 = vsel %vm1020_vm9, %v1010_v42, %v10400_v23  ;;  %v982_v51 = vsel %vm962_vm7, %v953_v12, %v10398_v15  ;;  %v954_v33 = vsel %vm933_vm6, %v925_v10, %v10400_v23  ;;  %v897_v60 = vsel %vm875_vm4, %v868_v61, %v10398_v15 }
 0x13b   : > { %v1374_v40 = vcombine.high %v1039_v26, %v1039_v26  ;;  %v1381_v34 = vrot.slane %v1039_v26, %v9900_v50  ;;  %v1800_v4 = vcombine.low %v1365_v9, %v1373_v25  ;;  %9090 = vmatmul.mubr.msk.f32.gmra.mxu0 %vm12949_vm10, %v1799_v35  ;;  %v840_v25 = vsel %vm817_vm2, %v10363_v0, %v10381_v58 }
 0x13c   : > { %9092 = vmatprep.mubr.msk.f32.mxu0 %vm9635_vm1, %v9634_v14  ;;  %v869_v36 = vsel %vm846_vm3, %v840_v25, %v10400_v23 }
 0x13d   : > { %v10415_v47 = vpop.permute.xlu1 %522  ;;  %v10417_v48 = vpop.permute.xlu0 %633  ;;  %v1801_v37 = vcombine.low %v1372_v19, %v1381_v34  ;;  %v1388_v39 = vrot.slane %v1374_v40, %v9900_v50  ;;  %v1389_v2 = vcombine.high %v1381_v34, %v1381_v34  ;;  %v1808_v52 = vrot.slane %v1800_v4, %v9900_v50 }
 0x13e   : > { %v1011_v56 = vsel %vm991_vm8, %v982_v51, %v10417_v48  ;;  %v983_v17 = vsel %vm962_vm7, %v954_v33, %v10415_v47  ;;  %v926_v41 = vsel %vm904_vm5, %v897_v60, %v10417_v48  ;;  %v898_v58 = vsel %vm875_vm4, %v869_v36, %v10415_v47 }
 0x13f   : > { %v1815_v28 = vrot.slane %v1801_v37, %v9900_v50  ;;  %v1390_v55 = vcombine.high %v1388_v39, %v1388_v39  ;;  %v1817_v62 = vcombine.low %v1389_v2, %v1388_v39  ;;  %v841_v51 = vsel %vm817_vm2, %v10398_v15, %v10417_v48 }
 0x141   : > { %v10434_v3 = vpop.permute.xlu1 %637  ;;  %v746_v31 = vpop.permute.xlu0 %745  ;;  %v1816_v21 = vcombine.low %v1808_v52, %v1815_v28  ;;  %v1825_v19 = vrot.slane %v1817_v62, %v9900_v50 }
 0x142   : > { %v1040_v59 = vsel %vm1020_vm9, %v1011_v56, %v746_v31  ;;  %v1012_v7 = vsel %vm991_vm8, %v983_v17, %v10434_v3  ;;  %v955_v26 = vsel %vm933_vm6, %v926_v41, %v746_v31  ;;  %v927_v39 = vsel %vm904_vm5, %v898_v58, %v10434_v3 }
 0x143   : > { %v1391_v32 = vcombine.high %v1040_v59, %v1040_v59  ;;  %v1398_v29 = vrot.slane %v1040_v59, %v9900_v50  ;;  %9093 = vmatmul.mubr.msk.f32.gmra.mxu0 %vm12949_vm10, %v1816_v21  ;;  %v870_v59 = vsel %vm846_vm3, %v841_v51, %v746_v31 }
 0x144   : > { %9095 = vmatprep.mubr.msk.f32.mxu0 %vm9635_vm1, %v9634_v14 }
 0x145   : > { %v10453_v27 = vpop.permute.xlu1 %526  ;;  %v750_v43 = vpop.permute.xlu0 %749  ;;  %v1405_v38 = vrot.slane %v1391_v32, %v9900_v50  ;;  %v1406_v45 = vcombine.high %v1398_v29, %v1398_v29  ;;  %v1818_v54 = vcombine.low %v1390_v55, %v1398_v29 }
 0x146   : > { %v1041_v9 = vsel %vm1020_vm9, %v1012_v7, %v750_v43  ;;  %v984_v34 = vsel %vm962_vm7, %v955_v26, %v10453_v27  ;;  %v956_v2 = vsel %vm933_vm6, %v927_v39, %v750_v43  ;;  %v899_v15 = vsel %vm875_vm4, %v870_v59, %v10453_v27 }
 0x147   : > { %v1407_v13 = vcombine.high %v1041_v9, %v1041_v9  ;;  %v1414_v49 = vrot.slane %v1041_v9, %v9900_v50  ;;  %v1832_v42 = vrot.slane %v1818_v54, %v9900_v50  ;;  %v1834_v40 = vcombine.low %v1406_v45, %v1405_v38 }
 0x148   : > { %v842_v7 = vsel %vm817_vm2, %v10415_v47, %v10434_v3 }
 0x149   : > { %v10471_v35 = vpop.permute.xlu1 %753  ;;  %v642_v57 = vpop.permute.xlu0 %641  ;;  %v1421_v30 = vrot.slane %v1407_v13, %v9900_v50  ;;  %v1422_v4 = vcombine.high %v1414_v49, %v1414_v49  ;;  %v1833_v0 = vcombine.low %v1825_v19, %v1832_v42  ;;  %v1842_v52 = vrot.slane %v1834_v40, %v9900_v50 }
 0x14a   : > { %v1013_v37 = vsel %vm991_vm8, %v984_v34, %v642_v57  ;;  %v928_v32 = vsel %vm904_vm5, %v899_v15, %v642_v57  ;;  %v871_v60 = vsel %vm846_vm3, %v842_v7, %v750_v43 }
 0x14b   : > { %v1423_v5 = vcombine.high %v1421_v30, %v1421_v30  ;;  %v1835_v44 = vcombine.low %v1414_v49, %v1422_v4  ;;  %v1042_v12 = vsel %vm1020_vm9, %v1013_v37, %v10471_v35  ;;  %9096 = vmatmul.mubr.msk.f32.gmra.mxu0 %vm12949_vm10, %v1833_v0  ;;  %v957_v9 = vsel %vm933_vm6, %v928_v32, %v10471_v35 }
 0x14c   : > { %v1431_v28 = vrot.slane %v1042_v12, %v9900_v50  ;;  %9098 = vmatprep.mubr.msk.f32.mxu0 %vm9635_vm1, %v9634_v14  ;;  %v1424_v21 = vcombine.high %v1042_v12, %v1042_v12 }
 0x14d   : > { %v10488_v46 = vpop.permute.xlu1 %645  ;;  %v10490_v23 = vpop.permute.xlu0 %533  ;;  %v1851_v53 = vcombine.low %v1421_v30, %v1423_v5  ;;  %v1849_v10 = vrot.slane %v1835_v44, %v9900_v50  ;;  %v843_v30 = vsel %vm817_vm2, %v10453_v27, %v642_v57 }
 0x14e   : > { %v1439_v56 = vcombine.high %v1431_v28, %v1431_v28  ;;  %v985_v63 = vsel %vm962_vm7, %v956_v2, %v10490_v23  ;;  %v1438_v38 = vrot.slane %v1424_v21, %v9900_v50  ;;  %v900_v26 = vsel %vm875_vm4, %v871_v60, %v10490_v23 }
 0x14f   : > { %v1850_v55 = vcombine.low %v1842_v52, %v1849_v10  ;;  %v1014_v29 = vsel %vm991_vm8, %v985_v63, %v10488_v46  ;;  %v1859_v31 = vrot.slane %v1851_v53, %v9900_v50  ;;  %v929_v0 = vsel %vm904_vm5, %v900_v26, %v10488_v46 }
 0x150   : > { %v1852_v48 = vcombine.low %v1431_v28, %v1439_v56  ;;  %v872_v27 = vsel %vm846_vm3, %v843_v30, %v10471_v35 }
 0x151   : > { %v10505_v33 = vpop.permute.xlu1 %537  ;;  %v758_v61 = vpop.permute.xlu0 %757  ;;  %9099 = vmatmul.mubr.msk.f32.gmra.mxu0 %vm12949_vm10, %v1850_v55 }
 0x152   : > { %v1043_v62 = vsel %vm1020_vm9, %v1014_v29, %v758_v61  ;;  %v1866_v17 = vrot.slane %v1852_v48, %v9900_v50  ;;  %9101 = vmatprep.mubr.msk.f32.mxu0 %vm9635_vm1, %v9634_v14  ;;  %v986_v49 = vsel %vm962_vm7, %v957_v9, %v10505_v33  ;;  %v958_v51 = vsel %vm933_vm6, %v929_v0, %v758_v61 }
 0x153   : > { %v1440_v45 = vcombine.high %v1043_v62, %v1043_v62  ;;  %v1447_v54 = vrot.slane %v1043_v62, %v9900_v50  ;;  %v901_v52 = vsel %vm875_vm4, %v872_v27, %v10505_v33  ;;  %v844_v48 = vsel %vm817_vm2, %v10490_v23, %v10488_v46 }
 0x154   : > { %v1867_v13 = vcombine.low %v1859_v31, %v1866_v17  ;;  %v873_v29 = vsel %vm846_vm3, %v844_v48, %v758_v61 }
 0x155   : > { %v10524_v41 = vpop.permute.xlu1 %761  ;;  %v1454_v47 = vrot.slane %v1440_v45, %v9900_v50  ;;  %v1455_v3 = vcombine.high %v1447_v54, %v1447_v54  ;;  %v1868_v42 = vcombine.low %v1438_v38, %v1447_v54  ;;  %v650_v25 = vpop.permute.xlu0 %649 }
 0x156   : > { %v1015_v19 = vsel %vm991_vm8, %v986_v49, %v650_v25  ;;  %9102 = vmatmul.mubr.msk.f32.gmra.mxu0 %vm12949_vm10, %v1867_v13  ;;  %v930_v63 = vsel %vm904_vm5, %v901_v52, %v650_v25  ;;  %v845_v23 = vsel %vm817_vm2, %v10505_v33, %v650_v25 }
 0x157   : > { %v1456_v43 = vcombine.high %v1454_v47, %v1454_v47  ;;  %v1869_v40 = vcombine.low %v1455_v3, %v1454_v47  ;;  %v1044_v34 = vsel %vm1020_vm9, %v1015_v19, %v10524_v41  ;;  %9104 = vmatprep.mubr.msk.f32.mxu0 %vm9635_vm1, %v9634_v14  ;;  %v1876_v5 = vrot.slane %v1868_v42, %v9900_v50 }
 0x158   : > { %v1457_v4 = vcombine.high %v1044_v34, %v1044_v34  ;;  %v1464_v36 = vrot.slane %v1044_v34, %v9900_v50  ;;  %v959_v62 = vsel %vm933_vm6, %v930_v63, %v10524_v41 }
 0x159   : > { %v777_v37 = vpop.permute.xlu1 %776  ;;  %v769_v58 = vpop.permute.xlu0 %768  ;;  %v1883_v44 = vrot.slane %v1869_v40, %v9900_v50 }
 0x15a   : > { %v1471_v12 = vrot.slane %v1457_v4, %v9900_v50  ;;  %v1472_v39 = vcombine.high %v1464_v36, %v1464_v36  ;;  %v1885_v28 = vcombine.low %v1456_v43, %v1464_v36  ;;  %v987_v57 = vsel %vm962_vm7, %v958_v51, %v769_v58 }
 0x15b   : > { %v1884_v2 = vcombine.low %v1876_v5, %v1883_v44  ;;  %v1016_v10 = vsel %vm991_vm8, %v987_v57, %v777_v37  ;;  %v902_v7 = vsel %vm875_vm4, %v873_v29, %v769_v58  ;;  %v874_v43 = vsel %vm846_vm3, %v845_v23, %v10524_v41  ;;  %v10615_v23 = vld [vmem:[%s12936_s4] ss:$0 sm:$0xff] }
 0x15c   : > { %v1886_v56 = vcombine.low %v1472_v39, %v1471_v12  ;;  %v1893_v35 = vrot.slane %v1885_v28, %v9900_v50  ;;  %v931_v49 = vsel %vm904_vm5, %v902_v7, %v777_v37 }
 0x15d   : > { %v773_v53 = vpop.permute.xlu1 %772  ;;  %9105 = vmatmul.mubr.msk.f32.gmra.mxu0 %vm12949_vm10, %v1884_v2  ;;  %v785_v59 = vpop.permute.xlu0 %784 }
 0x15e   : > { %v1045_v21 = vsel %vm1020_vm9, %v1016_v10, %v785_v59  ;;  %9107 = vmatprep.mubr.msk.f32.mxu0 %vm9635_vm1, %v9634_v14  ;;  %v1900_v15 = vrot.slane %v1886_v56, %v9900_v50  ;;  %v988_v38 = vsel %vm962_vm7, %v959_v62, %v773_v53  ;;  %v960_v42 = vsel %vm933_vm6, %v931_v49, %v785_v59 }
 0x15f   : > { %v1473_v55 = vcombine.high %v1045_v21, %v1045_v21  ;;  %v1480_v32 = vrot.slane %v1045_v21, %v9900_v50  ;;  %v903_v4 = vsel %vm875_vm4, %v874_v43, %v773_v53 }
 0x160   : > { %v1901_v17 = vcombine.low %v1893_v35, %v1900_v15 }
 0x161   : > { %v789_v31 = vpop.permute.xlu1 %788  ;;  %v1487_v45 = vrot.slane %v1473_v55, %v9900_v50  ;;  %v1488_v54 = vcombine.high %v1480_v32, %v1480_v32  ;;  %v781_v60 = vpop.permute.xlu0 %780 }
 0x162   : > { %v1017_v46 = vsel %vm991_vm8, %v988_v38, %v781_v60  ;;  %9108 = vmatmul.mubr.msk.f32.gmra.mxu0 %vm12949_vm10, %v1901_v17  ;;  %v932_v36 = vsel %vm904_vm5, %v903_v4, %v781_v60 }
 0x163   : > { %v1489_v61 = vcombine.high %v1487_v45, %v1487_v45  ;;  %v1902_v9 = vcombine.low %v1480_v32, %v1488_v54  ;;  %v1046_v13 = vsel %vm1020_vm9, %v1017_v46, %v789_v31  ;;  %9110 = vmatprep.mubr.msk.f32.mxu0 %vm9635_vm1, %v9634_v14  ;;  %v961_v51 = vsel %vm933_vm6, %v932_v36, %v789_v31 }
 0x164   : > { %v1497_v47 = vrot.slane %v1046_v13, %v9900_v50  ;;  %v1490_v40 = vcombine.high %v1046_v13, %v1046_v13 }
 0x165   : > { %v804_v3 = vpop.permute.xlu1 %803  ;;  %v1903_v26 = vcombine.low %v1487_v45, %v1489_v61  ;;  %v796_v19 = vpop.permute.xlu0 %795  ;;  %v1910_v25 = vrot.slane %v1902_v9, %v9900_v50 }
 0x166   : > { %v989_v33 = vsel %vm962_vm7, %v960_v42, %v796_v19  ;;  %v1505_v34 = vcombine.high %v1497_v47, %v1497_v47  ;;  %v1504_v12 = vrot.slane %v1490_v40, %v9900_v50 }
 0x167   : > { %v1917_v30 = vrot.slane %v1903_v26, %v9900_v50  ;;  %v1018_v0 = vsel %vm991_vm8, %v989_v33, %v804_v3 }
 0x168   : > { %v1919_v41 = vcombine.low %v1497_v47, %v1505_v34 }
 0x169   : > { %v800_v37 = vpop.permute.xlu1 %799  ;;  %v812_v58 = vpop.permute.xlu0 %811  ;;  %v1918_v5 = vcombine.low %v1910_v25, %v1917_v30 }
 0x16a   : > { %v1047_v44 = vsel %vm1020_vm9, %v1018_v0, %v812_v58  ;;  %v990_v27 = vsel %vm962_vm7, %v961_v51, %v800_v37  ;;  %v1927_v35 = vrot.slane %v1919_v41, %v9900_v50 }
 0x16b   : > { %v1506_v39 = vcombine.high %v1047_v44, %v1047_v44  ;;  %v1513_v28 = vrot.slane %v1047_v44, %v9900_v50  ;;  %9111 = vmatmul.mubr.msk.f32.gmra.mxu0 %vm12949_vm10, %v1918_v5 }
 0x16c   : > { %9113 = vmatprep.mubr.msk.f32.mxu0 %vm9635_vm1, %v9634_v14 }
 0x16d   : > { %v1520_v57 = vrot.slane %v1506_v39, %v9900_v50  ;;  %v1521_v2 = vcombine.high %v1513_v28, %v1513_v28  ;;  %v1920_v52 = vcombine.low %v1504_v12, %v1513_v28  ;;  %v808_v53 = vpop.permute.xlu0 %807  ;;  %v816_v56 = vpop.permute.xlu1 %815 }
 0x16e   : > { %v1019_v63 = vsel %vm991_vm8, %v990_v27, %v808_v53 }
 0x16f   : > { %v1934_v10 = vrot.slane %v1920_v52, %v9900_v50  ;;  %v1048_v59 = vsel %vm1020_vm9, %v1019_v63, %v816_v56  ;;  %v1522_v21 = vcombine.high %v1520_v57, %v1520_v57  ;;  %v1936_v15 = vcombine.low %v1521_v2, %v1520_v57 }
 0x170   : > { %v1523_v48 = vcombine.high %v1048_v59, %v1048_v59  ;;  %v1530_v55 = vrot.slane %v1048_v59, %v9900_v50 }
 0x171   : > { %v1935_v32 = vcombine.low %v1927_v35, %v1934_v10  ;;  %v1944_v17 = vrot.slane %v1936_v15, %v9900_v50 }
 0x172   : > { %v1537_v29 = vrot.slane %v1523_v48, %v9900_v50  ;;  %v1538_v62 = vcombine.high %v1530_v55, %v1530_v55  ;;  %v1937_v31 = vcombine.low %v1522_v21, %v1530_v55 }
 0x173   : > { %9114 = vmatmul.mubr.msk.f32.gmra.mxu0 %vm12949_vm10, %v1935_v32 }
 0x174   : > { %v1951_v7 = vrot.slane %v1937_v31, %v9900_v50  ;;  %9116 = vmatprep.mubr.msk.f32.mxu0 %vm9635_vm1, %v9634_v14  ;;  %v1953_v38 = vcombine.low %v1538_v62, %v1537_v29 }
 0x176   : > { %v1952_v45 = vcombine.low %v1944_v17, %v1951_v7  ;;  %v1960_v54 = vrot.slane %v1953_v38, %v9900_v50 }
 0x178   : > { %9117 = vmatmul.mubr.msk.f32.gmra.mxu0 %vm12949_vm10, %v1952_v45 }
 0x179   : > { %9119 = vmatprep.mubr.msk.f32.mxu0 %vm9635_vm1, %v9634_v14 }
 0x17c   : > { %9120 = vmatmul.mubr.msk.f32.gmra.mxu0 %vm12949_vm10, %v1960_v54  ;;  %vm3761_vm10 = vcmask 261120  }
 0x194   : > { %v2082_v60 = vpop.f32.mrf.mxu0 }
 0x195   : > { %v2083_v61 = vadd.f32 %v10615_v23, %v2082_v60 }
 0x196   : > { %v9049_v46 = vpop.f32.mrf.mxu0 }
 0x197   : > { %v8756_v9 = vmul.f32 -1.442695, %v2083_v61 }
 0x199   : > { %9304 = vpow2.f32 %v8756_v9 }
 0x1a4   : > { %v2087_v13 = vpop.f32.mrf.mxu0 }
 0x1a5   : > { %v2088_v49 = vadd.f32 %v10615_v23, %v2087_v13 }
 0x1a6   : > { %v9052_v47 = vpop.f32.mrf.mxu0  ;;  %v9305_v43 = vpop.eup %9304 }
 0x1a7   : > { %v8757_v3 = vmul.f32 -1.442695, %v2088_v49  ;;  %v2281_v25 = vadd.f32 1.0, %v9305_v43 }
 0x1a9   : > { %9306 = vpow2.f32 %v8757_v3 }
 0x1ac   : > { %v2092_v42 = vpop.f32.mrf.mxu0 }
 0x1ad   : > { %v2093_v26 = vadd.f32 %v10615_v23, %v2092_v42 }
 0x1ae   : > { %v9055_v19 = vpop.f32.mrf.mxu0 }
 0x1af   : > { %v8758_v33 = vmul.f32 -1.442695, %v2093_v26 }
 0x1b1   : > { %9308 = vpow2.f32 %v8758_v33  ;;  %v2097_v40 = vpop.f32.mrf.mxu0 }
 0x1b2   : > { %v10621_v34 = vadd.f32 %v10615_v23, %v2097_v40  ;;  %9310 = vrcp.f32 %v2281_v25 }
 0x1b3   : > { %v9058_v30 = vpop.f32.mrf.mxu0 }
 0x1b4   : > { %v8759_v4 = vmul.f32 -1.442695, %v10621_v34 }
 0x1b6   : > { %v9307_v36 = vpop.eup %9306  ;;  %v2102_v37 = vpop.f32.mrf.mxu0  ;;  %9312 = vpow2.f32 %v8759_v4 }
 0x1b7   : > { %v2282_v0 = vadd.f32 1.0, %v9307_v36  ;;  %v10625_v58 = vadd.f32 %v10615_v23, %v2102_v37 }
 0x1b8   : > { %v9061_v5 = vpop.f32.mrf.mxu0 }
 0x1b9   : > { %9314 = vrcp.f32 %v2282_v0  ;;  %v8760_v44 = vmul.f32 -1.442695, %v10625_v58 }
 0x1bb   : > { %9316 = vpow2.f32 %v8760_v44 }
 0x1bd   : > { %v2107_v12 = vpop.f32.mrf.mxu0 }
 0x1be   : > { %v9309_v41 = vpop.eup %9308  ;;  %v10629_v28 = vadd.f32 %v10615_v23, %v2107_v12 }
 0x1bf   : > { %v2283_v39 = vadd.f32 1.0, %v9309_v41  ;;  %v9064_v51 = vpop.f32.mrf.mxu0  ;;  %v9311_v57 = vpop.eup %9310 }
 0x1c0   : > { %v8761_v27 = vmul.f32 -1.442695, %v10629_v28  ;;  %v2356_v56 = vmul.f32 %v9311_v57, %v2083_v61 }
 0x1c1   : > { %9318 = vrcp.f32 %v2283_v39 }
 0x1c2   : > { %9320 = vpow2.f32 %v8761_v27  ;;  %v2406_v32 = vcombine.high %v2356_v56, %v2356_v56  ;;  %v2413_v62 = vrot.slane %v2356_v56, %v9900_v50 }
 0x1c3   : > { %v9313_v2 = vpop.eup %9312 }
 0x1c4   : > { %v2284_v52 = vadd.f32 1.0, %v9313_v2  ;;  %v2420_v45 = vrot.slane %v2406_v32, %v9900_v50  ;;  %v2421_v13 = vcombine.high %v2413_v62, %v2413_v62 }
 0x1c5   : > { %v2112_v63 = vpop.f32.mrf.mxu0 }
 0x1c6   : > { %v9315_v53 = vpop.eup %9314  ;;  %9322 = vrcp.f32 %v2284_v52  ;;  %v10633_v59 = vadd.f32 %v10615_v23, %v2112_v63  ;;  %v2422_v19 = vcombine.high %v2420_v45, %v2420_v45 }
 0x1c7   : > { %v2357_v10 = vmul.f32 %v9315_v53, %v2088_v49  ;;  %v9067_v35 = vpop.f32.mrf.mxu0 }
 0x1c8   : > { %v9317_v21 = vpop.eup %9316  ;;  %v8762_v55 = vmul.f32 -1.442695, %v10633_v59 }
 0x1c9   : > { %v2423_v15 = vcombine.high %v2357_v10, %v2357_v10  ;;  %v2285_v48 = vadd.f32 1.0, %v9317_v21  ;;  %v2430_v43 = vrot.slane %v2357_v10, %v9900_v50 }
 0x1cb   : > { %v2437_v29 = vrot.slane %v2423_v15, %v9900_v50  ;;  %9324 = vrcp.f32 %v2285_v48  ;;  %v2117_v31 = vpop.f32.mrf.mxu0  ;;  %v2438_v39 = vcombine.high %v2430_v43, %v2430_v43 }
 0x1cc   : > { %9326 = vpow2.f32 %v8762_v55  ;;  %v10639_v7 = vadd.f32 %v10615_v23, %v2117_v31 }
 0x1cd   : > { %v2439_v17 = vcombine.high %v2437_v29, %v2437_v29  ;;  %v9070_v54 = vpop.f32.mrf.mxu0 }
 0x1ce   : > { %v9319_v38 = vpop.eup %9318  ;;  %v8763_v61 = vmul.f32 -1.442695, %v10639_v7 }
 0x1cf   : > { %v2920_v60 = vadd.f32 %v2439_v17, %v2413_v62  ;;  %v2358_v46 = vmul.f32 %v9319_v38, %v2093_v26  ;;  %v9321_v9 = vpop.eup %9320 }
 0x1d0   : > { %v2286_v42 = vadd.f32 1.0, %v9321_v9  ;;  %9328 = vpow2.f32 %v8763_v61 }
 0x1d1   : > { %v8781_v49 = vrot.slane %v2920_v60, 9  ;;  %v2440_v47 = vcombine.high %v2358_v46, %v2358_v46  ;;  %v2447_v3 = vrot.slane %v2358_v46, %v9900_v50 }
 0x1d2   : > { %9330 = vrcp.f32 %v2286_v42 }
 0x1d3   : > { %v2454_v33 = vrot.slane %v2440_v47, %v9900_v50  ;;  %v2455_v25 = vcombine.high %v2447_v3, %v2447_v3  ;;  %v2921_v40 = vadd.f32 %v2447_v3, %v2421_v13  ;;  %v9323_v30 = vpop.eup %9322  ;;  %v3165_v4 = vadd.f32 %v8781_v49, %v2920_v60  ;;  %v2122_v26 = vpop.f32.mrf.mxu0 }
 0x1d4   : > { %v2359_v44 = vmul.f32 %v9323_v30, %v10621_v34  ;;  %v10648_v41 = vadd.f32 %v10615_v23, %v2122_v26 }
 0x1d5   : > { %v2456_v36 = vcombine.high %v2454_v33, %v2454_v33  ;;  %v2922_v37 = vadd.f32 %v2455_v25, %v2420_v45  ;;  %v2923_v0 = vadd.f32 %v2454_v33, %v2422_v19  ;;  %v8782_v5 = vrot.slane %v2921_v40, 9  ;;  %v9073_v12 = vpop.f32.mrf.mxu0 }
 0x1d6   : > { %v3214_v52 = vmul.f32 0.25, %v3165_v4  ;;  %v2457_v56 = vcombine.high %v2359_v44, %v2359_v44  ;;  %v2464_v63 = vrot.slane %v2359_v44, %v9900_v50  ;;  %v8764_v34 = vmul.f32 -1.442695, %v10648_v41 }
 0x1d7   : > { %v2924_v51 = vadd.f32 %v2456_v36, %v2430_v43  ;;  %v8783_v27 = vrot.slane %v2922_v37, 9  ;;  %v8784_v57 = vrot.slane %v2923_v0, 9  ;;  %v3166_v53 = vadd.f32 %v8782_v5, %v2921_v40 }
 0x1d8   : > { %v9325_v2 = vpop.eup %9324  ;;  %v2472_v32 = vcombine.high %v2464_v63, %v2464_v63  ;;  %v2925_v62 = vadd.f32 %v2464_v63, %v2438_v39  ;;  %v3291_v38 = vrot.slane %v3214_v52, %v9820_v6  ;;  %v2471_v45 = vrot.slane %v2457_v56, %v9900_v50 }
 0x1d9   : > { %v3167_v10 = vadd.f32 %v8783_v27, %v2922_v37  ;;  %v3168_v21 = vadd.f32 %v8784_v57, %v2923_v0  ;;  %v10652_v35 = vmul.f32 %v9325_v2, %v10625_v58  ;;  %v9327_v15 = vpop.eup %9326  ;;  %v8785_v48 = vrot.slane %v2924_v51, 9 }
 0x1da   : > { %v3215_v55 = vmul.f32 0.25, %v3166_v53  ;;  %v2926_v54 = vadd.f32 %v2472_v32, %v2437_v29  ;;  %v8786_v60 = vrot.slane %v2925_v62, 9  ;;  %v2287_v9 = vadd.f32 1.0, %v9327_v15 }
 0x1db   : > { %v3216_v31 = vmul.f32 0.25, %v3167_v10  ;;  %v3217_v17 = vmul.f32 0.25, %v3168_v21  ;;  %v2127_v46 = vpop.f32.mrf.mxu0  ;;  %v2474_v61 = vcombine.high %v10652_v35, %v10652_v35  ;;  %9332 = vpow2.f32 %v8764_v34 }
 0x1dc   : > { %v3295_v58 = vrot.slane %v3215_v55, %v9820_v6  ;;  %v8787_v13 = vrot.slane %v2926_v54, 9  ;;  %v3170_v49 = vadd.f32 %v8786_v60, %v2925_v62  ;;  %v10661_v47 = vadd.f32 %v10615_v23, %v2127_v46 }
 0x1dd   : > { %v9076_v3 = vpop.f32.mrf.mxu0  ;;  %v3169_v42 = vadd.f32 %v8785_v48, %v2924_v51  ;;  %v9329_v19 = vpop.eup %9328  ;;  %v10665_v29 = vrot.slane %v10652_v35, %v9900_v50  ;;  %9334 = vrcp.f32 %v2287_v9  ;;  %v3299_v43 = vrot.slane %v3216_v31, %v9820_v6 }
 0x1de   : > { %v3303_v33 = vrot.slane %v3217_v17, %v9820_v6  ;;  %v2288_v25 = vadd.f32 1.0, %v9329_v19  ;;  %v8765_v40 = vmul.f32 -1.442695, %v10661_v47  ;;  %v3219_v4 = vmul.f32 0.25, %v3170_v49 }
 0x1df   : > { %v3218_v30 = vmul.f32 0.25, %v3169_v42  ;;  %v9331_v26 = vpop.eup %9330  ;;  %v3442_v36 = vsel %vm12948_vm11, %v3299_v43, %v3295_v58  ;;  %v3171_v37 = vadd.f32 %v8787_v13, %v2926_v54  ;;  %v3389_v5 = vsel %vm12948_vm11, %v3295_v58, %v3291_v38 }
 0x1e0   : > { %v3502_v0 = vsel %vm12948_vm11, %v3303_v33, %v3299_v43  ;;  %v2361_v44 = vmul.f32 %v9331_v26, %v10629_v28  ;;  %9336 = vrcp.f32 %v2288_v25  ;;  %v3425_v51 = vrot.slane %v3219_v4, %v9820_v6 }
 0x1e1   : > { %v2132_v12 = vpop.f32.mrf.mxu0  ;;  %v3307_v39 = vrot.slane %v3218_v30, %v9820_v6  ;;  %9338 = vpow2.f32 %v8765_v40  ;;  %v3443_v57 = vsel %vm12947_vm12, %v3303_v33, %v3442_v36  ;;  %v3220_v2 = vmul.f32 0.25, %v3171_v37 }
 0x1e2   : > { %v10677_v27 = vadd.f32 %v10615_v23, %v2132_v12  ;;  %v2491_v52 = vcombine.high %v2361_v44, %v2361_v44  ;;  %v10681_v53 = vrot.slane %v2361_v44, %v9900_v50  ;;  %v2473_v48 = vcombine.high %v2471_v45, %v2471_v45 }
 0x1e3   : > { %v3444_v56 = vsel %vm12946_vm13, %v3307_v39, %v3443_v57  ;;  %v9079_v28 = vpop.f32.mrf.mxu0  ;;  %v3503_v63 = vsel %vm12947_vm12, %v3307_v39, %v3502_v0  ;;  %v3485_v34 = vrot.slane %v3220_v2, %v9820_v6  ;;  %v3391_v31 = vsel %vm12947_vm12, %v3299_v43, %v3389_v5 }
 0x1e4   : > { %v8766_v10 = vmul.f32 -1.442695, %v10677_v27  ;;  %v3445_v21 = vsel %vm12945_vm14, %v3425_v51, %v3444_v56  ;;  %v3504_v15 = vsel %vm12946_vm13, %v3425_v51, %v3503_v63  ;;  %v2505_v55 = vrot.slane %v2491_v52, %v9900_v50 }
 0x1e5   : > { %v2506_v32 = vcombine.high %v10681_v53, %v10681_v53  ;;  %3462 = vrot.lane.b32.xlu1 %v3445_v21, %s9637_s25  ;;  %v3505_v17 = vsel %vm12945_vm14, %v3485_v34, %v3504_v15  ;;  %v3393_v54 = vsel %vm12946_vm13, %v3303_v33, %v3391_v31  ;;  %v2489_v12 = vcombine.high %v10665_v29, %v10665_v29 }
 0x1e6   : > { %v2137_v62 = vpop.f32.mrf.mxu0  ;;  %9340 = vpow2.f32 %v8766_v10  ;;  %v2507_v60 = vcombine.high %v2505_v55, %v2505_v55  ;;  %v2928_v58 = vadd.f32 %v2505_v55, %v2473_v48  ;;  %3522 = vrot.lane.b32.xlu0 %v3505_v17, %s9638_s19  ;;  %v10701_v13 = vsel %vm12945_vm14, %v3307_v39, %v3393_v54 }
 0x1e7   : > { %v10696_v38 = vadd.f32 %v10615_v23, %v2137_v62  ;;  %v2927_v46 = vadd.f32 %v2506_v32, %v2471_v45  ;;  %v2488_v45 = vrot.slane %v2474_v61, %v9900_v50 }
 0x1e8   : > { %v9082_v9 = vpop.f32.mrf.mxu0  ;;  %v9333_v3 = vpop.eup %9332  ;;  %v2929_v42 = vadd.f32 %v2507_v60, %v10665_v29  ;;  %v8789_v43 = vrot.slane %v2928_v58, 9 }
 0x1e9   : > { %v8767_v49 = vmul.f32 -1.442695, %v10696_v38  ;;  %v8788_v19 = vrot.slane %v2927_v46, 9  ;;  %v2289_v25 = vadd.f32 1.0, %v9333_v3  ;;  %v2490_v57 = vcombine.high %v2488_v45, %v2488_v45 }
 0x1ea   : > { %v9335_v33 = vpop.eup %9334  ;;  %v8790_v40 = vrot.slane %v2929_v42, 9  ;;  %v3173_v4 = vadd.f32 %v8789_v43, %v2928_v58 }
 0x1eb   : > { %9342 = vpow2.f32 %v8767_v49  ;;  %v3172_v30 = vadd.f32 %v8788_v19, %v2927_v46  ;;  %v2362_v26 = vmul.f32 %v9335_v33, %v10633_v59 }
 0x1ec   : > { %9344 = vrcp.f32 %v2289_v25  ;;  %v3174_v36 = vadd.f32 %v8790_v40, %v2929_v42  ;;  %v3222_v0 = vmul.f32 0.25, %v3173_v4 }
 0x1ed   : > { %v3221_v37 = vmul.f32 0.25, %v3172_v30  ;;  %v2142_v5 = vpop.f32.mrf.mxu0  ;;  %v9337_v44 = vpop.eup %9336  ;;  %v2508_v39 = vcombine.high %v2362_v26, %v2362_v26  ;;  %v2515_v51 = vrot.slane %v2362_v26, %v9900_v50 }
 0x1ee   : > { %v10714_v35 = vadd.f32 %v10615_v23, %v2142_v5  ;;  %v9339_v61 = vpop.eup %9338  ;;  %v3223_v63 = vmul.f32 0.25, %v3174_v36  ;;  %v3315_v21 = vrot.slane %v3222_v0, %v9820_v6  ;;  %v2363_v62 = vmul.f32 %v9337_v44, %v10639_v7 }
 0x1ef   : > { %v9085_v2 = vpop.f32.mrf.mxu0  ;;  %v2522_v59 = vrot.slane %v2508_v39, %v9900_v50  ;;  %v2523_v52 = vcombine.high %v2515_v51, %v2515_v51  ;;  %v2930_v56 = vadd.f32 %v2515_v51, %v2489_v12  ;;  %v2290_v28 = vadd.f32 1.0, %v9339_v61 }
 0x1f0   : > { %v3311_v10 = vrot.slane %v3221_v37, %v9820_v6  ;;  %v8768_v29 = vmul.f32 -1.442695, %v10714_v35  ;;  %v3319_v9 = vrot.slane %v3223_v63, %v9820_v6  ;;  %v2525_v4 = vcombine.high %v2363_v62, %v2363_v62 }
 0x1f1   : > { %v2524_v34 = vcombine.high %v2522_v59, %v2522_v59  ;;  %v2931_v15 = vadd.f32 %v2523_v52, %v2488_v45  ;;  %v2932_v48 = vadd.f32 %v2522_v59, %v2490_v57  ;;  %v8791_v55 = vrot.slane %v2930_v56, 9 }
 0x1f2   : > { %9346 = vrcp.f32 %v2290_v28  ;;  %v3396_v49 = vsel %vm12948_vm11, %v3315_v21, %v3311_v10  ;;  %v3446_v2 = vsel %vm12948_vm11, %v3319_v9, %v3315_v21 }
 0x1f3   : > { %v9341_v32 = vpop.eup %9340  ;;  %v2933_v31 = vadd.f32 %v2524_v34, %v10681_v53  ;;  %v8792_v17 = vrot.slane %v2931_v15, 9  ;;  %v8793_v54 = vrot.slane %v2932_v48, 9  ;;  %v3175_v60 = vadd.f32 %v8791_v55, %v2930_v56 }
 0x1f4   : > { %v2291_v46 = vadd.f32 1.0, %v9341_v32  ;;  %9348 = vpow2.f32 %v8768_v29  ;;  %v3397_v36 = vsel %vm12947_vm12, %v3319_v9, %v3396_v49 }
 0x1f5   : > { %v2147_v58 = vpop.f32.mrf.mxu0  ;;  %v3177_v3 = vadd.f32 %v8793_v54, %v2932_v48  ;;  %v3224_v42 = vmul.f32 0.25, %v3175_v60  ;;  %v3176_v43 = vadd.f32 %v8792_v17, %v2931_v15  ;;  %v8794_v53 = vrot.slane %v2933_v31, 9 }
 0x1f6   : > { %v10725_v19 = vadd.f32 %v10615_v23, %v2147_v58  ;;  %9350 = vrcp.f32 %v2291_v46  ;;  %v2532_v15 = vrot.slane %v2363_v62, %v9900_v50 }
 0x1f7   : > { %v9088_v25 = vpop.f32.mrf.mxu0  ;;  %v3226_v33 = vmul.f32 0.25, %v3177_v3  ;;  %v3225_v40 = vmul.f32 0.25, %v3176_v43  ;;  %v3323_v26 = vrot.slane %v3224_v42, %v9820_v6  ;;  %v3178_v37 = vadd.f32 %v8794_v53, %v2933_v31 }
 0x1f8   : > { %v9343_v7 = vpop.eup %9342  ;;  %v8769_v5 = vmul.f32 -1.442695, %v10725_v19  ;;  %v2539_v31 = vrot.slane %v2525_v4, %v9900_v50  ;;  %v2540_v58 = vcombine.high %v2532_v15, %v2532_v15 }
 0x1f9   : > { %v2292_v45 = vadd.f32 1.0, %v9343_v7  ;;  %v9345_v30 = vpop.eup %9344  ;;  %v3327_v44 = vrot.slane %v3225_v40, %v9820_v6  ;;  %v3429_v12 = vrot.slane %v3226_v33, %v9820_v6  ;;  %v3398_v39 = vsel %vm12946_vm13, %v3323_v26, %v3397_v36 }
 0x1fa   : > { %v2364_v0 = vmul.f32 %v9345_v30, %v10648_v41  ;;  %v3227_v51 = vmul.f32 0.25, %v3178_v37  ;;  %v3506_v61 = vsel %vm12948_vm11, %v3323_v26, %v3319_v9  ;;  %v3447_v10 = vsel %vm12947_vm12, %v3323_v26, %v3446_v2 }
 0x1fb   : > { %v2152_v57 = vpop.f32.mrf.mxu0  ;;  %9352 = vrcp.f32 %v2292_v45  ;;  %v10737_v52 = vsel %vm12945_vm14, %v3327_v44, %v3398_v39  ;;  %v3507_v41 = vsel %vm12947_vm12, %v3327_v44, %v3506_v61  ;;  %v3448_v34 = vsel %vm12946_vm13, %v3327_v44, %v3447_v10 }
 0x1fc   : > { %v2542_v59 = vcombine.high %v2364_v0, %v2364_v0  ;;  %3566 = vrot.lane.b32.xlu0 %v10737_v52, %s9639_s28  ;;  %v3489_v56 = vrot.slane %v3227_v51, %v9820_v6  ;;  %v3508_v28 = vsel %vm12946_vm13, %v3429_v12, %v3507_v41  ;;  %v10745_v63 = vadd.f32 %v10615_v23, %v2152_v57 }
 0x1fd   : > { %v9091_v21 = vpop.f32.mrf.mxu0  ;;  %9354 = vpow2.f32 %v8769_v5  ;;  %v3449_v54 = vsel %vm12945_vm14, %v3429_v12, %v3448_v34  ;;  %v2541_v7 = vcombine.high %v2539_v31, %v2539_v31  ;;  %v2549_v25 = vrot.slane %v2364_v0, %v9900_v50 }
 0x1fe   : > { %v2556_v29 = vrot.slane %v2542_v59, %v9900_v50  ;;  %v3509_v48 = vsel %vm12945_vm14, %v3489_v56, %v3508_v28  ;;  %v8770_v55 = vmul.f32 -1.442695, %v10745_v63 }
 0x1ff   : > { %v9347_v32 = vpop.eup %9346  ;;  %3614 = vrot.lane.b32.xlu1 %v3509_v48, %s9640_s14  ;;  %v2557_v0 = vcombine.high %v2549_v25, %v2549_v25 }
 0x200   : > { %v2558_v17 = vcombine.high %v2556_v29, %v2556_v29  ;;  %v2365_v60 = vmul.f32 %v9347_v32, %v10661_v47  ;;  %9356 = vpow2.f32 %v8770_v55  ;;  %3464 = vrot.lane.b32.xlu0 %v3449_v54, %s9637_s25 }
 0x201   : > { %v9349_v46 = vpop.eup %9348 }
 0x202   : > { %v2934_v62 = vadd.f32 %v2558_v17, %v2532_v15  ;;  %v2559_v9 = vcombine.high %v2365_v60, %v2365_v60  ;;  %v2566_v49 = vrot.slane %v2365_v60, %v9900_v50  ;;  %v2293_v3 = vadd.f32 1.0, %v9349_v46 }
 0x203   : > { %v2157_v42 = vpop.f32.mrf.mxu0  ;;  %v9351_v43 = vpop.eup %9350 }
 0x204   : > { %v8795_v53 = vrot.slane %v2934_v62, 9  ;;  %v2573_v33 = vrot.slane %v2559_v9, %v9900_v50  ;;  %v2574_v45 = vcombine.high %v2566_v49, %v2566_v49  ;;  %v2935_v47 = vadd.f32 %v2566_v49, %v2540_v58  ;;  %3590 = vrot.lane.b32.xlu0 %v3449_v54, %s9641_s16 }
 0x205   : > { %v2366_v40 = vmul.f32 %v9351_v43, %v10677_v27  ;;  %v9094_v30 = vpop.f32.mrf.mxu0  ;;  %9358 = vrcp.f32 %v2293_v3  ;;  %v10764_v4 = vadd.f32 %v10615_v23, %v2157_v42 }
 0x206   : > { %v2575_v26 = vcombine.high %v2573_v33, %v2573_v33  ;;  %v2936_v36 = vadd.f32 %v2574_v45, %v2539_v31  ;;  %v2937_v37 = vadd.f32 %v2573_v33, %v2541_v7  ;;  %v8796_v5 = vrot.slane %v2935_v47, 9 }
 0x207   : > { %v3179_v44 = vadd.f32 %v8795_v53, %v2934_v62  ;;  %v2583_v12 = vrot.slane %v2366_v40, %v9900_v50  ;;  %v8771_v59 = vmul.f32 -1.442695, %v10764_v4  ;;  %v2576_v54 = vcombine.high %v2366_v40, %v2366_v40 }
 0x208   : > { %v9353_v39 = vpop.eup %9352  ;;  %v8797_v51 = vrot.slane %v2936_v36, 9  ;;  %v8798_v61 = vrot.slane %v2937_v37, 9  ;;  %v3180_v27 = vadd.f32 %v8796_v5, %v2935_v47  ;;  %3524 = vrot.lane.b32.xlu0 %v3509_v48, %s9638_s19  ;;  %v2938_v56 = vadd.f32 %v2575_v26, %v2549_v25 }
 0x209   : > { %v2591_v57 = vcombine.high %v2583_v12, %v2583_v12  ;;  %v2939_v2 = vadd.f32 %v2583_v12, %v2557_v0  ;;  %v3228_v15 = vmul.f32 0.25, %v3179_v44  ;;  %v10771_v58 = vmul.f32 %v9353_v39, %v10696_v38 }
 0x20a   : > { %v9355_v41 = vpop.eup %9354  ;;  %v3181_v28 = vadd.f32 %v8797_v51, %v2936_v36  ;;  %v3182_v10 = vadd.f32 %v8798_v61, %v2937_v37  ;;  %v3229_v21 = vmul.f32 0.25, %v3180_v27  ;;  %9360 = vpow2.f32 %v8771_v59 }
 0x20b   : > { %v2162_v34 = vpop.f32.mrf.mxu0  ;;  %v2940_v55 = vadd.f32 %v2591_v57, %v2556_v29  ;;  %v8800_v32 = vrot.slane %v2939_v2, 9  ;;  %v2294_v9 = vadd.f32 1.0, %v9355_v41  ;;  %v8799_v42 = vrot.slane %v2938_v56, 9 }
 0x20c   : > { %v3230_v31 = vmul.f32 0.25, %v3181_v28  ;;  %v3231_v17 = vmul.f32 0.25, %v3182_v10  ;;  %v3335_v48 = vrot.slane %v3229_v21, %v9820_v6  ;;  %v10774_v3 = vadd.f32 %v10615_v23, %v2162_v34 }
 0x20d   : > { %v9097_v60 = vpop.f32.mrf.mxu0  ;;  %v9357_v46 = vpop.eup %9356  ;;  %v3184_v62 = vadd.f32 %v8800_v32, %v2939_v2  ;;  %v8801_v29 = vrot.slane %v2940_v55, 9  ;;  %9362 = vrcp.f32 %v2294_v9  ;;  %v3331_v43 = vrot.slane %v3228_v15, %v9820_v6 }
 0x20e   : > { %v2295_v49 = vadd.f32 1.0, %v9357_v46  ;;  %v3339_v7 = vrot.slane %v3230_v31, %v9820_v6  ;;  %v8772_v53 = vmul.f32 -1.442695, %v10774_v3  ;;  %v3183_v33 = vadd.f32 %v8799_v42, %v2938_v56 }
 0x20f   : > { %v3233_v25 = vmul.f32 0.25, %v3184_v62  ;;  %v3343_v38 = vrot.slane %v3231_v17, %v9820_v6  ;;  %v3400_v47 = vsel %vm12948_vm11, %v3335_v48, %v3331_v43  ;;  %v2590_v36 = vrot.slane %v2576_v54, %v9900_v50 }
 0x210   : > { %9364 = vrcp.f32 %v2295_v49  ;;  %v3450_v30 = vsel %vm12948_vm11, %v3339_v7, %v3335_v48  ;;  %v3232_v37 = vmul.f32 0.25, %v3183_v33  ;;  %v3401_v5 = vsel %vm12947_vm12, %v3339_v7, %v3400_v47 }
 0x211   : > { %v2167_v45 = vpop.f32.mrf.mxu0  ;;  %9366 = vpow2.f32 %v8772_v53  ;;  %v3402_v12 = vsel %vm12946_vm13, %v3343_v38, %v3401_v5  ;;  %v3185_v51 = vadd.f32 %v8801_v29, %v2940_v55  ;;  %v3433_v27 = vrot.slane %v3233_v25, %v9820_v6 }
 0x212   : > { %v10782_v40 = vadd.f32 %v10615_v23, %v2167_v45  ;;  %v9359_v26 = vpop.eup %9358  ;;  %v3347_v61 = vrot.slane %v3232_v37, %v9820_v6  ;;  %v3451_v57 = vsel %vm12947_vm12, %v3343_v38, %v3450_v30  ;;  %v3510_v2 = vsel %vm12948_vm11, %v3343_v38, %v3339_v7 }
 0x213   : > { %v9100_v0 = vpop.f32.mrf.mxu0  ;;  %v2368_v44 = vmul.f32 %v9359_v26, %v10714_v35  ;;  %v3234_v35 = vmul.f32 0.25, %v3185_v51  ;;  %v2592_v28 = vcombine.high %v2590_v36, %v2590_v36  ;;  %v2593_v17 = vcombine.high %v10771_v58, %v10771_v58 }
 0x214   : > { %v8773_v39 = vmul.f32 -1.442695, %v10782_v40  ;;  %v10798_v10 = vsel %vm12945_vm14, %v3347_v61, %v3402_v12  ;;  %v3511_v21 = vsel %vm12947_vm12, %v3347_v61, %v3510_v2  ;;  %v3452_v31 = vsel %vm12946_vm13, %v3347_v61, %v3451_v57 }
 0x215   : > { %v2610_v41 = vcombine.high %v2368_v44, %v2368_v44  ;;  %v10795_v56 = vrot.slane %v2368_v44, %v9900_v50  ;;  %3658 = vrot.lane.b32.xlu0 %v10798_v10, %s9642_s17  ;;  %3568 = vrot.lane.b32.xlu1 %v10798_v10, %s9639_s28  ;;  %v3493_v54 = vrot.slane %v3234_v35, %v9820_v6 }
 0x216   : > { %v2172_v59 = vpop.f32.mrf.mxu0  ;;  %9368 = vpow2.f32 %v8773_v39  ;;  %v3512_v60 = vsel %vm12946_vm13, %v3433_v27, %v3511_v21  ;;  %v2600_v48 = vrot.slane %v10771_v58, %v9900_v50  ;;  %v3453_v42 = vsel %vm12945_vm14, %v3433_v27, %v3452_v31 }
 0x217   : > { %v10802_v34 = vadd.f32 %v10615_v23, %v2172_v59  ;;  %v2624_v55 = vrot.slane %v2610_v41, %v9900_v50  ;;  %v2625_v32 = vcombine.high %v10795_v56, %v10795_v56  ;;  %v10821_v29 = vsel %vm12945_vm14, %v3493_v54, %v3512_v60  ;;  %v9361_v43 = vpop.eup %9360 }
 0x218   : > { %v9103_v15 = vpop.f32.mrf.mxu0  ;;  %v2607_v38 = vrot.slane %v2593_v17, %v9900_v50  ;;  %v2296_v45 = vadd.f32 1.0, %v9361_v43  ;;  %v2608_v12 = vcombine.high %v2600_v48, %v2600_v48 }
 0x219   : > { %v8774_v46 = vmul.f32 -1.442695, %v10802_v34  ;;  %v2626_v62 = vcombine.high %v2624_v55, %v2624_v55  ;;  %v2941_v9 = vadd.f32 %v2625_v32, %v2590_v36  ;;  %v2942_v49 = vadd.f32 %v2624_v55, %v2592_v28  ;;  %3466 = vrot.lane.b32.xlu1 %v3453_v42, %s9637_s25  ;;  %3706 = vrot.lane.b32.xlu0 %v10821_v29, %s9643_s20 }
 0x21a   : > { %v9363_v33 = vpop.eup %9362  ;;  %v2609_v35 = vcombine.high %v2607_v38, %v2607_v38 }
 0x21b   : > { %9370 = vpow2.f32 %v8774_v46  ;;  %v2943_v7 = vadd.f32 %v2626_v62, %v2600_v48  ;;  %v8802_v25 = vrot.slane %v2941_v9, 9  ;;  %v8803_v53 = vrot.slane %v2942_v49, 9 }
 0x21c   : > { %v2369_v37 = vmul.f32 %v9363_v33, %v10725_v19  ;;  %9372 = vrcp.f32 %v2296_v45 }
 0x21d   : > { %v2177_v58 = vpop.f32.mrf.mxu0  ;;  %v8804_v30 = vrot.slane %v2943_v7, 9  ;;  %v3186_v26 = vadd.f32 %v8802_v25, %v2941_v9  ;;  %v3187_v36 = vadd.f32 %v8803_v53, %v2942_v49  ;;  %v9365_v0 = vpop.eup %9364  ;;  %3592 = vrot.lane.b32.xlu1 %v3453_v42, %s9641_s16 }
 0x21e   : > { %v10828_v47 = vadd.f32 %v10615_v23, %v2177_v58  ;;  %v9367_v44 = vpop.eup %9366  ;;  %v2627_v61 = vcombine.high %v2369_v37, %v2369_v37  ;;  %v2634_v57 = vrot.slane %v2369_v37, %v9900_v50  ;;  %v2370_v28 = vmul.f32 %v9365_v0, %v10745_v63 }
 0x21f   : > { %v9106_v5 = vpop.f32.mrf.mxu0  ;;  %v3188_v39 = vadd.f32 %v8804_v30, %v2943_v7  ;;  %v3235_v51 = vmul.f32 0.25, %v3186_v26  ;;  %v3236_v27 = vmul.f32 0.25, %v3187_v36  ;;  %v2297_v2 = vadd.f32 1.0, %v9367_v44 }
 0x220   : > { %v8775_v59 = vmul.f32 -1.442695, %v10828_v47  ;;  %v2641_v19 = vrot.slane %v2627_v61, %v9900_v50  ;;  %v2642_v32 = vcombine.high %v2634_v57, %v2634_v57  ;;  %v2944_v31 = vadd.f32 %v2634_v57, %v2608_v12 }
 0x221   : > { %v3237_v15 = vmul.f32 0.25, %v3188_v39  ;;  %v3351_v55 = vrot.slane %v3235_v51, %v9820_v6  ;;  %9374 = vrcp.f32 %v2297_v2  ;;  %3682 = vrot.lane.b32.xlu1 %v3453_v42, %s12952_s23  ;;  %v3355_v48 = vrot.slane %v3236_v27, %v9820_v6 }
 0x222   : > { %v2182_v41 = vpop.f32.mrf.mxu0  ;;  %v2643_v54 = vcombine.high %v2641_v19, %v2641_v19  ;;  %v2946_v60 = vadd.f32 %v2641_v19, %v2609_v35  ;;  %v2945_v62 = vadd.f32 %v2642_v32, %v2607_v38  ;;  %v8805_v9 = vrot.slane %v2944_v31, 9 }
 0x223   : > { %v9369_v21 = vpop.eup %9368  ;;  %9376 = vpow2.f32 %v8775_v59  ;;  %v10841_v43 = vadd.f32 %v10615_v23, %v2182_v41  ;;  %v2644_v53 = vcombine.high %v2370_v28, %v2370_v28  ;;  %v3359_v33 = vrot.slane %v3237_v15, %v9820_v6 }
 0x224   : > { %v9109_v17 = vpop.f32.mrf.mxu0  ;;  %v2298_v46 = vadd.f32 1.0, %v9369_v21  ;;  %v2947_v63 = vadd.f32 %v2643_v54, %v10795_v56  ;;  %v8807_v49 = vrot.slane %v2946_v60, 9  ;;  %v8806_v7 = vrot.slane %v2945_v62, 9 }
 0x225   : > { %v3189_v25 = vadd.f32 %v8805_v9, %v2944_v31  ;;  %3526 = vrot.lane.b32.xlu1 %v10821_v29, %s9638_s19  ;;  %v8776_v42 = vmul.f32 -1.442695, %v10841_v43  ;;  %v3404_v36 = vsel %vm12948_vm11, %v3355_v48, %v3351_v55  ;;  %v2651_v37 = vrot.slane %v2370_v28, %v9900_v50 }
 0x226   : > { %9378 = vrcp.f32 %v2298_v46  ;;  %v3191_v38 = vadd.f32 %v8807_v49, %v2946_v60  ;;  %v8808_v45 = vrot.slane %v2947_v63, 9  ;;  %v3190_v26 = vadd.f32 %v8806_v7, %v2945_v62 }
 0x227   : > { %v3238_v30 = vmul.f32 0.25, %v3189_v25  ;;  %9380 = vpow2.f32 %v8776_v42  ;;  %v2658_v27 = vrot.slane %v2644_v53, %v9900_v50  ;;  %v3405_v57 = vsel %vm12947_vm12, %v3359_v33, %v3404_v36 }
 0x228   : > { %v9371_v58 = vpop.eup %9370  ;;  %v3240_v0 = vmul.f32 0.25, %v3191_v38  ;;  %v3192_v44 = vadd.f32 %v8808_v45, %v2947_v63  ;;  %v3239_v12 = vmul.f32 0.25, %v3190_v26  ;;  %v3454_v2 = vsel %vm12948_vm11, %v3359_v33, %v3355_v48 }
 0x229   : > { %v2299_v56 = vadd.f32 1.0, %v9371_v58  ;;  %v3363_v39 = vrot.slane %v3238_v30, %v9820_v6  ;;  %v9373_v61 = vpop.eup %9372  ;;  %3616 = vrot.lane.b32.xlu1 %v10821_v29, %s9640_s14  ;;  %v2659_v60 = vcombine.high %v2651_v37, %v2651_v37  ;;  %v2660_v9 = vcombine.high %v2658_v27, %v2658_v27 }
 0x22a   : > { %v2371_v41 = vmul.f32 %v9373_v61, %v10764_v4  ;;  %v3367_v35 = vrot.slane %v3239_v12, %v9820_v6  ;;  %v3437_v21 = vrot.slane %v3240_v0, %v9820_v6  ;;  %v3241_v55 = vmul.f32 0.25, %v3192_v44 }
 0x22b   : > { %v2187_v5 = vpop.f32.mrf.mxu0  ;;  %9382 = vrcp.f32 %v2299_v56  ;;  %v3406_v19 = vsel %vm12946_vm13, %v3363_v39, %v3405_v57  ;;  %v3455_v15 = vsel %vm12947_vm12, %v3363_v39, %v3454_v2  ;;  %v3514_v29 = vsel %vm12948_vm11, %v3363_v39, %v3359_v33 }
 0x22c   : > { %v10851_v51 = vadd.f32 %v10615_v23, %v2187_v5  ;;  %v2661_v32 = vcombine.high %v2371_v41, %v2371_v41  ;;  %v10866_v31 = vsel %vm12945_vm14, %v3367_v35, %v3406_v19  ;;  %v3456_v4 = vsel %vm12946_vm13, %v3367_v35, %v3455_v15 }
 0x22d   : > { %v9112_v59 = vpop.f32.mrf.mxu0  ;;  %3660 = vrot.lane.b32.xlu0 %v10866_v31, %s9642_s17  ;;  %3570 = vrot.lane.b32.xlu1 %v10866_v31, %s9639_s28  ;;  %v3515_v17 = vsel %vm12947_vm12, %v3367_v35, %v3514_v29  ;;  %v2668_v46 = vrot.slane %v2371_v41, %v9900_v50  ;;  %v3457_v49 = vsel %vm12945_vm14, %v3437_v21, %v3456_v4 }
 0x22e   : > { %v8777_v28 = vmul.f32 -1.442695, %v10851_v51  ;;  %v9375_v54 = vpop.eup %9374  ;;  %v2675_v48 = vrot.slane %v2661_v32, %v9900_v50  ;;  %v3497_v7 = vrot.slane %v3241_v55, %v9820_v6  ;;  %v3516_v33 = vsel %vm12946_vm13, %v3437_v21, %v3515_v17 }
 0x22f   : > { %v2372_v63 = vmul.f32 %v9375_v54, %v10774_v3  ;;  %v2676_v26 = vcombine.high %v2668_v46, %v2668_v46 }
 0x230   : > { %9384 = vpow2.f32 %v8777_v28  ;;  %v9377_v62 = vpop.eup %9376  ;;  %v2677_v58 = vcombine.high %v2675_v48, %v2675_v48  ;;  %v3517_v12 = vsel %vm12945_vm14, %v3497_v7, %v3516_v33 }
 0x231   : > { %v2300_v42 = vadd.f32 1.0, %v9377_v62  ;;  %v2678_v45 = vcombine.high %v2372_v63, %v2372_v63  ;;  %v2685_v30 = vrot.slane %v2372_v63, %v9900_v50  ;;  %3684 = vrot.lane.b32.xlu1 %v3457_v49, %s12952_s23  ;;  %3468 = vrot.lane.b32.xlu0 %v3457_v49, %s9637_s25 }
 0x232   : > { %v2948_v36 = vadd.f32 %v2677_v58, %v2651_v37 }
 0x233   : > { %v2192_v25 = vpop.f32.mrf.mxu0  ;;  %v9379_v53 = vpop.eup %9378  ;;  %9386 = vrcp.f32 %v2300_v42  ;;  %v2692_v0 = vrot.slane %v2678_v45, %v9900_v50  ;;  %v2693_v44 = vcombine.high %v2685_v30, %v2685_v30 }
 0x234   : > { %v10881_v38 = vadd.f32 %v10615_v23, %v2192_v25  ;;  %v2373_v56 = vmul.f32 %v9379_v53, %v10782_v40  ;;  %v2949_v23 = vadd.f32 %v2685_v30, %v2659_v60  ;;  %v8809_v39 = vrot.slane %v2948_v36, 9  ;;  %v9381_v2 = vpop.eup %9380 }
 0x235   : > { %v9115_v3 = vpop.f32.mrf.mxu0  ;;  %v2694_v59 = vcombine.high %v2692_v0, %v2692_v0  ;;  %v2950_v41 = vadd.f32 %v2693_v44, %v2658_v27  ;;  %v2951_v35 = vadd.f32 %v2692_v0, %v2660_v9  ;;  %3594 = vrot.lane.b32.xlu0 %v3457_v49, %s9641_s16  ;;  %3618 = vrot.lane.b32.xlu1 %v3517_v12, %s9640_s14  ;;  %v2301_v42 = vadd.f32 1.0, %v9381_v2 }
 0x236   : > { %v8778_v5 = vmul.f32 -1.442695, %v10881_v38  ;;  %v2695_v61 = vcombine.high %v2373_v56, %v2373_v56  ;;  %v2702_v40 = vrot.slane %v2373_v56, %v9900_v50  ;;  %v8810_v37 = vrot.slane %v2949_v23, 9 }
 0x237   : > { %v3193_v28 = vadd.f32 %v8809_v39, %v2948_v36  ;;  %v8811_v29 = vrot.slane %v2950_v41, 9  ;;  %v8812_v32 = vrot.slane %v2951_v35, 9  ;;  %v2952_v17 = vadd.f32 %v2694_v59, %v2668_v46 }
 0x238   : > { %9388 = vpow2.f32 %v8778_v5  ;;  %v2197_v57 = vpop.f32.mrf.mxu0  ;;  %v9383_v19 = vpop.eup %9382  ;;  %v2710_v21 = vcombine.high %v2702_v40, %v2702_v40  ;;  %v2953_v15 = vadd.f32 %v2702_v40, %v2676_v26  ;;  %v3194_v4 = vadd.f32 %v8810_v37, %v2949_v23 }
 0x239   : > { %v10894_v54 = vrot.slane %v2695_v61, %v9900_v50  ;;  %v3195_v63 = vadd.f32 %v8811_v29, %v2950_v41  ;;  %v3196_v49 = vadd.f32 %v8812_v32, %v2951_v35  ;;  %v10897_v25 = vmul.f32 %v9383_v19, %v10802_v34  ;;  %3528 = vrot.lane.b32.xlu0 %v3517_v12, %s9638_s19  ;;  %v9528_v34 = vld [vmem:[%s12936_s4] ss:$0 sm:$0xff] }
 0x23a   : > { %v9118_v55 = vpop.f32.mrf.mxu0  ;;  %v2954_v60 = vadd.f32 %v2710_v21, %v2675_v48  ;;  %v8814_v27 = vrot.slane %v2953_v15, 9  ;;  %v3243_v7 = vmul.f32 0.25, %v3194_v4  ;;  %v3242_v53 = vmul.f32 0.25, %v3193_v28 }
 0x23b   : > { %v3244_v46 = vmul.f32 0.25, %v3195_v63  ;;  %v3245_v45 = vmul.f32 0.25, %v3196_v49  ;;  %v2711_v56 = vcombine.high %v10894_v54, %v10894_v54  ;;  %9390 = vrcp.f32 %v2301_v42 }
 0x23c   : > { %v2202_v62 = vpop.f32.mrf.mxu0  ;;  %v3198_v58 = vadd.f32 %v8814_v27, %v2953_v15  ;;  %v3375_v48 = vrot.slane %v3243_v7, %v9820_v6  ;;  %v10906_v3 = vadd.f32 %v9528_v34, %v2197_v57  ;;  %v8815_v26 = vrot.slane %v2954_v60, 9 }
 0x23d   : > { %v9385_v9 = vpop.eup %9384  ;;  %v2712_v36 = vcombine.high %v10897_v25, %v10897_v25  ;;  %3708 = vrot.lane.b32.xlu0 %v3517_v12, %s9643_s20  ;;  %v10911_v5 = vadd.f32 %v9528_v34, %v2202_v62  ;;  %v8813_v0 = vrot.slane %v2952_v17, 9  ;;  %v3371_v39 = vrot.slane %v3242_v53, %v9820_v6 }
 0x23e   : > { %v9121_v33 = vpop.f32.mrf.mxu0  ;;  %v2302_v30 = vadd.f32 1.0, %v9385_v9  ;;  %v3247_v44 = vmul.f32 0.25, %v3198_v58  ;;  %v8779_v23 = vmul.f32 -1.442695, %v10906_v3  ;;  %v3379_v61 = vrot.slane %v3244_v46, %v9820_v6 }
 0x23f   : > { %v8780_v57 = vmul.f32 -1.442695, %v10911_v5  ;;  %v3197_v2 = vadd.f32 %v8813_v0, %v2952_v17  ;;  %v3383_v59 = vrot.slane %v3245_v45, %v9820_v6  ;;  %v10920_v12 = vrot.slane %v10897_v25, %v9900_v50 }
 0x240   : > { %v9387_v40 = vpop.eup %9386  ;;  %9392 = vrcp.f32 %v2302_v30  ;;  %v3408_v35 = vsel %vm12948_vm11, %v3375_v48, %v3371_v39  ;;  %v3458_v21 = vsel %vm12948_vm11, %v3379_v61, %v3375_v48  ;;  %v3199_v17 = vadd.f32 %v8815_v26, %v2954_v60 }
 0x241   : > { %v2375_v41 = vmul.f32 %v9387_v40, %v10828_v47  ;;  %9394 = vpow2.f32 %v8779_v23  ;;  %v3246_v19 = vmul.f32 0.25, %v3197_v2  ;;  %v3409_v28 = vsel %vm12947_vm12, %v3379_v61, %v3408_v35 }
 0x242   : > { %9396 = vpow2.f32 %v8780_v57  ;;  %v3410_v32 = vsel %vm12946_vm13, %v3383_v59, %v3409_v28  ;;  %v3459_v47 = vsel %vm12947_vm12, %v3383_v59, %v3458_v21  ;;  %v3518_v27 = vsel %vm12948_vm11, %v3383_v59, %v3379_v61 }
 0x243   : > { %v2729_v15 = vcombine.high %v2375_v41, %v2375_v41  ;;  %v2736_v55 = vrot.slane %v2375_v41, %v9900_v50  ;;  %v3387_v4 = vrot.slane %v3246_v19, %v9820_v6  ;;  %v3441_v63 = vrot.slane %v3247_v44, %v9820_v6 }
 0x244   : > { %v3248_v25 = vmul.f32 0.25, %v3199_v17  ;;  %v2726_v48 = vrot.slane %v2712_v36, %v9900_v50  ;;  %v2727_v59 = vcombine.high %v10920_v12, %v10920_v12 }
 0x245   : > { %v9389_v37 = vpop.eup %9388  ;;  %v2743_v62 = vrot.slane %v2729_v15, %v9900_v50  ;;  %v2744_v9 = vcombine.high %v2736_v55, %v2736_v55  ;;  %v10934_v49 = vsel %vm12945_vm14, %v3387_v4, %v3410_v32  ;;  %v3460_v7 = vsel %vm12946_vm13, %v3387_v4, %v3459_v47 }
 0x246   : > { %v2303_v29 = vadd.f32 1.0, %v9389_v37  ;;  %v3519_v53 = vsel %vm12947_vm12, %v3387_v4, %v3518_v27  ;;  %3662 = vrot.lane.b32.xlu0 %v10934_v49, %s9642_s17  ;;  %3572 = vrot.lane.b32.xlu1 %v10934_v49, %s9639_s28  ;;  %v3461_v34 = vsel %vm12945_vm14, %v3441_v63, %v3460_v7  ;;  %v3501_v26 = vrot.slane %v3248_v25, %v9820_v6 }
 0x247   : > { %v2745_v58 = vcombine.high %v2743_v62, %v2743_v62  ;;  %v2955_v42 = vadd.f32 %v2744_v9, %v10894_v54  ;;  %v2956_v60 = vadd.f32 %v2743_v62, %v2711_v56  ;;  %v3520_v54 = vsel %vm12946_vm13, %v3441_v63, %v3519_v53 }
 0x248   : > { %9398 = vrcp.f32 %v2303_v29  ;;  %v9391_v30 = vpop.eup %9390  ;;  %v3521_v35 = vsel %vm12945_vm14, %v3501_v26, %v3520_v54  ;;  %v2728_v19 = vcombine.high %v2726_v48, %v2726_v48 }
 0x249   : > { %v2957_v33 = vadd.f32 %v2745_v58, %v10920_v12  ;;  %v8816_v46 = vrot.slane %v2955_v42, 9  ;;  %v8817_v45 = vrot.slane %v2956_v60, 9  ;;  %v2376_v23 = vmul.f32 %v9391_v30, %v10841_v43 }
 0x24a   : > { %3686 = vrot.lane.b32.xlu1 %v3461_v34, %s12952_s23  ;;  %3470 = vrot.lane.b32.xlu0 %v3461_v34, %s9637_s25 }
 0x24b   : > { %v8818_v56 = vrot.slane %v2957_v33, 9  ;;  %v3200_v0 = vadd.f32 %v8816_v46, %v2955_v42  ;;  %v3201_v44 = vadd.f32 %v8817_v45, %v2956_v60  ;;  %v2746_v36 = vcombine.high %v2376_v23, %v2376_v23 }
 0x24c   : > { %v2753_v41 = vrot.slane %v2376_v23, %v9900_v50 }
 0x24d   : > { %v9393_v39 = vpop.eup %9392  ;;  %v3202_v61 = vadd.f32 %v8818_v56, %v2957_v33  ;;  %v3249_v40 = vmul.f32 0.25, %v3200_v0  ;;  %v3250_v57 = vmul.f32 0.25, %v3201_v44  ;;  %v2760_v28 = vrot.slane %v2746_v36, %v9900_v50 }
 0x24e   : > { %v9395_v2 = vpop.eup %9394  ;;  %3596 = vrot.lane.b32.xlu0 %v3461_v34, %s9641_s16  ;;  %3530 = vrot.lane.b32.xlu1 %v3521_v35, %s9638_s19  ;;  %v2761_v29 = vcombine.high %v2753_v41, %v2753_v41  ;;  %v2958_v32 = vadd.f32 %v2753_v41, %v2727_v59  ;;  %v2377_v33 = vmul.f32 %v9393_v39, %v10851_v51 }
 0x24f   : > { %v9397_v37 = vpop.eup %9396  ;;  %v3251_v43 = vmul.f32 0.25, %v3202_v61  ;;  %v3545_v21 = vrot.slane %v3249_v40, %v9820_v6  ;;  %v3549_v15 = vrot.slane %v3250_v57, %v9820_v6  ;;  %v2762_v12 = vcombine.high %v2760_v28, %v2760_v28 }
 0x250   : > { %v2960_v4 = vadd.f32 %v2760_v28, %v2728_v19  ;;  %v2304_v47 = vadd.f32 1.0, %v9395_v2  ;;  %v2305_v17 = vadd.f32 1.0, %v9397_v37  ;;  %v2959_v62 = vadd.f32 %v2761_v29, %v2726_v48  ;;  %v363_v29 = vld [vmem:[%s12937_s5 + $0x20] sm:$0xf] }
 0x251   : > { %v8819_v9 = vrot.slane %v2958_v32, 9  ;;  %v3553_v63 = vrot.slane %v3251_v43, %v9820_v6  ;;  %v2961_v7 = vadd.f32 %v2762_v12, %v2736_v55  ;;  %v3562_v60 = vsel %vm12948_vm11, %v3549_v15, %v3545_v21  ;;  %9122 = vmatprep.subr.msk.mxu1 %vm4143_vm15, %v363_v29  ;;  %9222 = vmatprep.subr.msk.mxu0 %vm4143_vm15, %v363_v29 }
 0x252   : > { %v8821_v25 = vrot.slane %v2960_v4, 9  ;;  %9400 = vrcp.f32 %v2304_v47  ;;  %3620 = vrot.lane.b32.xlu1 %v3521_v35, %s9640_s14  ;;  %v8820_v58 = vrot.slane %v2959_v62, 9  ;;  %v2770_v51 = vrot.slane %v2377_v33, %v9900_v50  ;;  %9123 = vmatpush3.msk.msra.mxu1 %vm4143_vm15, %v363_v29 }
 0x253   : > { %v3203_v42 = vadd.f32 %v8819_v9, %v2958_v32  ;;  %9402 = vrcp.f32 %v2305_v17  ;;  %v3563_v34 = vsel %vm12947_vm12, %v3553_v63, %v3562_v60  ;;  %v3586_v26 = vsel %vm12948_vm11, %v3553_v63, %v3549_v15  ;;  %9223 = vmatpush3.msk.msra.mxu0 %vm4143_vm15, %v363_v29 }
 0x254   : > { %v3205_v45 = vadd.f32 %v8821_v25, %v2960_v4  ;;  %v3204_v48 = vadd.f32 %v8820_v58, %v2959_v62  ;;  %v8822_v54 = vrot.slane %v2961_v7, 9  ;;  %v2763_v41 = vcombine.high %v2377_v33, %v2377_v33  ;;  %v362_v62 = vld [vmem:[%s12937_s5 + $0x18] sm:$0xff] }
 0x255   : > { %v9399_v27 = vpop.eup %9398  ;;  %v3252_v30 = vmul.f32 0.25, %v3203_v42  ;;  %9124 = vmatprep.subr.mxu1 %v362_v62  ;;  %9224 = vmatprep.subr.mxu0 %v362_v62  ;;  %vm3731_vm15 = vcmask 97280  }
 0x256   : > { %v2378_v53 = vmul.f32 %v9399_v27, %v10881_v38  ;;  %3710 = vrot.lane.b32.xlu1 %v3521_v35, %s9643_s20  ;;  %v3254_v38 = vmul.f32 0.25, %v3205_v45  ;;  %v3253_v56 = vmul.f32 0.25, %v3204_v48  ;;  %v3206_v39 = vadd.f32 %v8822_v54, %v2961_v7  ;;  %9125 = vmatpush3.msra.mxu1 %v362_v62 }
 0x257   : > { %v3557_v0 = vrot.slane %v3252_v30, %v9820_v6  ;;  %v2777_v12 = vrot.slane %v2763_v41, %v9900_v50  ;;  %v2778_v7 = vcombine.high %v2770_v51, %v2770_v51  ;;  %v359_v30 = vld [vmem:[%s12937_s5] sm:$0xff]  ;;  %9225 = vmatpush3.msra.mxu0 %v362_v62 }
 0x258   : > { %v2780_v46 = vcombine.high %v2378_v53, %v2378_v53  ;;  %v3585_v23 = vrot.slane %v3254_v38, %v9820_v6  ;;  %v3561_v61 = vrot.slane %v3253_v56, %v9820_v6  ;;  %v3255_v59 = vmul.f32 0.25, %v3206_v39 }
 0x259   : > { %v3564_v40 = vsel %vm12946_vm13, %v3557_v0, %v3563_v34  ;;  %v3587_v57 = vsel %vm12947_vm12, %v3557_v0, %v3586_v26  ;;  %v3610_v36 = vsel %vm12948_vm11, %v3557_v0, %v3553_v63  ;;  %v2787_v4 = vrot.slane %v2378_v53, %v9900_v50  ;;  %v361_v53 = vld [vmem:[%s12937_s5 + $0x10] sm:$0xff] }
 0x25a   : > { %v10967_v55 = vrot.slane %v2780_v46, %v9900_v50  ;;  %v3565_v35 = vsel %vm12945_vm14, %v3561_v61, %v3564_v40  ;;  %v3588_v37 = vsel %vm12946_vm13, %v3561_v61, %v3587_v57  ;;  %v3611_v19 = vsel %vm12947_vm12, %v3561_v61, %v3610_v36  ;;  %9126 = vmatprep.subr.mxu1 %v361_v53 }
 0x25b   : > { %3574 = vrot.lane.b32.xlu0 %v3565_v35, %s9639_s28  ;;  %v3589_v43 = vsel %vm12945_vm14, %v3585_v23, %v3588_v37  ;;  %v3609_v28 = vrot.slane %v3255_v59, %v9820_v6  ;;  %v3612_v15 = vsel %vm12946_vm13, %v3585_v23, %v3611_v19  ;;  %v2779_v58 = vcombine.high %v2777_v12, %v2777_v12 }
 0x25c   : > { %v2796_v44 = vcombine.high %v10967_v55, %v10967_v55  ;;  %3598 = vrot.lane.b32.xlu1 %v3589_v43, %s9641_s16  ;;  %v2795_v42 = vcombine.high %v2787_v4, %v2787_v4  ;;  %9127 = vmatpush3.msra.mxu1 %v361_v53 }
 0x25d   : > { %v3613_v27 = vsel %vm12945_vm14, %v3609_v28, %v3612_v15  ;;  %9226 = vmatprep.subr.mxu0 %v361_v53 }
 0x25e   : > { %v2962_v2 = vadd.f32 %v2796_v44, %v2770_v51  ;;  %9227 = vmatpush3.msra.mxu0 %v361_v53 }
 0x25f   : > { %v9401_v32 = vpop.eup %9400  ;;  %3664 = vrot.lane.b32.xlu0 %v3565_v35, %s9642_s17 }
 0x260   : > { %v8823_v21 = vrot.slane %v2962_v2, 9  ;;  %v9403_v47 = vpop.eup %9402  ;;  %v2379_v17 = vmul.f32 %v9401_v32, %v10906_v3  ;;  %3622 = vrot.lane.b32.xlu1 %v3613_v27, %s9640_s14 }
 0x261   : > { %v2380_v63 = vmul.f32 %v9403_v47, %v10911_v5  ;;  %v360_v5 = vld [vmem:[%s12937_s5 + $0x8] sm:$0xff] }
 0x262   : > { %v3207_v9 = vadd.f32 %v8823_v21, %v2962_v2  ;;  %v2797_v25 = vcombine.high %v2379_v17, %v2379_v17  ;;  %v2804_v3 = vrot.slane %v2379_v17, %v9900_v50  ;;  %9128 = vmatprep.subr.mxu1 %v360_v5  ;;  %9228 = vmatprep.subr.mxu0 %v360_v5 }
 0x263   : > { %v2820_v60 = vrot.slane %v2380_v63, %v9900_v50  ;;  %3688 = vrot.lane.b32.xlu0 %v3589_v43, %s12952_s23  ;;  %9129 = vmatpush3.msra.mxu1 %v360_v5 }
 0x264   : > { %v2811_v33 = vrot.slane %v2797_v25, %v9900_v50  ;;  %v2812_v46 = vcombine.high %v2804_v3, %v2804_v3  ;;  %v2963_v45 = vadd.f32 %v2804_v3, %v2778_v7  ;;  %v3256_v48 = vmul.f32 0.25, %v3207_v9  ;;  %3712 = vrot.lane.b32.xlu1 %v3613_v27, %s9643_s20  ;;  %9130 = vmatprep.subr.mxu1 %v359_v30 }
 0x265   : > { %v2821_v34 = vcombine.high %v2820_v60, %v2820_v60  ;;  %v2967_v38 = vadd.f32 %v2820_v60, %v2795_v42  ;;  %9131 = vmatpush3.msra.mxu1 %v359_v30  ;;  %9229 = vmatpush3.msra.mxu0 %v360_v5 }
 0x266   : > { %v2813_v26 = vcombine.high %v2811_v33, %v2811_v33  ;;  %v2964_v54 = vadd.f32 %v2812_v46, %v2777_v12  ;;  %v2965_v56 = vadd.f32 %v2811_v33, %v2779_v58  ;;  %v8824_v0 = vrot.slane %v2963_v45, 9  ;;  %9138 = vmatprep.subr.mxu1 %v9634_v14  ;;  %9230 = vmatprep.subr.mxu0 %v359_v30  ;;  %v3523_v46 = vpop.permute.xlu0 %3522 }
 0x267   : > { %v2968_v51 = vadd.f32 %v2821_v34, %v10967_v55  ;;  %v8828_v44 = vrot.slane %v2967_v38, 9  ;;  %v3637_v2 = vrot.slane %v3256_v48, %v9820_v6  ;;  %9231 = vmatpush3.msra.mxu0 %v359_v30  ;;  %v11048_v30 = vld [vmem:[%s12933_s1] ss:$0 sm:$0xff]  ;;  %v3463_v34 = vpop.permute.xlu1 %3462 }
 0x268   : > { %v2966_v23 = vadd.f32 %v2813_v26, %v2787_v4  ;;  %v8825_v39 = vrot.slane %v2964_v54, 9  ;;  %v8826_v61 = vrot.slane %v2965_v56, 9  ;;  %v3208_v40 = vadd.f32 %v8824_v0, %v2963_v45  ;;  %9238 = vmatprep.subr.mxu0 %v9634_v14  ;;  %v8844_v45 = vld [vmem:[%s9799_s27 + $0x10] sm:$0xff]  ;;  %v11054_v26 = vld [vmem:[%s12934_s2] ss:$0 sm:$0xff] }
 0x269   : > { %v8829_v57 = vrot.slane %v2968_v51, 9  ;;  %v3212_v36 = vadd.f32 %v8828_v44, %v2967_v38  ;;  %v4530_v48 = vmul.f32 %v11048_v30, %v8844_v45 }
 0x26a   : > { %v3209_v59 = vadd.f32 %v8825_v39, %v2964_v54  ;;  %v3210_v41 = vadd.f32 %v8826_v61, %v2965_v56  ;;  %v3257_v35 = vmul.f32 0.25, %v3208_v40  ;;  %v8827_v55 = vrot.slane %v2966_v23, 9 }
 0x26b   : > { %v3261_v37 = vmul.f32 0.25, %v3212_v36  ;;  %v3213_v19 = vadd.f32 %v8829_v57, %v2968_v51  ;;  %v11057_v54 = vadd.f32 %v11054_v26, %v4530_v48 }
 0x26c   : > { %v3258_v43 = vmul.f32 0.25, %v3209_v59  ;;  %v3259_v28 = vmul.f32 0.25, %v3210_v41  ;;  %v3641_v21 = vrot.slane %v3257_v35, %v9820_v6  ;;  %v3211_v15 = vadd.f32 %v8827_v55, %v2966_v23 }
 0x26d   : > { %v3262_v29 = vmul.f32 0.25, %v3213_v19  ;;  %v3677_v17 = vrot.slane %v3261_v37, %v9820_v6  ;;  %v4537_v56 = vrot.slane %v11057_v54, %v9820_v6  ;;  %v4548_v51 = vrot.slane %v11057_v54, %v9826_v8 }
 0x26e   : > { %v3260_v32 = vmul.f32 0.25, %v3211_v15  ;;  %v3645_v12 = vrot.slane %v3258_v43, %v9820_v6  ;;  %v3649_v4 = vrot.slane %v3259_v28, %v9820_v6  ;;  %v3654_v47 = vsel %vm12948_vm11, %v3641_v21, %v3637_v2  ;;  %v3567_v38 = vpop.permute.xlu0 %3566 }
 0x26f   : > { %v3701_v27 = vrot.slane %v3262_v29, %v9820_v6  ;;  %v4559_v40 = vrot.slane %v11057_v54, %v9833_v11  ;;  %v3721_v2 = vsel %vm904_vm5, %v10701_v13, %v3463_v34  ;;  %v9645_v55 = vmov 1966171168  }
 0x270   : > { %v3653_v62 = vrot.slane %v3260_v32, %v9820_v6  ;;  %v3655_v9 = vsel %vm12947_vm12, %v3645_v12, %v3654_v47  ;;  %v3702_v63 = vsel %vm12948_vm11, %v3649_v4, %v3645_v12  ;;  %v3678_v7 = vsel %vm12948_vm11, %v3645_v12, %v3641_v21 }
 0x271   : > { %v3656_v25 = vsel %vm12946_vm13, %v3649_v4, %v3655_v9  ;;  %v3679_v3 = vsel %vm12947_vm12, %v3649_v4, %v3678_v7  ;;  %v3615_v0 = vpop.permute.xlu1 %3614  ;;  %v3726_v35 = vsel %vm1020_vm9, %v3721_v2, %v3523_v46  ;;  %v3774_v37 = vunpack.c.l.s4 %v9645_v55 }
 0x272   : > { %v3657_v53 = vsel %vm12945_vm14, %v3653_v62, %v3656_v25  ;;  %v3703_v58 = vsel %vm12947_vm12, %v3653_v62, %v3702_v63  ;;  %v3680_v60 = vsel %vm12946_vm13, %v3653_v62, %v3679_v3  ;;  %v3465_v44 = vpop.permute.xlu0 %3464  ;;  %v3732_v19 = vsel %vm3731_vm15, %v3726_v35, %v3567_v38 }
 0x273   : > { %3666 = vrot.lane.b32.xlu0 %v3657_v53, %s9642_s17  ;;  %v3704_v42 = vsel %vm12946_vm13, %v3677_v17, %v3703_v58  ;;  %v3681_v33 = vsel %vm12945_vm14, %v3677_v17, %v3680_v60  ;;  %vm3743_vm13 = vcmask 162816   ;;  %vm3749_vm12 = vcmask 195584  }
 0x274   : > { %v3705_v5 = vsel %vm12945_vm14, %v3701_v27, %v3704_v42  ;;  %vm3737_vm14 = vcmask 130048   ;;  %vm3755_vm11 = vcmask 228352   ;;  %v3775_v21 = vunpack.c.0.s8 %v3774_v37 }
 0x275   : > { %3714 = vrot.lane.b32.xlu1 %v3705_v5, %s9643_s20  ;;  %v4570_v17 = vrot.slane %v11057_v54, %v9849_v16 }
 0x276   : > { %v3591_v39 = vpop.permute.xlu0 %3590  ;;  %v11078_v4 = vsub.s32 %v3775_v21, %v9805_v1  ;;  %v3722_v1 = vsel %vm904_vm5, %v10737_v52, %v3465_v44  ;;  %v4581_v52 = vrot.slane %v11057_v54, %v9854_v18 }
 0x277   : > { %3690 = vrot.lane.b32.xlu0 %v3681_v33, %s12952_s23  ;;  %v3738_v43 = vsel %vm3737_vm14, %v3732_v19, %v3591_v39  ;;  %s13004_s23 = smov 28  }
 0x278   : > { %v3744_v15 = vsel %vm3743_vm13, %v3738_v43, %v3615_v0 }
 0x279   : > { %4690 = vbcast.lane.b32.xlu1 %v4537_v56, 257 }
 0x27a   : > { %v3525_v36 = vpop.permute.xlu0 %3524 }
 0x27b   : > { %4539 = vbcast.lane.b32.xlu0 %v4537_v56, 256  ;;  %v3727_v3 = vsel %vm1020_vm9, %v3722_v1, %v3525_v36 }
 0x27d   : > { %4550 = vbcast.lane.b32.xlu1 %v4548_v51, 256 }
 0x27f   : > { %4802 = vbcast.lane.b32.xlu0 %v4537_v56, 258 }
 0x281   : > { %4810 = vbcast.lane.b32.xlu1 %v4548_v51, 258 }
 0x283   : > { %4698 = vbcast.lane.b32.xlu0 %v4548_v51, 257 }
 0x285   : > { %4543 = vbcast.lane.b32.xlu1 %v4537_v56, 264 }
 0x287   : > { %v3569_v23 = vpop.permute.xlu1 %3568  ;;  %4561 = vbcast.lane.b32.xlu0 %v4559_v40, 256  ;;  %v3659_v41 = vpop.permute.xlu0 %3658 }
 0x288   : > { %v3750_v29 = vsel %vm3749_vm12, %v3744_v15, %v3659_v41  ;;  %v3733_v53 = vsel %vm3731_vm15, %v3727_v3, %v3569_v23 }
 0x289   : > { %4706 = vbcast.lane.b32.xlu1 %v4559_v40, 257 }
 0x28b   : > { %v11063_v61 = vpop.permute.xlu1 %3466  ;;  %4694 = vbcast.lane.b32.xlu0 %v4537_v56, 265  ;;  %v3707_v13 = vpop.permute.xlu0 %3706 }
 0x28d   : > { %4818 = vbcast.lane.b32.xlu1 %v4559_v40, 258 }
 0x28f   : > { %v3593_v57 = vpop.permute.xlu1 %3592  ;;  %4806 = vbcast.lane.b32.xlu0 %v4537_v56, 266 }
 0x290   : > { %v3739_v60 = vsel %vm3737_vm14, %v3733_v53, %v3593_v57 }
 0x291   : > { %4702 = vbcast.lane.b32.xlu1 %v4548_v51, 265 }
 0x293   : > { %v3683_v59 = vpop.permute.xlu1 %3682  ;;  %4554 = vbcast.lane.b32.xlu0 %v4548_v51, 264 }
 0x294   : > { %v3756_v32 = vsel %vm3755_vm11, %v3750_v29, %v3683_v59 }
 0x295   : > { %4565 = vbcast.lane.b32.xlu1 %v4559_v40, 264  ;;  %v3762_v27 = vsel %vm3761_vm10, %v3756_v32, %v3707_v13 }
 0x296   : > { %v3779_v9 = vrot.slane %v3762_v27, %v11078_v4  ;;  %v3772_v58 = vcombine.high %v3762_v27, %v3762_v27  ;;  %v3723_v27 = vsel %vm904_vm5, %v10798_v10, %v11063_v61 }
 0x297   : > { %v11072_v28 = vpop.permute.xlu1 %3526  ;;  %4814 = vbcast.lane.b32.xlu0 %v4548_v51, 266 }
 0x298   : > { %v3787_v25 = vcombine.high %v3779_v9, %v3779_v9  ;;  %v3794_v45 = vrot.slane %v3779_v9, %v11078_v4  ;;  %v3786_v34 = vrot.slane %v3772_v58, %v11078_v4 }
 0x299   : > { %4572 = vbcast.lane.b32.xlu1 %v4570_v17, 256 }
 0x29a   : > { %v3808_v5 = vrot.slane %v3787_v25, %v11078_v4  ;;  %v3801_v39 = vrot.slane %v3786_v34, %v11078_v4  ;;  %v3728_v25 = vsel %vm1020_vm9, %v3723_v27, %v11072_v28 }
 0x29b   : > { %v3617_v47 = vpop.permute.xlu1 %3616  ;;  %4710 = vbcast.lane.b32.xlu0 %v4559_v40, 265 }
 0x29c   : > { %v3745_v46 = vsel %vm3743_vm13, %v3739_v60, %v3617_v47  ;;  %v3973_v0 = vcombine.low %v3794_v45, %v3808_v5  ;;  %v8831_v44 = vcombine.high %v3794_v45, %v3808_v5 }
 0x29d   : > { %4714 = vbcast.lane.b32.xlu1 %v4570_v17, 257 }
 0x29e   : > { %v3983_v2 = vrot.slane %v3973_v0, %v11078_v4  ;;  %v3990_v55 = vrot.slane %v8831_v44, %v11078_v4 }
 0x29f   : > { %v3661_v12 = vpop.permute.xlu0 %3660  ;;  %v3571_v63 = vpop.permute.xlu1 %3570  ;;  %4822 = vbcast.lane.b32.xlu0 %v4559_v40, 266 }
 0x2a0   : > { %v3751_v48 = vsel %vm3749_vm12, %v3745_v46, %v3661_v12  ;;  %v4005_v21 = vcombine.low %v3983_v2, %v3990_v55  ;;  %v3734_v1 = vsel %vm3731_vm15, %v3728_v25, %v3571_v63 }
 0x2a1   : > { %4826 = vbcast.lane.b32.xlu1 %v4570_v17, 258 }
 0x2a2   : > { %v4013_v32 = vrot.slane %v4005_v21, %v11078_v4 }
 0x2a3   : > { %v11083_v62 = vpop.permute.xlu0 %3468  ;;  %v3685_v33 = vpop.permute.xlu1 %3684  ;;  %4576 = vbcast.lane.b32.xlu0 %v4570_v17, 264 }
 0x2a4   : > { %v3757_v38 = vsel %vm3755_vm11, %v3751_v48, %v3685_v33 }
 0x2a5   : > { %4718 = vbcast.lane.b32.xlu1 %v4570_v17, 265 }
 0x2a7   : > { %v3595_v7 = vpop.permute.xlu0 %3594  ;;  %4583 = vbcast.lane.b32.xlu0 %v4581_v52, 256  ;;  %v3619_v36 = vpop.permute.xlu1 %3618 }
 0x2a8   : > { %v3740_v3 = vsel %vm3737_vm14, %v3734_v1, %v3595_v7  ;;  %v3724_v7 = vsel %vm904_vm5, %v10866_v31, %v11083_v62 }
 0x2a9   : > { %4830 = vbcast.lane.b32.xlu1 %v4570_v17, 266  ;;  %v3746_v60 = vsel %vm3743_vm13, %v3740_v3, %v3619_v36 }
 0x2ab   : > { %v11090_v42 = vpop.permute.xlu0 %3528  ;;  %4722 = vbcast.lane.b32.xlu0 %v4581_v52, 257 }
 0x2ac   : > { %v3729_v34 = vsel %vm1020_vm9, %v3724_v7, %v11090_v42 }
 0x2ad   : > { %4834 = vbcast.lane.b32.xlu1 %v4581_v52, 258 }
 0x2af   : > { %v3709_v56 = vpop.permute.xlu0 %3708  ;;  %4587 = vbcast.lane.b32.xlu0 %v4581_v52, 264 }
 0x2b0   : > { %v3763_v51 = vsel %vm3761_vm10, %v3757_v38, %v3709_v56 }
 0x2b1   : > { %v3818_v23 = vrot.slane %v3763_v51, %v11078_v4  ;;  %4726 = vbcast.lane.b32.xlu1 %v4581_v52, 265  ;;  %v3811_v45 = vcombine.high %v3763_v51, %v3763_v51 }
 0x2b3   : > { %v3826_v40 = vcombine.high %v3818_v23, %v3818_v23  ;;  %v3833_v57 = vrot.slane %v3818_v23, %v11078_v4  ;;  %4838 = vbcast.lane.b32.xlu0 %v4581_v52, 266  ;;  %v3825_v56 = vrot.slane %v3811_v45, %v11078_v4 }
 0x2b5   : > { %v3847_v59 = vrot.slane %v3826_v40, %v11078_v4  ;;  %v3848_v41 = vcombine.high %v3833_v57, %v3833_v57  ;;  %v3975_v35 = vcombine.low %v3801_v39, %v3833_v57  ;;  %v3840_v42 = vrot.slane %v3825_v56, %v11078_v4 }
 0x2b7   : > { %v3976_v37 = vcombine.low %v3847_v59, %v3848_v41  ;;  %v3997_v43 = vrot.slane %v3975_v35, %v11078_v4  ;;  %v3849_v40 = vcombine.high %v3847_v59, %v3847_v59 }
 0x2b8   : > { %v3573_v19 = vpop.permute.xlu1 %3572  ;;  %v3663_v47 = vpop.permute.xlu0 %3662 }
 0x2b9   : > { %v4004_v13 = vrot.slane %v3976_v37, %v11078_v4  ;;  %v3752_v5 = vsel %vm3749_vm12, %v3746_v60, %v3663_v47  ;;  %v3735_v0 = vsel %vm3731_vm15, %v3729_v34, %v3573_v19  ;;  %v4022_v19 = vcombine.low %v3849_v40, %v3840_v42 }
 0x2bb   : > { %v4006_v15 = vcombine.low %v3997_v43, %v4004_v13 }
 0x2bc   : > { %v3687_v29 = vpop.permute.xlu1 %3686  ;;  %v3471_v53 = vpop.permute.xlu0 %3470 }
 0x2bd   : > { %v4020_v12 = vrot.slane %v4006_v15, %v11078_v4  ;;  %v3758_v33 = vsel %vm3755_vm11, %v3752_v5, %v3687_v29  ;;  %v4032_v29 = vrot.slane %v4022_v19, %v11078_v4  ;;  %v3725_v1 = vsel %vm904_vm5, %v10934_v49, %v3471_v53 }
 0x2bf   : > { %v4021_v17 = vcombine.low %v4013_v32, %v4020_v12 }
 0x2c0   : > { %v3531_v9 = vpop.permute.xlu1 %3530  ;;  %v3597_v61 = vpop.permute.xlu0 %3596 }
 0x2c1   : > { %9132 = vmatprep.mubr.msk.f32.mxu1 %vm12951_vm0, %v4021_v17  ;;  %v3741_v51 = vsel %vm3737_vm14, %v3735_v0, %v3597_v61 }
 0x2c4   : > { %v3621_v58 = vpop.permute.xlu1 %3620 }
 0x2c5   : > { %v3747_v57 = vsel %vm3743_vm13, %v3741_v51, %v3621_v58  ;;  %v3730_v58 = vsel %vm1020_vm9, %v3725_v1, %v3531_v9 }
 0x2c8   : > { %v3711_v46 = vpop.permute.xlu1 %3710 }
 0x2c9   : > { %v3764_v10 = vsel %vm3761_vm10, %v3758_v33, %v3711_v46 }
 0x2ca   : > { %v3857_v28 = vrot.slane %v3764_v10, %v11078_v4  ;;  %v3850_v44 = vcombine.high %v3764_v10, %v3764_v10 }
 0x2cc   : > { %v3865_v48 = vcombine.high %v3857_v28, %v3857_v28  ;;  %v3872_v36 = vrot.slane %v3857_v28, %v11078_v4  ;;  %v3864_v2 = vrot.slane %v3850_v44, %v11078_v4 }
 0x2cd   : > { %v3575_v52 = vpop.permute.xlu0 %3574 }
 0x2ce   : > { %v3599_v63 = vpop.permute.xlu1 %3598  ;;  %v3886_v23 = vrot.slane %v3865_v48, %v11078_v4  ;;  %v3879_v43 = vrot.slane %v3864_v2, %v11078_v4  ;;  %v3736_v33 = vsel %vm3731_vm15, %v3730_v58, %v3575_v52 }
 0x2cf   : > { %v3742_v45 = vsel %vm3737_vm14, %v3736_v33, %v3599_v63 }
 0x2d0   : > { %v4023_v41 = vcombine.low %v3872_v36, %v3886_v23  ;;  %v8832_v13 = vcombine.high %v3872_v36, %v3886_v23 }
 0x2d1   : > { %v3665_v38 = vpop.permute.xlu0 %3664 }
 0x2d2   : > { %v3623_v39 = vpop.permute.xlu1 %3622  ;;  %v3753_v31 = vsel %vm3749_vm12, %v3747_v57, %v3665_v38  ;;  %v4039_v21 = vrot.slane %v4023_v41, %v11078_v4  ;;  %v4046_v12 = vrot.slane %v8832_v13, %v11078_v4 }
 0x2d3   : > { %v3748_v49 = vsel %vm3743_vm13, %v3742_v45, %v3623_v39 }
 0x2d4   : > { %v4054_v47 = vcombine.low %v4032_v29, %v4039_v21  ;;  %v4603_v29 = vrot.slane %v11057_v54, %v9864_v22 }
 0x2d5   : > { %v3689_v62 = vpop.permute.xlu0 %3688 }
 0x2d6   : > { %v3759_v35 = vsel %vm3755_vm11, %v3753_v31, %v3689_v62  ;;  %v3713_v55 = vpop.permute.xlu1 %3712  ;;  %v4062_v60 = vrot.slane %v4054_v47, %v11078_v4 }
 0x2d7   : > { %v3765_v37 = vsel %vm3761_vm10, %v3759_v35, %v3713_v55 }
 0x2d8   : > { %v3896_v59 = vrot.slane %v3765_v37, %v11078_v4  ;;  %v3889_v3 = vcombine.high %v3765_v37, %v3765_v37 }
 0x2da   : > { %v3911_v15 = vrot.slane %v3896_v59, %v11078_v4  ;;  %v3904_v27 = vcombine.high %v3896_v59, %v3896_v59  ;;  %v3903_v28 = vrot.slane %v3889_v3, %v11078_v4 }
 0x2dc   : > { %v4025_v32 = vcombine.low %v3879_v43, %v3911_v15  ;;  %v3925_v46 = vrot.slane %v3904_v27, %v11078_v4  ;;  %v3918_v7 = vrot.slane %v3903_v28, %v11078_v4  ;;  %v3926_v34 = vcombine.high %v3911_v15, %v3911_v15 }
 0x2dd   : > { %v4592_v15 = vrot.slane %v11057_v54, %v9859_v20 }
 0x2de   : > { %v4053_v17 = vrot.slane %v4025_v32, %v11078_v4  ;;  %v3927_v53 = vcombine.high %v3925_v46, %v3925_v46  ;;  %v4071_v23 = vcombine.low %v3925_v46, %v3926_v34  ;;  %v4614_v32 = vrot.slane %v11057_v54, %v9869_v24 }
 0x2df   : > { %4594 = vbcast.lane.b32.xlu1 %v4592_v15, 256  ;;  %4730 = vbcast.lane.b32.xlu0 %v4592_v15, 257 }
 0x2e0   : > { %v4055_v25 = vcombine.low %v4046_v12, %v4053_v17  ;;  %v4072_v0 = vcombine.low %v3927_v53, %v3918_v7  ;;  %v4081_v31 = vrot.slane %v4071_v23, %v11078_v4  ;;  %v8845_v12 = vld [vmem:[%s9799_s27 + $0x18] sm:$0xff] }
 0x2e1   : > { %v4531_v47 = vmul.f32 %v11048_v30, %v8845_v12 }
 0x2e2   : > { %v4069_v5 = vrot.slane %v4055_v25, %v11078_v4  ;;  %v4088_v40 = vrot.slane %v4072_v0, %v11078_v4 }
 0x2e3   : > { %4842 = vbcast.lane.b32.xlu1 %v4592_v15, 258  ;;  %4598 = vbcast.lane.b32.xlu0 %v4592_v15, 264  ;;  %v4533_v17 = vadd.f32 %v11054_v26, %v4531_v47 }
 0x2e4   : > { %v4070_v61 = vcombine.low %v4062_v60, %v4069_v5  ;;  %v4103_v55 = vcombine.low %v4081_v31, %v4088_v40 }
 0x2e5   : > { %v3667_v10 = vpop.permute.xlu0 %3666  ;;  %v11190_v27 = vrot.slane %v4533_v17, %v9820_v6  ;;  %v11198_v30 = vrot.slane %v4533_v17, %v9826_v8  ;;  %v11205_v26 = vrot.slane %v4533_v17, %v9833_v11  ;;  %v11211_v8 = vrot.slane %v4533_v17, %v9849_v16  ;;  %v8830_v16 = vld [vmem:[%s12938_s6] ss:$0 sm:$0xff] }
 0x2e6   : > { %9133 = vmatmul.mubr.msk.f32.vlgmr.msra.gmra.mxu1 %vm12951_vm0, %v4070_v61  ;;  %v3754_v9 = vsel %vm3749_vm12, %v3748_v49, %v3667_v10  ;;  %v4111_v59 = vrot.slane %v4103_v55, %v11078_v4  ;;  %v11217_v54 = vrot.slane %v4533_v17, %v9854_v18  ;;  %v11222_v11 = vrot.slane %v4533_v17, %v9859_v20 }
 0x2e7   : > { %v3715_v52 = vpop.permute.xlu1 %3714  ;;  %4734 = vbcast.lane.b32.xlu1 %v4592_v15, 265  ;;  %4605 = vbcast.lane.b32.xlu0 %v4603_v29, 256  ;;  %v11233_v20 = vrot.slane %v4533_v17, %v9864_v22  ;;  %v11243_v28 = vrot.slane %v4533_v17, %v9869_v24 }
 0x2e9   : > { %v3691_v48 = vpop.permute.xlu0 %3690 }
 0x2ea   : > { %v3760_v38 = vsel %vm3755_vm11, %v3754_v9, %v3691_v48 }
 0x2eb   : > { %v3766_v56 = vsel %vm3761_vm10, %v3760_v38, %v3715_v52  ;;  %4846 = vbcast.lane.b32.xlu1 %v4592_v15, 266  ;;  %4738 = vbcast.lane.b32.xlu0 %v4603_v29, 257  ;;  %v11229_v60 = vpop.permute.xlu1 %4690 }
 0x2ec   : > { %v3928_v44 = vcombine.high %v3766_v56, %v3766_v56  ;;  %v3935_v63 = vrot.slane %v3766_v56, %v11078_v4 }
 0x2ed   : > { %v11266_v55 = vpop.permute.xlu0 %4539 }
 0x2ee   : > { %v3943_v51 = vcombine.high %v3935_v63, %v3935_v63  ;;  %v3942_v39 = vrot.slane %v3928_v44, %v11078_v4  ;;  %v3950_v57 = vrot.slane %v3935_v63, %v11078_v4 }
 0x2ef   : > { %4850 = vbcast.lane.b32.xlu1 %v4603_v29, 258  ;;  %4609 = vbcast.lane.b32.xlu0 %v4603_v29, 264  ;;  %v11236_v33 = vpop.permute.xlu1 %4550 }
 0x2f0   : > { %v3964_v36 = vrot.slane %v3943_v51, %v11078_v4  ;;  %v3957_v2 = vrot.slane %v3942_v39, %v11078_v4  ;;  %v365_v39 = vld [vmem:[%s12939_s7] sm:$0xff] }
 0x2f1   : > { %9139 = vmatpush3.msra.mxu1 %v365_v39 }
 0x2f2   : > { %v4073_v62 = vcombine.low %v3950_v57, %v3964_v36  ;;  %v8833_v42 = vcombine.high %v3950_v57, %v3964_v36  ;;  %v4126_v19 = vrot.slane %v3957_v2, %v11078_v4  ;;  %9143 = vmatprep.subr.mxu1 %v9634_v14 }
 0x2f3   : > { %4742 = vbcast.lane.b32.xlu1 %v4603_v29, 265  ;;  %4616 = vbcast.lane.b32.xlu0 %v4614_v32, 256  ;;  %v11239_v46 = vpop.permute.xlu1 %4810 }
 0x2f4   : > { %v4095_v41 = vrot.slane %v4073_v62, %v11078_v4  ;;  %v4102_v35 = vrot.slane %v8833_v42, %v11078_v4  ;;  %v4133_v21 = vrot.slane %v4126_v19, %v11078_v4 }
 0x2f6   : > { %v4104_v37 = vcombine.low %v4095_v41, %v4102_v35 }
 0x2f7   : > { %4854 = vbcast.lane.b32.xlu1 %v4603_v29, 266  ;;  %4746 = vbcast.lane.b32.xlu0 %v4614_v32, 257  ;;  %v11246_v53 = vpop.permute.xlu1 %4543 }
 0x2f8   : > { %v4118_v43 = vrot.slane %v4104_v37, %v11078_v4 }
 0x2fa   : > { %v4119_v13 = vcombine.low %v4111_v59, %v4118_v43 }
 0x2fb   : > { %4858 = vbcast.lane.b32.xlu1 %v4614_v32, 258  ;;  %4620 = vbcast.lane.b32.xlu0 %v4614_v32, 264  ;;  %v11249_v34 = vpop.permute.xlu1 %4706 }
 0x2fc   : > { %9135 = vmatprep.mubr.msk.f32.mxu1 %vm12951_vm0, %v4119_v13 }
 0x2fd   : > { %9136 = vmatmul.mubr.msk.f32.gmra.mxu1 %vm12951_vm0, %v4133_v21  ;;  %vm12963_vm0 = vcmask 1040384  }
 0x2fe   : > { %9140 = vmatprep.mubr.msk.f32.mxu1 %vm9635_vm1, %v9634_v14 }
 0x2ff   : > { %4750 = vbcast.lane.b32.xlu1 %v4614_v32, 265  ;;  %4627 = vbcast.lane.b32.xlu0 %v11190_v27, 256  ;;  %v11252_v52 = vpop.permute.xlu1 %4818 }
 0x303   : > { %4862 = vbcast.lane.b32.xlu1 %v4614_v32, 266  ;;  %4754 = vbcast.lane.b32.xlu0 %v11190_v27, 257  ;;  %v11260_v57 = vpop.permute.xlu1 %4702 }
 0x307   : > { %4866 = vbcast.lane.b32.xlu1 %v11190_v27, 258  ;;  %4631 = vbcast.lane.b32.xlu0 %v11190_v27, 264  ;;  %v11272_v32 = vpop.permute.xlu1 %4565 }
 0x30b   : > { %4758 = vbcast.lane.b32.xlu1 %v11190_v27, 265 }
 0x30f   : > { %4638 = vbcast.lane.b32.xlu1 %v11198_v30, 256 }
 0x313   : > { %4874 = vbcast.lane.b32.xlu1 %v11198_v30, 258 }
 0x317   : > { %4766 = vbcast.lane.b32.xlu1 %v11198_v30, 265 }
 0x31b   : > { %4878 = vbcast.lane.b32.xlu1 %v11198_v30, 266 }
 0x31f   : > { %4882 = vbcast.lane.b32.xlu1 %v11205_v26, 258 }
 0x323   : > { %4774 = vbcast.lane.b32.xlu1 %v11205_v26, 265 }
 0x327   : > { %4886 = vbcast.lane.b32.xlu1 %v11205_v26, 266 }
 0x32b   : > { %4890 = vbcast.lane.b32.xlu1 %v11211_v8, 258 }
 0x32f   : > { %4782 = vbcast.lane.b32.xlu1 %v11211_v8, 265 }
 0x333   : > { %4894 = vbcast.lane.b32.xlu1 %v11211_v8, 266 }
 0x337   : > { %4898 = vbcast.lane.b32.xlu1 %v11217_v54, 258 }
 0x33b   : > { %4790 = vbcast.lane.b32.xlu1 %v11217_v54, 265 }
 0x33f   : > { %4682 = vbcast.lane.b32.xlu1 %v11222_v11, 256 }
 0x343   : > { %4906 = vbcast.lane.b32.xlu1 %v11222_v11, 258 }
 0x347   : > { %4798 = vbcast.lane.b32.xlu1 %v11222_v11, 265 }
 0x34b   : > { %4917 = vbcast.lane.b32.xlu1 %v11233_v20, 256 }
 0x34f   : > { %4933 = vbcast.lane.b32.xlu1 %v11233_v20, 258 }
 0x353   : > { %4929 = vbcast.lane.b32.xlu1 %v11233_v20, 265 }
 0x357   : > { %4944 = vbcast.lane.b32.xlu1 %v11243_v28, 256 }
 0x35b   : > { %4960 = vbcast.lane.b32.xlu1 %v11243_v28, 258 }
 0x35f   : > { %4956 = vbcast.lane.b32.xlu1 %v11243_v28, 265 }
 0x3a6   : > { %v9134_v25 = vpop.f32.mrf.mxu1 }
 0x3a7   : > { %v4219_v1 = vadd.f32 %v9134_v25, %v8830_v16 }
 0x3a8   : > { %v4213_v3 = vpop.f32.mrf.mxu1 }
 0x3a9   : > { %v8840_v18 = vmul.f32 -1.442695, %v4219_v1  ;;  %v4214_v58 = vadd.f32 %v8830_v16, %v4213_v3 }
 0x3ab   : > { %9404 = vpow2.f32 %v8840_v18  ;;  %v8839_v5 = vmul.f32 -1.442695, %v4214_v58 }
 0x3ad   : > { %9406 = vpow2.f32 %v8839_v5 }
 0x3b8   : > { %v9405_v10 = vpop.eup %9404 }
 0x3b9   : > { %v4241_v61 = vadd.f32 1.0, %v9405_v10 }
 0x3ba   : > { %v9407_v45 = vpop.eup %9406 }
 0x3bb   : > { %9408 = vrcp.f32 %v4241_v61  ;;  %v4240_v49 = vadd.f32 1.0, %v9407_v45 }
 0x3bd   : > { %v9137_v22 = vpop.f32.mrf.mxu1  ;;  %9410 = vrcp.f32 %v4240_v49 }
 0x3bf   : > { %v4223_v9 = vpop.f32.mrf.mxu1 }
 0x3c0   : > { %v4224_v48 = vadd.f32 %v8830_v16, %v4223_v9  ;;  %v11274_v16 = vpop.permute.xlu0 %4802 }
 0x3c2   : > { %v8841_v7 = vmul.f32 -1.442695, %v4224_v48 }
 0x3c4   : > { %9412 = vpow2.f32 %v8841_v7  ;;  %v11278_v18 = vpop.permute.xlu0 %4698 }
 0x3c8   : > { %v9409_v24 = vpop.eup %9408  ;;  %v11284_v7 = vpop.permute.xlu0 %4561 }
 0x3c9   : > { %v4250_v38 = vmul.f32 %v9409_v24, %v4219_v1  ;;  %v11276_v1 = vpop.permute.xlu1 %4572 }
 0x3ca   : > { %v9411_v56 = vpop.eup %9410 }
 0x3cb   : > { %v4304_v0 = vcombine.high %v4250_v38, %v4250_v38  ;;  %v4311_v44 = vrot.slane %v4250_v38, %v11078_v4  ;;  %v4249_v63 = vmul.f32 %v9411_v56, %v4214_v58 }
 0x3cd   : > { %v4318_v23 = vrot.slane %v4304_v0, %v11078_v4  ;;  %v4255_v51 = vcombine.high %v4249_v63, %v4249_v63  ;;  %v4262_v40 = vrot.slane %v4249_v63, %v11078_v4  ;;  %v4327_v31 = vrot.slane %v4311_v44, %v11078_v4  ;;  %v11280_v5 = vpop.permute.xlu1 %4714 }
 0x3ce   : > { %v4319_v3 = vcombine.high %v4311_v44, %v4311_v44 }
 0x3cf   : > { %v4320_v36 = vcombine.high %v4318_v23, %v4318_v23  ;;  %v4269_v42 = vrot.slane %v4255_v51, %v11078_v4  ;;  %v4270_v2 = vcombine.high %v4262_v40, %v4262_v40  ;;  %v4349_v59 = vcombine.high %v4327_v31, %v4327_v31 }
 0x3d0   : > { %v4278_v13 = vrot.slane %v4262_v40, %v11078_v4  ;;  %v4341_v10 = vrot.slane %v4319_v3, %v11078_v4  ;;  %v4334_v44 = vrot.slane %v4318_v23, %v11078_v4 }
 0x3d1   : > { %v9413_v62 = vpop.eup %9412  ;;  %v4348_v41 = vrot.slane %v4320_v36, %v11078_v4  ;;  %v4271_v37 = vcombine.high %v4269_v42, %v4269_v42  ;;  %v4285_v19 = vrot.slane %v4269_v42, %v11078_v4  ;;  %v4292_v21 = vrot.slane %v4270_v2, %v11078_v4  ;;  %v11288_v63 = vpop.permute.xlu1 %4826 }
 0x3d2   : > { %v4242_v35 = vadd.f32 1.0, %v9413_v62  ;;  %v4300_v49 = vcombine.high %v4278_v13, %v4278_v13  ;;  %v4350_v24 = vcombine.high %v4341_v10, %v4341_v10 }
 0x3d3   : > { %v4351_v43 = vcombine.high %v4348_v41, %v4348_v41  ;;  %v4299_v15 = vrot.slane %v4271_v37, %v11078_v4  ;;  %v4301_v29 = vcombine.high %v4285_v19, %v4285_v19  ;;  %v4302_v22 = vcombine.high %v4292_v21, %v4292_v21 }
 0x3d4   : > { %9414 = vrcp.f32 %v4242_v35  ;;  %v4695_v35 = vpop.permute.xlu0 %4694 }
 0x3d5   : > { %v4395_v12 = vadd.f32 %v4351_v43, %v4349_v59  ;;  %v4391_v47 = vadd.f32 %v4299_v15, %v4278_v13  ;;  %v4392_v17 = vadd.f32 %v4301_v29, %v4292_v21  ;;  %v4303_v61 = vcombine.high %v4299_v15, %v4299_v15  ;;  %v11295_v43 = vpop.permute.xlu1 %4718 }
 0x3d6   : > { %v4394_v51 = vadd.f32 %v4327_v31, %v4302_v22 }
 0x3d7   : > { %v4399_v25 = vadd.f32 %v4392_v17, %v4391_v47  ;;  %v4393_v38 = vadd.f32 %v4303_v61, %v4300_v49 }
 0x3d8   : > { %v4807_v21 = vpop.permute.xlu0 %4806 }
 0x3d9   : > { %v4400_v36 = vadd.f32 %v4394_v51, %v4393_v38  ;;  %v11291_v37 = vmul.f32 0.25, %v4399_v25  ;;  %v11300_v47 = vpop.permute.xlu1 %4830 }
 0x3db   : > { %v4404_v23 = vmul.f32 0.25, %v4400_v36 }
 0x3dd   : > { %v11304_v17 = vpop.permute.xlu1 %4834 }
 0x3e1   : > { %v9415_v58 = vpop.eup %9414  ;;  %v11310_v3 = vpop.permute.xlu1 %4726 }
 0x3e2   : > { %v4251_v45 = vmul.f32 %v9415_v58, %v4224_v48 }
 0x3e4   : > { %v4358_v9 = vrot.slane %v4251_v45, %v11078_v4 }
 0x3e5   : > { %v11315_v10 = vpop.permute.xlu1 %4594 }
 0x3e6   : > { %v4359_v56 = vcombine.high %v4358_v9, %v4358_v9  ;;  %v4366_v0 = vrot.slane %v4358_v9, %v11078_v4 }
 0x3e8   : > { %v4373_v39 = vrot.slane %v4359_v56, %v11078_v4  ;;  %v4374_v40 = vcombine.high %v4366_v0, %v4366_v0  ;;  %v4396_v48 = vadd.f32 %v4366_v0, %v4350_v24 }
 0x3e9   : > { %v11320_v45 = vpop.permute.xlu1 %4842 }
 0x3ea   : > { %v4397_v62 = vadd.f32 %v4373_v39, %v4334_v44  ;;  %v4398_v42 = vadd.f32 %v4374_v40, %v4348_v41  ;;  %v4401_v2 = vadd.f32 %v4396_v48, %v4395_v12  ;;  %v4555_v12 = vpop.permute.xlu0 %4554  ;;  %v4966_v39 = vsel %vm817_vm2, %v11266_v55, %v11229_v60 }
 0x3eb   : > { %v4994_v48 = vsel %vm846_vm3, %v4966_v39, %v11274_v16  ;;  %v4967_v55 = vsel %vm817_vm2, %v11246_v53, %v4695_v35  ;;  %v4968_v16 = vsel %vm817_vm2, %v11236_v33, %v11278_v18  ;;  %v4970_v53 = vsel %vm817_vm2, %v11284_v7, %v11249_v34 }
 0x3ec   : > { %v4402_v19 = vadd.f32 %v4398_v42, %v4397_v62  ;;  %v11293_v59 = vmul.f32 0.25, %v4401_v2  ;;  %v4995_v2 = vsel %vm846_vm3, %v4967_v55, %v4807_v21 }
 0x3ed   : > { %v11326_v49 = vpop.permute.xlu1 %4734 }
 0x3ee   : > { %v4406_v13 = vmul.f32 0.25, %v4402_v19  ;;  %v4409_v31 = vcombine.low %v11291_v37, %v11293_v59  ;;  %v11307_v25 = vpop.permute.xlu0 %4814  ;;  %v4996_v19 = vsel %vm846_vm3, %v4968_v16, %v11239_v46 }
 0x3f0   : > { %v4427_v15 = vcombine.low %v4404_v23, %v4406_v13  ;;  %v5024_v23 = vsel %vm875_vm4, %v4996_v19, %v11284_v7  ;;  %v4998_v13 = vsel %vm846_vm3, %v4970_v53, %v11252_v52 }
 0x3f2   : > { %v4434_v29 = vrot.slane %v4427_v15, %v11078_v4  ;;  %v11312_v58 = vpop.permute.xlu0 %4710 }
 0x3f4   : > { %v4441_v41 = vrot.slane %v4434_v29, %v11078_v4 }
 0x3f6   : > { %4442 = vrot.lane.b32.xlu0 %v4441_v41, %s9637_s25  ;;  %v11318_v61 = vpop.permute.xlu0 %4822 }
 0x3fa   : > { %4870 = vbcast.lane.b32.xlu0 %v11190_v27, 266  ;;  %v11323_v27 = vpop.permute.xlu0 %4576 }
 0x3fe   : > { %4762 = vbcast.lane.b32.xlu0 %v11198_v30, 257  ;;  %v11329_v22 = vpop.permute.xlu0 %4583 }
 0x402   : > { %4642 = vbcast.lane.b32.xlu0 %v11198_v30, 264  ;;  %v11331_v30 = vpop.permute.xlu1 %4846  ;;  %v11334_v9 = vpop.permute.xlu0 %4722 }
 0x406   : > { %4649 = vbcast.lane.b32.xlu0 %v11205_v26, 256  ;;  %v11337_v24 = vpop.permute.xlu1 %4850  ;;  %v11340_v38 = vpop.permute.xlu0 %4587 }
 0x40a   : > { %4770 = vbcast.lane.b32.xlu0 %v11205_v26, 257  ;;  %v11345_v56 = vpop.permute.xlu0 %4838 }
 0x40e   : > { %4653 = vbcast.lane.b32.xlu0 %v11205_v26, 264  ;;  %v11342_v26 = vpop.permute.xlu1 %4742  ;;  %v11350_v44 = vpop.permute.xlu0 %4730 }
 0x412   : > { %4660 = vbcast.lane.b32.xlu0 %v11211_v8, 256  ;;  %v11348_v0 = vpop.permute.xlu1 %4854  ;;  %v11356_v51 = vpop.permute.xlu0 %4598 }
 0x413   : > { %v4977_v37 = vsel %vm817_vm2, %v11356_v51, %v11326_v49 }
 0x416   : > { %4778 = vbcast.lane.b32.xlu0 %v11211_v8, 257  ;;  %v11366_v36 = vpop.permute.xlu0 %4605 }
 0x41a   : > { %4664 = vbcast.lane.b32.xlu0 %v11211_v8, 264  ;;  %v11353_v8 = vpop.permute.xlu1 %4858  ;;  %v11381_v42 = vpop.permute.xlu0 %4738 }
 0x41e   : > { %4671 = vbcast.lane.b32.xlu0 %v11217_v54, 256  ;;  %v11362_v40 = vpop.permute.xlu1 %4750  ;;  %v11403_v21 = vpop.permute.xlu0 %4609 }
 0x422   : > { %4786 = vbcast.lane.b32.xlu0 %v11217_v54, 257  ;;  %v11371_v62 = vpop.permute.xlu1 %4862 }
 0x426   : > { %4675 = vbcast.lane.b32.xlu0 %v11217_v54, 264  ;;  %v11392_v35 = vpop.permute.xlu1 %4866 }
 0x42a   : > { %4902 = vbcast.lane.b32.xlu0 %v11217_v54, 266  ;;  %v5022_v54 = vsel %vm875_vm4, %v4994_v48, %v11236_v33  ;;  %v11406_v15 = vpop.permute.xlu1 %4758 }
 0x42b   : > { %v5050_v60 = vsel %vm904_vm5, %v5022_v54, %v11278_v18  ;;  %v5023_v18 = vsel %vm875_vm4, %v4995_v2, %v4555_v12 }
 0x42c   : > { %v5051_v41 = vsel %vm904_vm5, %v5023_v18, %v11260_v57 }
 0x42d   : > { %v5079_v48 = vsel %vm933_vm6, %v5051_v41, %v11307_v25 }
 0x42e   : > { %4794 = vbcast.lane.b32.xlu0 %v11222_v11, 257  ;;  %v11431_v55 = vpop.permute.xlu1 %4638  ;;  %v5107_v2 = vsel %vm962_vm7, %v5079_v48, %v11272_v32 }
 0x432   : > { %4686 = vbcast.lane.b32.xlu0 %v11222_v11, 264  ;;  %v11448_v18 = vpop.permute.xlu1 %4874 }
 0x436   : > { %4910 = vbcast.lane.b32.xlu0 %v11222_v11, 266  ;;  %v5078_v11 = vsel %vm933_vm6, %v5050_v60, %v11239_v46  ;;  %v4969_v46 = vsel %vm817_vm2, %v4555_v12, %v11260_v57  ;;  %v5026_v12 = vsel %vm875_vm4, %v4998_v13, %v11276_v1  ;;  %v11429_v60 = vpop.permute.xlu0 %4616 }
 0x437   : > { %v5106_v33 = vsel %vm962_vm7, %v5078_v11, %v11284_v7  ;;  %v5052_v7 = vsel %vm904_vm5, %v5024_v23, %v11249_v34  ;;  %v4997_v39 = vsel %vm846_vm3, %v4969_v46, %v11307_v25  ;;  %v5054_v54 = vsel %vm904_vm5, %v5026_v12, %v11280_v5 }
 0x438   : > { %v5134_v29 = vsel %vm991_vm8, %v5106_v33, %v11249_v34  ;;  %v5080_v57 = vsel %vm933_vm6, %v5052_v7, %v11252_v52  ;;  %v5025_v34 = vsel %vm875_vm4, %v4997_v39, %v11272_v32  ;;  %v4971_v25 = vsel %vm817_vm2, %v11272_v32, %v11312_v58 }
 0x439   : > { %v5053_v19 = vsel %vm904_vm5, %v5025_v34, %v11312_v58  ;;  %v5082_v53 = vsel %vm933_vm6, %v5054_v54, %v11288_v63  ;;  %v5135_v33 = vsel %vm991_vm8, %v5107_v2, %v11312_v58  ;;  %v4999_v13 = vsel %vm846_vm3, %v4971_v25, %v11318_v61  ;;  %v11481_v54 = vpop.permute.xlu1 %4766 }
 0x43a   : > { %4925 = vbcast.lane.b32.xlu0 %v11233_v20, 257  ;;  %v5081_v32 = vsel %vm933_vm6, %v5053_v19, %v11318_v61  ;;  %v5110_v46 = vsel %vm962_vm7, %v5082_v53, %v11329_v22  ;;  %v4972_v7 = vsel %vm817_vm2, %v11276_v1, %v11280_v5  ;;  %v5163_v39 = vsel %vm1020_vm9, %v5135_v33, %v11318_v61 }
 0x43b   : > { %v5109_v48 = vsel %vm962_vm7, %v5081_v32, %v11323_v27  ;;  %v5242_v61 = vrot.slane %v5163_v39, %v9900_v50  ;;  %v5000_v34 = vsel %vm846_vm3, %v4972_v7, %v11288_v63  ;;  %v4974_v53 = vsel %vm817_vm2, %v11329_v22, %v11334_v9 }
 0x43c   : > { %v5028_v33 = vsel %vm875_vm4, %v5000_v34, %v11329_v22  ;;  %v5002_v7 = vsel %vm846_vm3, %v4974_v53, %v11304_v17 }
 0x43e   : > { %4921 = vbcast.lane.b32.xlu0 %v11233_v20, 264 }
 0x442   : > { %4937 = vbcast.lane.b32.xlu0 %v11233_v20, 266  ;;  %v5162_v20 = vsel %vm1020_vm9, %v5134_v29, %v11252_v52  ;;  %v5108_v52 = vsel %vm962_vm7, %v5080_v57, %v11276_v1  ;;  %v11458_v29 = vpop.permute.xlu0 %4746  ;;  %v4973_v57 = vsel %vm817_vm2, %v11323_v27, %v11295_v43 }
 0x443   : > { %v5218_v16 = vcombine.high %v5162_v20, %v5162_v20  ;;  %v5225_v11 = vrot.slane %v5162_v20, %v9900_v50  ;;  %v5136_v23 = vsel %vm991_vm8, %v5108_v52, %v11280_v5  ;;  %v5027_v20 = vsel %vm875_vm4, %v4999_v13, %v11323_v27 }
 0x444   : > { %v5164_v12 = vsel %vm1020_vm9, %v5136_v23, %v11288_v63  ;;  %v5055_v2 = vsel %vm904_vm5, %v5027_v20, %v11295_v43  ;;  %v5137_v52 = vsel %vm991_vm8, %v5109_v48, %v11295_v43  ;;  %v5001_v63 = vsel %vm846_vm3, %v4973_v57, %v11300_v47  ;;  %v11512_v48 = vpop.permute.xlu1 %4878 }
 0x445   : > { %v5232_v58 = vrot.slane %v5218_v16, %v9900_v50  ;;  %v5233_v41 = vcombine.high %v5225_v11, %v5225_v11  ;;  %v5251_v16 = vcombine.high %v5164_v12, %v5164_v12  ;;  %v5258_v19 = vrot.slane %v5164_v12, %v9900_v50 }
 0x446   : > { %4952 = vbcast.lane.b32.xlu0 %v11243_v28, 257  ;;  %v11489_v27 = vpop.permute.xlu0 %4620  ;;  %v5083_v43 = vsel %vm933_vm6, %v5055_v2, %v11300_v47  ;;  %v5165_v13 = vsel %vm1020_vm9, %v5137_v52, %v11300_v47  ;;  %v5056_v20 = vsel %vm904_vm5, %v5028_v33, %v11334_v9  ;;  %v5030_v2 = vsel %vm875_vm4, %v5002_v7, %v11315_v10 }
 0x447   : > { %v5234_v1 = vcombine.high %v5232_v58, %v5232_v58  ;;  %v5680_v5 = vcombine.low %v5225_v11, %v5233_v41  ;;  %v5235_v11 = vcombine.high %v5163_v39, %v5163_v39  ;;  %v5265_v41 = vrot.slane %v5251_v16, %v9900_v50 }
 0x448   : > { %v5029_v39 = vsel %vm875_vm4, %v5001_v63, %v11340_v38  ;;  %v5268_v47 = vcombine.high %v5165_v13, %v5165_v13  ;;  %v5111_v57 = vsel %vm962_vm7, %v5083_v43, %v11340_v38  ;;  %v5084_v53 = vsel %vm933_vm6, %v5056_v20, %v11304_v17 }
 0x449   : > { %v5681_v23 = vcombine.low %v5232_v58, %v5234_v1  ;;  %v5688_v12 = vrot.slane %v5680_v5, %v9900_v50  ;;  %v5249_v22 = vrot.slane %v5235_v11, %v9900_v50  ;;  %v5266_v58 = vcombine.high %v5258_v19, %v5258_v19 }
 0x44a   : > { %4948 = vbcast.lane.b32.xlu0 %v11243_v28, 264  ;;  %v4975_v1 = vsel %vm817_vm2, %v11340_v38, %v11310_v3  ;;  %v11520_v34 = vpop.permute.xlu0 %4627  ;;  %v5267_v63 = vcombine.high %v5265_v41, %v5265_v41 }
 0x44b   : > { %v5695_v52 = vrot.slane %v5681_v23, %v9900_v50  ;;  %v5698_v38 = vcombine.low %v5249_v22, %v5258_v19  ;;  %v11531_v33 = vcombine.low %v5266_v58, %v5265_v41  ;;  %v5003_v43 = vsel %vm846_vm3, %v4975_v1, %v11345_v56  ;;  %v11547_v41 = vpop.permute.xlu1 %4882 }
 0x44c   : > { %v5112_v19 = vsel %vm962_vm7, %v5084_v53, %v11315_v10  ;;  %v5031_v22 = vsel %vm875_vm4, %v5003_v43, %v11356_v51 }
 0x44d   : > { %v11555_v20 = vcombine.low %v5688_v12, %v5695_v52 }
 0x44e   : > { %4964 = vbcast.lane.b32.xlu0 %v11243_v28, 266  ;;  %v5138_v28 = vsel %vm991_vm8, %v5110_v46, %v11334_v9  ;;  %v5250_v46 = vcombine.high %v5242_v61, %v5242_v61  ;;  %v5057_v9 = vsel %vm904_vm5, %v5029_v39, %v11310_v3  ;;  %v11553_v58 = vpop.permute.xlu0 %4754 }
 0x44f   : > { %v5166_v25 = vsel %vm1020_vm9, %v5138_v28, %v11304_v17  ;;  %v5275_v28 = vrot.slane %v5165_v13, %v9900_v50  ;;  %v5282_v13 = vrot.slane %v5268_v47, %v9900_v50  ;;  %v5085_v23 = vsel %vm933_vm6, %v5057_v9, %v11345_v56  ;;  %v11594_v43 = vpop.permute.xlu1 %4774 }
 0x450   : > { %v5284_v32 = vcombine.high %v5166_v25, %v5166_v25  ;;  %v5291_v5 = vrot.slane %v5166_v25, %v9900_v50  ;;  %v5697_v11 = vcombine.low %v5242_v61, %v5250_v46  ;;  %v5139_v25 = vsel %vm991_vm8, %v5111_v57, %v11310_v3 }
 0x451   : > { %v5058_v61 = vsel %vm904_vm5, %v5030_v2, %v11350_v44  ;;  %v4976_v3 = vsel %vm817_vm2, %v11315_v10, %v11350_v44  ;;  %v5715_v7 = vcombine.low %v5267_v63, %v5275_v28  ;;  %v5167_v39 = vsel %vm1020_vm9, %v5139_v25, %v11345_v56 }
 0x452   : > { %v5298_v16 = vrot.slane %v5284_v32, %v9900_v50  ;;  %v5283_v32 = vcombine.high %v5275_v28, %v5275_v28  ;;  %v5299_v46 = vcombine.high %v5291_v5, %v5291_v5  ;;  %v5086_v47 = vsel %vm933_vm6, %v5058_v61, %v11320_v45 }
 0x453   : > { %v5113_v57 = vsel %vm962_vm7, %v5085_v23, %v11356_v51  ;;  %v5705_v10 = vrot.slane %v5697_v11, %v9900_v50  ;;  %v5712_v28 = vrot.slane %v5698_v38, %v9900_v50  ;;  %v5301_v9 = vcombine.high %v5167_v39, %v5167_v39 }
 0x454   : > { %v5300_v17 = vcombine.high %v5298_v16, %v5298_v16  ;;  %v5731_v1 = vcombine.low %v5283_v32, %v5282_v13  ;;  %v5140_v56 = vsel %vm991_vm8, %v5112_v19, %v11350_v44  ;;  %v5004_v2 = vsel %vm846_vm3, %v4976_v3, %v11320_v45 }
 0x455   : > { %v5732_v12 = vcombine.low %v5291_v5, %v5299_v46  ;;  %v5059_v63 = vsel %vm904_vm5, %v5031_v22, %v11326_v49  ;;  %v4416_v11 = vrot.slane %v4409_v31, %v11078_v4  ;;  %v5308_v53 = vrot.slane %v5167_v39, %v9900_v50 }
 0x456   : > { %v11567_v52 = vcombine.low %v5298_v16, %v5300_v17  ;;  %v5141_v38 = vsel %vm991_vm8, %v5113_v57, %v11326_v49  ;;  %v5114_v44 = vsel %vm962_vm7, %v5086_v47, %v11366_v36  ;;  %v4978_v5 = vsel %vm817_vm2, %v11366_v36, %v11381_v42  ;;  %v11583_v16 = vpop.permute.xlu0 %4631 }
 0x457   : > { %v5168_v25 = vsel %vm1020_vm9, %v5140_v56, %v11320_v45  ;;  %v5032_v59 = vsel %vm875_vm4, %v5004_v2, %v11366_v36  ;;  %v11592_v31 = vcombine.low %v5705_v10, %v5712_v28  ;;  %v11597_v13 = vrot.slane %v5301_v9, %v9900_v50  ;;  %v9531_v56 = vld [vmem:[%s12935_s3 + $0x8] sm:$0x1]  ;;  %v11637_v2 = vpop.permute.xlu1 %4886 }
 0x458   : > { %v5087_v32 = vsel %vm933_vm6, %v5059_v63, %v11331_v30  ;;  %v5722_v45 = vrot.slane %v11531_v33, %v9900_v50  ;;  %v5729_v23 = vrot.slane %v5715_v7, %v9900_v50  ;;  %v5169_v49 = vsel %vm1020_vm9, %v5141_v38, %v11331_v30 }
 0x459   : > { %v5142_v51 = vsel %vm991_vm8, %v5114_v44, %v11381_v42  ;;  %v5006_v36 = vsel %vm846_vm3, %v4978_v5, %v11337_v24  ;;  %v4423_v61 = vrot.slane %v4416_v11, %v11078_v4  ;;  %v5316_v46 = vcombine.high %v5308_v53, %v5308_v53 }
 0x45a   : > { %v5317_v17 = vcombine.high %v5168_v25, %v5168_v25  ;;  %v5005_v19 = vsel %vm846_vm3, %v4977_v37, %v11331_v30  ;;  %v5060_v33 = vsel %vm904_vm5, %v5032_v59, %v11381_v42  ;;  %v5115_v7 = vsel %vm962_vm7, %v5087_v32, %v11403_v21 }
 0x45b   : > { %v5739_v22 = vrot.slane %v5731_v1, %v9900_v50  ;;  %v5746_v47 = vrot.slane %v5732_v12, %v9900_v50  ;;  %v5324_v57 = vrot.slane %v5168_v25, %v9900_v50  ;;  %v5334_v10 = vcombine.high %v5169_v49, %v5169_v49 }
 0x45c   : > { %v5170_v28 = vsel %vm1020_vm9, %v5142_v51, %v11337_v24  ;;  %v5034_v30 = vsel %vm875_vm4, %v5006_v36, %v11429_v60  ;;  %v5341_v42 = vrot.slane %v5169_v49, %v9900_v50  ;;  %v5033_v9 = vsel %vm875_vm4, %v5005_v19, %v11403_v21 }
 0x45d   : > { %v5088_v1 = vsel %vm933_vm6, %v5060_v33, %v11337_v24  ;;  %v11639_v12 = vcombine.low %v5308_v53, %v5316_v46  ;;  %v5331_v63 = vrot.slane %v5317_v17, %v9900_v50  ;;  %v5143_v11 = vsel %vm991_vm8, %v5115_v7, %v11342_v26  ;;  %v9532_v53 = vld [vmem:[%s12935_s3] sm:$0xff]  ;;  %v11685_v7 = vpop.permute.xlu1 %4890 }
 0x45e   : > { %v5730_v38 = vcombine.low %v5722_v45, %v5729_v23  ;;  %v5350_v44 = vcombine.high %v5170_v28, %v5170_v28  ;;  %v4979_v5 = vsel %vm817_vm2, %v11403_v21, %v11342_v26  ;;  %v5062_v25 = vsel %vm904_vm5, %v5034_v30, %v11458_v29 }
 0x45f   : > { %v11655_v37 = vcombine.low %v5739_v22, %v5746_v47  ;;  %v5332_v59 = vcombine.high %v5324_v57, %v5324_v57  ;;  %v5333_v32 = vcombine.high %v5331_v63, %v5331_v63  ;;  %v5061_v45 = vsel %vm904_vm5, %v5033_v9, %v11342_v26 }
 0x460   : > { %v5116_v23 = vsel %vm962_vm7, %v5088_v1, %v11429_v60  ;;  %v5348_v21 = vrot.slane %v5334_v10, %v9900_v50  ;;  %v5349_v49 = vcombine.high %v5341_v42, %v5341_v42  ;;  %v5357_v51 = vrot.slane %v5170_v28, %v9900_v50 }
 0x461   : > { %v5171_v36 = vsel %vm1020_vm9, %v5143_v11, %v11348_v0  ;;  %v5007_v26 = vsel %vm846_vm3, %v4979_v5, %v11348_v0  ;;  %v5090_v46 = vsel %vm933_vm6, %v5062_v25, %v11353_v8  ;;  %v5756_v17 = vrot.slane %v11567_v52, %v9900_v50 }
 0x462   : > { %v5364_v19 = vrot.slane %v5350_v44, %v9900_v50  ;;  %v5089_v33 = vsel %vm933_vm6, %v5061_v45, %v11348_v0  ;;  %v5782_v22 = vcombine.low %v5333_v32, %v5341_v42  ;;  %v5374_v47 = vrot.slane %v5171_v36, %v9900_v50 }
 0x463   : > { %v4980_v52 = vsel %vm817_vm2, %v11429_v60, %v11458_v29  ;;  %v5783_v0 = vcombine.low %v5349_v49, %v5348_v21  ;;  %v5035_v10 = vsel %vm875_vm4, %v5007_v26, %v11489_v27  ;;  %v5118_v28 = vsel %vm962_vm7, %v5090_v46, %v11520_v34 }
 0x464   : > { %v5367_v30 = vcombine.high %v5171_v36, %v5171_v36  ;;  %v5117_v60 = vsel %vm962_vm7, %v5089_v33, %v11489_v27  ;;  %v5366_v9 = vcombine.high %v5364_v19, %v5364_v19  ;;  %v5008_v1 = vsel %vm846_vm3, %v4980_v52, %v11353_v8 }
 0x465   : > { %v5063_v11 = vsel %vm904_vm5, %v5035_v10, %v11362_v40  ;;  %v5146_v44 = vsel %vm991_vm8, %v5118_v28, %v11553_v58 }
 0x466   : > { %v5381_v32 = vrot.slane %v5367_v30, %v9900_v50  ;;  %v5800_v21 = vcombine.low %v5364_v19, %v5366_v9  ;;  %v5174_v36 = vsel %vm1020_vm9, %v5146_v44, %v11392_v35 }
 0x468   : > { %v4443_v3 = vpop.permute.xlu0 %4442  ;;  %v5814_v28 = vrot.slane %v5800_v21, %v9900_v50 }
 0x469   : > { %v4445_v39 = vsel %vm904_vm5, %v4423_v61, %v4443_v3  ;;  %v5765_v61 = vcombine.low %v11597_v13, %v5324_v57  ;;  %v5144_v3 = vsel %vm991_vm8, %v5116_v23, %v11458_v29  ;;  %v5763_v13 = vrot.slane %v11639_v12, %v9900_v50 }
 0x46a   : > { %9141 = vmatmul.mubr.msk.f32.vlgmr.msra.gmra.mxu1 %vm1020_vm9, %v4445_v39  ;;  %v5766_v39 = vcombine.low %v5332_v59, %v5331_v63  ;;  %v5365_v57 = vcombine.high %v5357_v51, %v5357_v51  ;;  %v5172_v42 = vsel %vm1020_vm9, %v5144_v3, %v11353_v8  ;;  %v4981_v12 = vsel %vm817_vm2, %v11489_v27, %v11362_v40 }
 0x46b   : > { %9144 = vmatpush3.msk.msra.mxu1 %vm12963_vm0, %v9531_v56  ;;  %9147 = vmatprep.mubr.msk.f32.mxu1 %vm9635_vm1, %v9634_v14  ;;  %vm12964_vm0 = vcmask 72704   ;;  %v5383_v56 = vcombine.high %v5172_v42, %v5172_v42  ;;  %v5382_v63 = vcombine.high %v5374_v47, %v5374_v47  ;;  %v5145_v8 = vsel %vm991_vm8, %v5117_v60, %v11362_v40 }
 0x46c   : > { %9145 = vmatprep.subr.mxu1 %v9634_v14  ;;  %v11645_v24 = vpop.permute.xlu0 %4870  ;;  %v5780_v5 = vrot.slane %v5766_v39, %v9900_v50  ;;  %v5799_v25 = vcombine.low %v5357_v51, %v5365_v57  ;;  %v5790_v27 = vrot.slane %v5782_v22, %v9900_v50  ;;  %v5797_v59 = vrot.slane %v5783_v0, %v9900_v50 }
 0x46d   : > { %9146 = vmatpush3.msra.mxu1 %v9532_v53  ;;  %v11721_v53 = vpop.permute.xlu1 %4782  ;;  %v5390_v45 = vrot.slane %v5172_v42, %v9900_v50  ;;  %v5009_v23 = vsel %vm846_vm3, %v4981_v12, %v11371_v62  ;;  %v5397_v49 = vrot.slane %v5383_v56, %v9900_v50  ;;  %v5091_v51 = vsel %vm933_vm6, %v5063_v11, %v11371_v62 }
 0x46e   : > { %9148 = vmatmul.mubr.msk.f32.vlgmr.msra.gmra.mxu1 %vm12964_vm0, %v11555_v20  ;;  %v5173_v26 = vsel %vm1020_vm9, %v5145_v8, %v11371_v62  ;;  %v5764_v46 = vcombine.low %v5756_v17, %v5763_v13  ;;  %v5037_v3 = vsel %vm875_vm4, %v5009_v23, %v11583_v16  ;;  %v5798_v39 = vcombine.low %v5790_v27, %v5797_v59 }
 0x46f   : > { %9150 = vmatprep.mubr.msk.f32.mxu1 %vm9635_vm1, %v9634_v14  ;;  %v5807_v22 = vrot.slane %v5799_v25, %v9900_v50  ;;  %v4982_v62 = vsel %vm817_vm2, %v11520_v34, %v11553_v58  ;;  %v5119_v17 = vsel %vm962_vm7, %v5091_v51, %v11583_v16  ;;  %v5399_v52 = vcombine.high %v5397_v49, %v5397_v49 }
 0x470   : > { %v11674_v20 = vpop.permute.xlu0 %4762  ;;  %v5407_v0 = vrot.slane %v5173_v26, %v9900_v50  ;;  %v5416_v57 = vcombine.high %v5174_v36, %v5174_v36  ;;  %v5400_v42 = vcombine.high %v5173_v26, %v5173_v26  ;;  %v5398_v60 = vcombine.high %v5390_v45, %v5390_v45 }
 0x471   : > { %v11758_v10 = vpop.permute.xlu1 %4894  ;;  %v5147_v9 = vsel %vm991_vm8, %v5119_v17, %v11406_v15  ;;  %v5815_v8 = vcombine.low %v5807_v22, %v5814_v28  ;;  %v4984_v23 = vsel %vm817_vm2, %v11431_v55, %v11674_v20 }
 0x472   : > { %9151 = vmatmul.mubr.msk.f32.gmra.mxu1 %vm12964_vm0, %v11592_v31  ;;  %v5773_v31 = vrot.slane %v5765_v61, %v9900_v50  ;;  %v5816_v61 = vcombine.low %v5374_v47, %v5382_v63  ;;  %v5817_v47 = vcombine.low %v5381_v32, %v5390_v45  ;;  %v5175_v63 = vsel %vm1020_vm9, %v5147_v9, %v11645_v24 }
 0x473   : > { %9153 = vmatprep.mubr.msk.f32.mxu1 %vm9635_vm1, %v9634_v14  ;;  %v5414_v27 = vrot.slane %v5400_v42, %v9900_v50  ;;  %v5415_v59 = vcombine.high %v5407_v0, %v5407_v0 }
 0x474   : > { %v11703_v29 = vpop.permute.xlu0 %4642  ;;  %v5781_v33 = vcombine.low %v5773_v31, %v5780_v5  ;;  %v5824_v30 = vrot.slane %v5816_v61, %v9900_v50  ;;  %v5010_v31 = vsel %vm846_vm3, %v4982_v62, %v11392_v35  ;;  %v5831_v56 = vrot.slane %v5817_v47, %v9900_v50 }
 0x475   : > { %v5430_v5 = vrot.slane %v5416_v57, %v9900_v50  ;;  %v5038_v32 = vsel %vm875_vm4, %v5010_v31, %v11431_v55  ;;  %v5833_v61 = vcombine.low %v5398_v60, %v5397_v49  ;;  %v5850_v62 = vcombine.low %v5415_v59, %v5414_v27 }
 0x476   : > { %9154 = vmatmul.mubr.msk.f32.gmra.mxu1 %vm12964_vm0, %v5730_v38  ;;  %v5036_v38 = vsel %vm875_vm4, %v5008_v1, %v11520_v34  ;;  %v5066_v21 = vsel %vm904_vm5, %v5038_v32, %v11674_v20 }
 0x477   : > { %9156 = vmatprep.mubr.msk.f32.mxu1 %vm9635_vm1, %v9634_v14  ;;  %v5064_v19 = vsel %vm904_vm5, %v5036_v38, %v11553_v58  ;;  %v5065_v58 = vsel %vm904_vm5, %v5037_v3, %v11406_v15  ;;  %v5440_v38 = vrot.slane %v5175_v63, %v9900_v50 }
 0x478   : > { %v11731_v40 = vpop.permute.xlu0 %4649  ;;  %v5092_v34 = vsel %vm933_vm6, %v5064_v19, %v11392_v35  ;;  %v5093_v1 = vsel %vm933_vm6, %v5065_v58, %v11645_v24  ;;  %v11782_v35 = vcombine.low %v5399_v52, %v5407_v0  ;;  %v5432_v19 = vcombine.high %v5430_v5, %v5430_v5 }
 0x479   : > { %v5121_v11 = vsel %vm962_vm7, %v5093_v1, %v11703_v29  ;;  %v5120_v25 = vsel %vm962_vm7, %v5092_v34, %v11431_v55  ;;  %v5832_v55 = vcombine.low %v5824_v30, %v5831_v56  ;;  %v5841_v1 = vrot.slane %v5833_v61, %v9900_v50 }
 0x47a   : > { %9157 = vmatmul.mubr.msk.f32.gmra.mxu1 %vm12964_vm0, %v11655_v37  ;;  %v5423_v37 = vrot.slane %v5174_v36, %v9900_v50  ;;  %v5148_v45 = vsel %vm991_vm8, %v5120_v25, %v11674_v20  ;;  %v5149_v51 = vsel %vm991_vm8, %v5121_v11, %v11481_v54  ;;  %v11803_v36 = vpop.permute.xlu1 %4898  ;;  %v5848_v20 = vrot.slane %v11782_v35, %v9900_v50 }
 0x47b   : > { %9159 = vmatprep.mubr.msk.f32.mxu1 %vm9635_vm1, %v9634_v14  ;;  %v5176_v22 = vsel %vm1020_vm9, %v5148_v45, %v11448_v18  ;;  %v5177_v47 = vsel %vm1020_vm9, %v5149_v51, %v11512_v48  ;;  %v5867_v60 = vcombine.low %v5430_v5, %v5432_v19 }
 0x47c   : > { %v11755_v13 = vpop.permute.xlu0 %4770  ;;  %v5431_v12 = vcombine.high %v5423_v37, %v5423_v37  ;;  %v5449_v0 = vcombine.high %v5176_v22, %v5176_v22  ;;  %v5456_v57 = vrot.slane %v5176_v22, %v9900_v50  ;;  %v5466_v42 = vcombine.high %v5177_v47, %v5177_v47 }
 0x47d   : > { %v5473_v31 = vrot.slane %v5177_v47, %v9900_v50  ;;  %v5849_v51 = vcombine.low %v5841_v1, %v5848_v20 }
 0x47e   : > { %9160 = vmatmul.mubr.msk.f32.gmra.mxu1 %vm12964_vm0, %v5764_v46  ;;  %v5851_v26 = vcombine.low %v5423_v37, %v5431_v12  ;;  %v4983_v46 = vsel %vm817_vm2, %v11583_v16, %v11406_v15  ;;  %v5012_v15 = vsel %vm846_vm3, %v4984_v23, %v11448_v18  ;;  %v5094_v16 = vsel %vm933_vm6, %v5066_v21, %v11448_v18  ;;  %v11840_v58 = vpop.permute.xlu1 %4790 }
 0x47f   : > { %9162 = vmatprep.mubr.msk.f32.mxu1 %vm9635_vm1, %v9634_v14  ;;  %v5011_v3 = vsel %vm846_vm3, %v4983_v46, %v11645_v24  ;;  %v5433_v37 = vcombine.high %v5175_v63, %v5175_v63  ;;  %v5448_v24 = vcombine.high %v5440_v38, %v5440_v38  ;;  %v5122_v17 = vsel %vm962_vm7, %v5094_v16, %v11731_v40 }
 0x480   : > { %v11780_v44 = vpop.permute.xlu0 %4653  ;;  %v5039_v49 = vsel %vm875_vm4, %v5011_v3, %v11703_v29  ;;  %v5865_v52 = vrot.slane %v5851_v26, %v9900_v50  ;;  %v5150_v28 = vsel %vm991_vm8, %v5122_v17, %v11755_v13  ;;  %v5040_v34 = vsel %vm875_vm4, %v5012_v15, %v11731_v40 }
 0x481   : > { %v5067_v30 = vsel %vm904_vm5, %v5039_v49, %v11481_v54  ;;  %v5068_v9 = vsel %vm904_vm5, %v5040_v34, %v11755_v13  ;;  %v5868_v56 = vcombine.low %v5440_v38, %v5448_v24  ;;  %v5858_v12 = vrot.slane %v5850_v62, %v9900_v50 }
 0x482   : > { %9163 = vmatmul.mubr.msk.f32.gmra.mxu1 %vm12964_vm0, %v5781_v33  ;;  %v5463_v63 = vrot.slane %v5449_v0, %v9900_v50  ;;  %v5464_v11 = vcombine.high %v5456_v57, %v5456_v57  ;;  %v5095_v5 = vsel %vm933_vm6, %v5067_v30, %v11512_v48  ;;  %v5096_v32 = vsel %vm933_vm6, %v5068_v9, %v11547_v41  ;;  %v11876_v61 = vpop.permute.xlu1 %4682 }
 0x483   : > { %9165 = vmatprep.mubr.msk.f32.mxu1 %vm9635_vm1, %v9634_v14  ;;  %v5123_v59 = vsel %vm962_vm7, %v5095_v5, %v11780_v44  ;;  %v5481_v45 = vcombine.high %v5473_v31, %v5473_v31  ;;  %v4986_v38 = vsel %vm817_vm2, %v11731_v40, %v11755_v13  ;;  %v5866_v26 = vcombine.low %v5858_v12, %v5865_v52 }
 0x484   : > { %v11808_v33 = vpop.permute.xlu0 %4660  ;;  %v5875_v46 = vrot.slane %v5867_v60, %v9900_v50  ;;  %v5882_v19 = vrot.slane %v5868_v56, %v9900_v50  ;;  %v5465_v22 = vcombine.high %v5463_v63, %v5463_v63  ;;  %v5885_v49 = vcombine.low %v5464_v11, %v5463_v63 }
 0x485   : > { %v4987_v20 = vsel %vm817_vm2, %v11780_v44, %v11594_v43  ;;  %v5014_v47 = vsel %vm846_vm3, %v4986_v38, %v11547_v41 }
 0x486   : > { %9166 = vmatmul.mubr.msk.f32.gmra.mxu1 %vm12964_vm0, %v5798_v39  ;;  %v4985_v39 = vsel %vm817_vm2, %v11703_v29, %v11481_v54  ;;  %v5447_v29 = vrot.slane %v5433_v37, %v9900_v50  ;;  %v5178_v54 = vsel %vm1020_vm9, %v5150_v28, %v11547_v41  ;;  %v5042_v16 = vsel %vm875_vm4, %v5014_v47, %v11808_v33  ;;  %v11914_v60 = vpop.permute.xlu1 %4906 }
 0x487   : > { %9168 = vmatprep.mubr.msk.f32.mxu1 %vm9635_vm1, %v9634_v14  ;;  %v5013_v35 = vsel %vm846_vm3, %v4985_v39, %v11512_v48  ;;  %v5482_v23 = vcombine.high %v5178_v54, %v5178_v54  ;;  %v5124_v48 = vsel %vm962_vm7, %v5096_v32, %v11808_v33  ;;  %v5489_v24 = vrot.slane %v5178_v54, %v9900_v50 }
 0x488   : > { %v4779_v18 = vpop.permute.xlu0 %4778  ;;  %v5041_v27 = vsel %vm875_vm4, %v5013_v35, %v11780_v44  ;;  %v5884_v40 = vcombine.low %v5447_v29, %v5456_v57  ;;  %v5015_v44 = vsel %vm846_vm3, %v4987_v20, %v11637_v2  ;;  %v5883_v57 = vcombine.low %v5875_v46, %v5882_v19 }
 0x489   : > { %v5152_v21 = vsel %vm991_vm8, %v5124_v48, %v4779_v18  ;;  %v5069_v13 = vsel %vm904_vm5, %v5041_v27, %v11594_v43  ;;  %v5496_v15 = vrot.slane %v5482_v23, %v9900_v50  ;;  %v5901_v39 = vcombine.low %v5465_v22, %v5473_v31 }
 0x48a   : > { %9169 = vmatmul.mubr.msk.f32.gmra.mxu1 %vm12964_vm0, %v5815_v8  ;;  %v5480_v8 = vrot.slane %v5466_v42, %v9900_v50  ;;  %v5180_v62 = vsel %vm1020_vm9, %v5152_v21, %v11685_v7  ;;  %v5097_v41 = vsel %vm933_vm6, %v5069_v13, %v11637_v2  ;;  %v5892_v28 = vrot.slane %v5884_v40, %v9900_v50  ;;  %v11950_v21 = vpop.permute.xlu1 %4798 }
 0x48b   : > { %9171 = vmatprep.mubr.msk.f32.mxu1 %vm9635_vm1, %v9634_v14  ;;  %v4988_v30 = vsel %vm817_vm2, %v11808_v33, %v4779_v18  ;;  %v5515_v42 = vcombine.high %v5180_v62, %v5180_v62  ;;  %v5498_v9 = vcombine.high %v5496_v15, %v5496_v15  ;;  %v5899_v29 = vrot.slane %v5885_v49, %v9900_v50 }
 0x48c   : > { %v11858_v25 = vpop.permute.xlu0 %4664  ;;  %v5902_v37 = vcombine.low %v5481_v45, %v5480_v8  ;;  %v5497_v31 = vcombine.high %v5489_v24, %v5489_v24  ;;  %v5522_v54 = vrot.slane %v5180_v62, %v9900_v50  ;;  %v5016_v63 = vsel %vm846_vm3, %v4988_v30, %v11685_v7 }
 0x48d   : > { %v5125_v52 = vsel %vm962_vm7, %v5097_v41, %v11858_v25  ;;  %v5043_v34 = vsel %vm875_vm4, %v5015_v44, %v11858_v25  ;;  %v5529_v8 = vrot.slane %v5515_v42, %v9900_v50  ;;  %v5919_v32 = vcombine.low %v5496_v15, %v5498_v9 }
 0x48e   : > { %9172 = vmatmul.mubr.msk.f32.gmra.mxu1 %vm12964_vm0, %v5832_v55  ;;  %v5151_v55 = vsel %vm991_vm8, %v5123_v59, %v11594_v43  ;;  %v5070_v43 = vsel %vm904_vm5, %v5042_v16, %v4779_v18  ;;  %v5153_v33 = vsel %vm991_vm8, %v5125_v52, %v11721_v53  ;;  %v5916_v56 = vrot.slane %v5902_v37, %v9900_v50 }
 0x48f   : > { %9174 = vmatprep.mubr.msk.f32.mxu1 %vm9635_vm1, %v9634_v14  ;;  %v5179_v17 = vsel %vm1020_vm9, %v5151_v55, %v11637_v2  ;;  %v5098_v1 = vsel %vm933_vm6, %v5070_v43, %v11685_v7  ;;  %v5071_v12 = vsel %vm904_vm5, %v5043_v34, %v11721_v53  ;;  %v5909_v59 = vrot.slane %v5901_v39, %v9900_v50 }
 0x490   : > { %v11884_v3 = vpop.permute.xlu0 %4671  ;;  %v5506_v2 = vrot.slane %v5179_v17, %v9900_v50  ;;  %v5499_v5 = vcombine.high %v5179_v17, %v5179_v17  ;;  %v5181_v38 = vsel %vm1020_vm9, %v5153_v33, %v11758_v10  ;;  %v5099_v48 = vsel %vm933_vm6, %v5071_v12, %v11758_v10 }
 0x491   : > { %v5126_v18 = vsel %vm962_vm7, %v5098_v1, %v11884_v3  ;;  %v5044_v27 = vsel %vm875_vm4, %v5016_v63, %v11884_v3  ;;  %v5918_v46 = vcombine.low %v5489_v24, %v5497_v31  ;;  %v5530_v19 = vcombine.high %v5522_v54, %v5522_v54 }
 0x492   : > { %9175 = vmatmul.mubr.msk.f32.gmra.mxu1 %vm12964_vm0, %v5849_v51  ;;  %v5514_v45 = vcombine.high %v5506_v2, %v5506_v2  ;;  %v5900_v51 = vcombine.low %v5892_v28, %v5899_v29  ;;  %v4989_v40 = vsel %vm817_vm2, %v11858_v25, %v11721_v53  ;;  %v5513_v22 = vrot.slane %v5499_v5, %v9900_v50 }
 0x493   : > { %9177 = vmatprep.mubr.msk.f32.mxu1 %vm9635_vm1, %v9634_v14  ;;  %v5531_v49 = vcombine.high %v5529_v8, %v5529_v8  ;;  %v5539_v20 = vrot.slane %v5181_v38, %v9900_v50  ;;  %v5933_v53 = vrot.slane %v5919_v32, %v9900_v50  ;;  %v5017_v24 = vsel %vm846_vm3, %v4989_v40, %v11758_v10 }
 0x494   : > { %v4787_v0 = vpop.permute.xlu0 %4786  ;;  %v5935_v15 = vcombine.low %v5506_v2, %v5514_v45  ;;  %v5936_v25 = vcombine.low %v5513_v22, %v5522_v54  ;;  %v5952_v43 = vcombine.low %v5530_v19, %v5529_v8  ;;  %v5532_v41 = vcombine.high %v5181_v38, %v5181_v38 }
 0x495   : > { %v5154_v11 = vsel %vm991_vm8, %v5126_v18, %v4787_v0  ;;  %v5072_v23 = vsel %vm904_vm5, %v5044_v27, %v4787_v0  ;;  %v4990_v37 = vsel %vm817_vm2, %v11884_v3, %v4787_v0  ;;  %v5953_v28 = vcombine.low %v5531_v49, %v5539_v20  ;;  %v11981_v0 = vpop.permute.xlu1 %4917 }
 0x496   : > { %9178 = vmatmul.mubr.msk.f32.gmra.mxu1 %vm12964_vm0, %v5866_v26  ;;  %v5182_v7 = vsel %vm1020_vm9, %v5154_v11, %v11803_v36  ;;  %v5917_v26 = vcombine.low %v5909_v59, %v5916_v56  ;;  %v5100_v47 = vsel %vm933_vm6, %v5072_v23, %v11803_v36  ;;  %v5926_v39 = vrot.slane %v5918_v46, %v9900_v50 }
 0x497   : > { %9180 = vmatprep.mubr.msk.f32.mxu1 %vm9635_vm1, %v9634_v14  ;;  %v5548_v16 = vcombine.high %v5182_v7, %v5182_v7  ;;  %v5555_v62 = vrot.slane %v5182_v7, %v9900_v50  ;;  %v5128_v44 = vsel %vm962_vm7, %v5100_v47, %v11876_v61  ;;  %v5018_v34 = vsel %vm846_vm3, %v4990_v37, %v11803_v36 }
 0x498   : > { %v11934_v35 = vpop.permute.xlu0 %4675  ;;  %v5934_v2 = vcombine.low %v5926_v39, %v5933_v53  ;;  %v5943_v1 = vrot.slane %v5935_v15, %v9900_v50  ;;  %v5950_v29 = vrot.slane %v5936_v25, %v9900_v50  ;;  %v5546_v31 = vrot.slane %v5532_v41, %v9900_v50 }
 0x499   : > { %v5127_v13 = vsel %vm962_vm7, %v5099_v48, %v11934_v35  ;;  %v5045_v3 = vsel %vm875_vm4, %v5017_v24, %v11934_v35  ;;  %v5562_v30 = vrot.slane %v5548_v16, %v9900_v50  ;;  %v5563_v42 = vcombine.high %v5555_v62, %v5555_v62  ;;  %v4934_v7 = vpop.permute.xlu1 %4933 }
 0x49a   : > { %9181 = vmatmul.mubr.msk.f32.gmra.mxu1 %vm12964_vm0, %v5883_v57  ;;  %v5155_v17 = vsel %vm991_vm8, %v5127_v13, %v11840_v58  ;;  %v5073_v33 = vsel %vm904_vm5, %v5045_v3, %v11840_v58  ;;  %v5960_v56 = vrot.slane %v5952_v43, %v9900_v50  ;;  %v5547_v54 = vcombine.high %v5539_v20, %v5539_v20 }
 0x49b   : > { %9183 = vmatprep.mubr.msk.f32.mxu1 %vm9635_vm1, %v9634_v14  ;;  %v5046_v12 = vsel %vm875_vm4, %v5018_v34, %v11876_v61  ;;  %v5967_v11 = vrot.slane %v5953_v28, %v9900_v50  ;;  %v5564_v5 = vcombine.high %v5562_v30, %v5562_v30  ;;  %v5970_v8 = vcombine.low %v5555_v62, %v5563_v42 }
 0x49c   : > { %v11957_v55 = vpop.permute.xlu0 %4902  ;;  %v4991_v32 = vsel %vm817_vm2, %v11934_v35, %v11840_v58  ;;  %v5969_v19 = vcombine.low %v5547_v54, %v5546_v31 }
 0x49d   : > { %v5183_v52 = vsel %vm1020_vm9, %v5155_v17, %v11957_v55  ;;  %v5101_v63 = vsel %vm933_vm6, %v5073_v33, %v11957_v55  ;;  %v5968_v35 = vcombine.low %v5960_v56, %v5967_v11  ;;  %v5986_v40 = vcombine.low %v5562_v30, %v5564_v5  ;;  %v4930_v24 = vpop.permute.xlu1 %4929 }
 0x49e   : > { %9184 = vmatmul.mubr.msk.f32.gmra.mxu1 %vm12964_vm0, %v5900_v51  ;;  %v5572_v9 = vrot.slane %v5183_v52, %v9900_v50  ;;  %v5019_v13 = vsel %vm846_vm3, %v4991_v32, %v11957_v55  ;;  %v5565_v22 = vcombine.high %v5183_v52, %v5183_v52  ;;  %v5984_v49 = vrot.slane %v5970_v8, %v9900_v50 }
 0x49f   : > { %9186 = vmatprep.mubr.msk.f32.mxu1 %vm9635_vm1, %v9634_v14  ;;  %v5977_v17 = vrot.slane %v5969_v19, %v9900_v50  ;;  %v5994_v52 = vrot.slane %v5986_v40, %v9900_v50 }
 0x4a0   : > { %v4795_v57 = vpop.permute.xlu0 %4794  ;;  %v5580_v45 = vcombine.high %v5572_v9, %v5572_v9  ;;  %v5579_v43 = vrot.slane %v5565_v22, %v9900_v50 }
 0x4a1   : > { %v5156_v10 = vsel %vm991_vm8, %v5128_v44, %v4795_v57  ;;  %v5074_v27 = vsel %vm904_vm5, %v5046_v12, %v4795_v57  ;;  %v4992_v47 = vsel %vm817_vm2, %v11876_v61, %v4795_v57  ;;  %v5985_v34 = vcombine.low %v5977_v17, %v5984_v49  ;;  %v4945_v56 = vpop.permute.xlu1 %4944 }
 0x4a2   : > { %9187 = vmatmul.mubr.msk.f32.gmra.mxu1 %vm12964_vm0, %v5917_v26  ;;  %v5184_v36 = vsel %vm1020_vm9, %v5156_v10, %v11914_v60  ;;  %v5951_v26 = vcombine.low %v5943_v1, %v5950_v29  ;;  %v5102_v46 = vsel %vm933_vm6, %v5074_v27, %v11914_v60  ;;  %v5987_v20 = vcombine.low %v5572_v9, %v5580_v45 }
 0x4a3   : > { %9189 = vmatprep.mubr.msk.f32.mxu1 %vm9635_vm1, %v9634_v14  ;;  %v5581_v38 = vcombine.high %v5184_v36, %v5184_v36  ;;  %v12014_v23 = vrot.slane %v5184_v36, %v9900_v50  ;;  %v5130_v55 = vsel %vm962_vm7, %v5102_v46, %v11981_v0  ;;  %v5020_v41 = vsel %vm846_vm3, %v4992_v47, %v11914_v60 }
 0x4a4   : > { %v11998_v18 = vpop.permute.xlu0 %4686  ;;  %v6001_v57 = vrot.slane %v5987_v20, %v9900_v50 }
 0x4a5   : > { %v5129_v59 = vsel %vm962_vm7, %v5101_v63, %v11998_v18  ;;  %v5595_v15 = vrot.slane %v5581_v38, %v9900_v50  ;;  %v5596_v16 = vcombine.high %v12014_v23, %v12014_v23  ;;  %v5047_v62 = vsel %vm875_vm4, %v5019_v13, %v11998_v18 }
 0x4a6   : > { %9190 = vmatmul.mubr.msk.f32.gmra.mxu1 %vm12964_vm0, %v5934_v2  ;;  %v5157_v48 = vsel %vm991_vm8, %v5129_v59, %v11950_v21  ;;  %v5075_v3 = vsel %vm904_vm5, %v5047_v62, %v11950_v21  ;;  %v6003_v9 = vcombine.low %v5579_v43, %v12014_v23  ;;  %v5048_v2 = vsel %vm875_vm4, %v5020_v41, %v11981_v0 }
 0x4a7   : > { %9192 = vmatprep.mubr.msk.f32.mxu1 %vm9635_vm1, %v9634_v14  ;;  %v6004_v28 = vcombine.low %v5596_v16, %v5595_v15  ;;  %v4993_v36 = vsel %vm817_vm2, %v11998_v18, %v11950_v21  ;;  %v6002_v54 = vcombine.low %v5994_v52, %v6001_v57  ;;  %v5597_v12 = vcombine.high %v5595_v15, %v5595_v15  ;;  %vm12965_vm2 = vmmov %vm12964_vm0 }
 0x4a8   : > { %v12020_v51 = vpop.permute.xlu0 %4910  ;;  %v6011_v32 = vrot.slane %v6003_v9, %v9900_v50 }
 0x4a9   : > { %v5185_v58 = vsel %vm1020_vm9, %v5157_v48, %v12020_v51  ;;  %v5103_v39 = vsel %vm933_vm6, %v5075_v3, %v12020_v51  ;;  %v6018_v0 = vrot.slane %v6004_v28, %v9900_v50  ;;  %v5021_v38 = vsel %vm846_vm3, %v4993_v36, %v12020_v51  ;;  %v4961_v48 = vpop.permute.xlu1 %4960  ;;  %vm12966_vm3 = vmmov %vm12964_vm0 }
 0x4aa   : > { %9193 = vmatmul.mubr.msk.f32.gmra.mxu1 %vm12964_vm0, %v5951_v26  ;;  %v5598_v53 = vcombine.high %v5185_v58, %v5185_v58  ;;  %v5605_v25 = vrot.slane %v5185_v58, %v9900_v50 }
 0x4ab   : > { %9195 = vmatprep.mubr.msk.f32.mxu1 %vm9635_vm1, %v9634_v14  ;;  %v6019_v26 = vcombine.low %v6011_v32, %v6018_v0  ;;  %v8842_v0 = vld [vmem:[%s12940_s8] ss:$0 sm:$0xff] }
 0x4ac   : > { %v4926_v37 = vpop.permute.xlu0 %4925  ;;  %v5612_v60 = vrot.slane %v5598_v53, %v9900_v50  ;;  %v5613_v30 = vcombine.high %v5605_v25, %v5605_v25  ;;  %v6020_v21 = vcombine.low %v5597_v12, %v5605_v25 }
 0x4ad   : > { %v5158_v61 = vsel %vm991_vm8, %v5130_v55, %v4926_v37  ;;  %v5076_v31 = vsel %vm904_vm5, %v5048_v2, %v4926_v37  ;;  %v4957_v43 = vpop.permute.xlu1 %4956 }
 0x4ae   : > { %v5186_v44 = vsel %vm1020_vm9, %v5158_v61, %v4934_v7  ;;  %9196 = vmatmul.mubr.msk.f32.gmra.mxu1 %vm12964_vm0, %v5968_v35  ;;  %v6021_v63 = vcombine.low %v5613_v30, %v5612_v60  ;;  %v5104_v27 = vsel %vm933_vm6, %v5076_v31, %v4934_v7  ;;  %v6028_v22 = vrot.slane %v6020_v21, %v9900_v50 }
 0x4af   : > { %v5614_v10 = vcombine.high %v5186_v44, %v5186_v44  ;;  %9198 = vmatprep.mubr.msk.f32.mxu1 %vm9635_vm1, %v9634_v14  ;;  %v5621_v33 = vrot.slane %v5186_v44, %v9900_v50  ;;  %v5132_v46 = vsel %vm962_vm7, %v5104_v27, %v4945_v56 }
 0x4b0   : > { %v4922_v42 = vpop.permute.xlu0 %4921  ;;  %v6035_v19 = vrot.slane %v6021_v63, %v9900_v50 }
 0x4b1   : > { %v5628_v1 = vrot.slane %v5614_v10, %v9900_v50  ;;  %v5131_v29 = vsel %vm962_vm7, %v5103_v39, %v4922_v42  ;;  %v5629_v18 = vcombine.high %v5621_v33, %v5621_v33  ;;  %v5049_v58 = vsel %vm875_vm4, %v5021_v38, %v4922_v42  ;;  %vm12967_vm4 = vmmov %vm12964_vm0 }
 0x4b2   : > { %9199 = vmatmul.mubr.msk.f32.gmra.mxu1 %vm12964_vm0, %v5985_v34  ;;  %v5159_v5 = vsel %vm991_vm8, %v5131_v29, %v4930_v24  ;;  %v5077_v20 = vsel %vm904_vm5, %v5049_v58, %v4930_v24  ;;  %v6036_v53 = vcombine.low %v6028_v22, %v6035_v19 }
 0x4b3   : > { %9201 = vmatprep.mubr.msk.f32.mxu1 %vm9635_vm1, %v9634_v14  ;;  %v5630_v11 = vcombine.high %v5628_v1, %v5628_v1  ;;  %v6037_v51 = vcombine.low %v5621_v33, %v5629_v18 }
 0x4b4   : > { %v4938_v8 = vpop.permute.xlu0 %4937 }
 0x4b5   : > { %v5187_v59 = vsel %vm1020_vm9, %v5159_v5, %v4938_v8  ;;  %v6038_v7 = vcombine.low %v5628_v1, %v5630_v11  ;;  %v5105_v55 = vsel %vm933_vm6, %v5077_v20, %v4938_v8  ;;  %v6045_v24 = vrot.slane %v6037_v51, %v9900_v50  ;;  %vm12968_vm6 = vmmov %vm12964_vm0  ;;  %v12132_v8 = vld [vmem:[%s12936_s4] ss:$0 sm:$0xff] }
 0x4b6   : > { %v5638_v45 = vrot.slane %v5187_v59, %v9900_v50  ;;  %9202 = vmatmul.mubr.msk.f32.gmra.mxu1 %vm12965_vm2, %v6002_v54  ;;  %v5631_v23 = vcombine.high %v5187_v59, %v5187_v59  ;;  %vm12954_vm2 = vcmask 254976  }
 0x4b7   : > { %9204 = vmatprep.mubr.msk.f32.mxu1 %vm9635_vm1, %v9634_v14  ;;  %v6052_v25 = vrot.slane %v6038_v7, %v9900_v50 }
 0x4b8   : > { %v4953_v35 = vpop.permute.xlu0 %4952  ;;  %v5646_v40 = vcombine.high %v5638_v45, %v5638_v45  ;;  %v5645_v47 = vrot.slane %v5631_v23, %v9900_v50 }
 0x4b9   : > { %v5160_v13 = vsel %vm991_vm8, %v5132_v46, %v4953_v35  ;;  %v6053_v3 = vcombine.low %v6045_v24, %v6052_v25 }
 0x4ba   : > { %v5188_v49 = vsel %vm1020_vm9, %v5160_v13, %v4961_v48  ;;  %9205 = vmatmul.mubr.msk.f32.gmra.mxu1 %vm12966_vm3, %v6019_v26  ;;  %v6054_v37 = vcombine.low %v5638_v45, %v5646_v40  ;;  %vm12971_vm3 = vcmask 1041409  }
 0x4bb   : > { %v5647_v15 = vcombine.high %v5188_v49, %v5188_v49  ;;  %v5654_v16 = vrot.slane %v5188_v49, %v9900_v50  ;;  %9207 = vmatprep.mubr.msk.f32.mxu1 %vm9635_vm1, %v9634_v14 }
 0x4bc   : > { %v4949_v62 = vpop.permute.xlu0 %4948  ;;  %v6062_v10 = vrot.slane %v6054_v37, %v9900_v50 }
 0x4bd   : > { %v6055_v61 = vcombine.low %v5645_v47, %v5654_v16  ;;  %v5133_v17 = vsel %vm962_vm7, %v5105_v55, %v4949_v62  ;;  %v5661_v41 = vrot.slane %v5647_v15, %v9900_v50  ;;  %v5662_v44 = vcombine.high %v5654_v16, %v5654_v16  ;;  %vm12969_vm7 = vmmov %vm12964_vm0 }
 0x4be   : > { %9208 = vmatmul.mubr.msk.f32.gmra.mxu1 %vm12967_vm4, %v6036_v53  ;;  %v5161_v57 = vsel %vm991_vm8, %v5133_v17, %v4957_v43  ;;  %vm12970_vm8 = vmmov %vm12964_vm0  ;;  %vm12972_vm4 = vcmask 1042434  }
 0x4bf   : > { %9210 = vmatprep.mubr.msk.f32.mxu1 %vm9635_vm1, %v9634_v14  ;;  %v6069_v52 = vrot.slane %v6055_v61, %v9900_v50  ;;  %v6071_v60 = vcombine.low %v5662_v44, %v5661_v41  ;;  %v5663_v30 = vcombine.high %v5661_v41, %v5661_v41 }
 0x4c0   : > { %v4965_v28 = vpop.permute.xlu0 %4964 }
 0x4c1   : > { %v5189_v39 = vsel %vm1020_vm9, %v5161_v57, %v4965_v28  ;;  %v6070_v29 = vcombine.low %v6062_v10, %v6069_v52  ;;  %v6079_v31 = vrot.slane %v6071_v60, %v9900_v50 }
 0x4c2   : > { %v5664_v42 = vcombine.high %v5189_v39, %v5189_v39  ;;  %v5671_v34 = vrot.slane %v5189_v39, %v9900_v50  ;;  %9211 = vmatmul.mubr.msk.f32.gmra.mxu1 %vm12968_vm6, %v6053_v3  ;;  %vm12973_vm6 = vcmask 1043459  }
 0x4c3   : > { %9213 = vmatprep.mubr.msk.f32.mxu1 %vm9635_vm1, %v9634_v14 }
 0x4c4   : > { %v5678_v9 = vrot.slane %v5664_v42, %v9900_v50  ;;  %v5679_v2 = vcombine.high %v5671_v34, %v5671_v34  ;;  %v6072_v1 = vcombine.low %v5663_v30, %v5671_v34 }
 0x4c6   : > { %v6086_v33 = vrot.slane %v6072_v1, %v9900_v50  ;;  %9214 = vmatmul.mubr.msk.f32.gmra.mxu1 %vm12969_vm7, %v6070_v29  ;;  %v6088_v36 = vcombine.low %v5679_v2, %v5678_v9  ;;  %vm12974_vm7 = vcmask 1044484  }
 0x4c7   : > { %9216 = vmatprep.mubr.msk.f32.mxu1 %vm9635_vm1, %v9634_v14 }
 0x4c8   : > { %v6087_v56 = vcombine.low %v6079_v31, %v6086_v33  ;;  %v6095_v54 = vrot.slane %v6088_v36, %v9900_v50 }
 0x4ca   : > { %9217 = vmatmul.mubr.msk.f32.gmra.mxu1 %vm12970_vm8, %v6087_v56  ;;  %vm12975_vm8 = vmmov %vm12971_vm3 }
 0x4cb   : > { %9219 = vmatprep.mubr.msk.f32.mxu1 %vm9635_vm1, %v9634_v14 }
 0x4ce   : > { %9220 = vmatmul.mubr.msk.f32.gmra.mxu1 %vm12964_vm0, %v6095_v54  ;;  %vm12976_vm0 = vmmov %vm12972_vm4 }
 0x52a   : > { %v4521_v12 = vpop.f32.mrf.mxu1 }
 0x52b   : > { %v4522_v63 = vadd.f32 %v8842_v0, %v4521_v12 }
 0x52c   : > { %v9142_v11 = vpop.f32.mrf.mxu1 }
 0x52d   : > { %4526 = vst.msk [vmem:[%s12125_s29] sm:$0x3] %vm12954_vm2, %v4522_v63 }
 0x52e   : > { %v6212_v5 = vpop.f32.mrf.mxu1 }
 0x52f   : > { %v6213_v27 = vadd.f32 %v12132_v8, %v6212_v5 }
 0x530   : > { %v9149_v59 = vpop.f32.mrf.mxu1 }
 0x531   : > { %v8872_v32 = vmul.f32 -1.442695, %v6213_v27 }
 0x532   : > { %v6217_v21 = vpop.f32.mrf.mxu1 }
 0x533   : > { %9416 = vpow2.f32 %v8872_v32  ;;  %v6218_v18 = vadd.f32 %v12132_v8, %v6217_v21 }
 0x534   : > { %v9152_v45 = vpop.f32.mrf.mxu1 }
 0x535   : > { %v8873_v38 = vmul.f32 -1.442695, %v6218_v18 }
 0x536   : > { %v6222_v23 = vpop.f32.mrf.mxu1 }
 0x537   : > { %9418 = vpow2.f32 %v8873_v38  ;;  %v12137_v48 = vadd.f32 %v12132_v8, %v6222_v23 }
 0x538   : > { %v9155_v26 = vpop.f32.mrf.mxu1 }
 0x539   : > { %v8874_v7 = vmul.f32 -1.442695, %v12137_v48 }
 0x53a   : > { %v6227_v46 = vpop.f32.mrf.mxu1 }
 0x53b   : > { %9420 = vpow2.f32 %v8874_v7  ;;  %v12141_v58 = vadd.f32 %v12132_v8, %v6227_v46 }
 0x53c   : > { %v9158_v35 = vpop.f32.mrf.mxu1 }
 0x53d   : > { %v8875_v19 = vmul.f32 -1.442695, %v12141_v58 }
 0x53e   : > { %v6232_v40 = vpop.f32.mrf.mxu1 }
 0x53f   : > { %9422 = vpow2.f32 %v8875_v19  ;;  %v12145_v13 = vadd.f32 %v12132_v8, %v6232_v40 }
 0x540   : > { %v9417_v22 = vpop.eup %9416  ;;  %v9161_v51 = vpop.f32.mrf.mxu1 }
 0x541   : > { %v6411_v49 = vadd.f32 1.0, %v9417_v22  ;;  %v8876_v20 = vmul.f32 -1.442695, %v12145_v13 }
 0x542   : > { %v6237_v47 = vpop.f32.mrf.mxu1 }
 0x543   : > { %9424 = vrcp.f32 %v6411_v49  ;;  %v12149_v15 = vadd.f32 %v12132_v8, %v6237_v47 }
 0x544   : > { %v9419_v16 = vpop.eup %9418  ;;  %9426 = vpow2.f32 %v8876_v20  ;;  %v9164_v55 = vpop.f32.mrf.mxu1 }
 0x545   : > { %v6412_v62 = vadd.f32 1.0, %v9419_v16  ;;  %v8877_v53 = vmul.f32 -1.442695, %v12149_v15 }
 0x546   : > { %v6242_v25 = vpop.f32.mrf.mxu1 }
 0x547   : > { %9428 = vrcp.f32 %v6412_v62  ;;  %v12153_v37 = vadd.f32 %v12132_v8, %v6242_v25 }
 0x548   : > { %v9421_v61 = vpop.eup %9420  ;;  %9430 = vpow2.f32 %v8877_v53  ;;  %v9167_v17 = vpop.f32.mrf.mxu1 }
 0x549   : > { %v6413_v43 = vadd.f32 1.0, %v9421_v61  ;;  %v8878_v24 = vmul.f32 -1.442695, %v12153_v37 }
 0x54a   : > { %v6247_v41 = vpop.f32.mrf.mxu1 }
 0x54b   : > { %9432 = vrcp.f32 %v6413_v43  ;;  %v12157_v44 = vadd.f32 %v12132_v8, %v6247_v41 }
 0x54c   : > { %v9423_v52 = vpop.eup %9422  ;;  %9434 = vpow2.f32 %v8878_v24  ;;  %v9170_v57 = vpop.f32.mrf.mxu1 }
 0x54d   : > { %v6414_v28 = vadd.f32 1.0, %v9423_v52  ;;  %v8879_v3 = vmul.f32 -1.442695, %v12157_v44 }
 0x54e   : > { %v6252_v10 = vpop.f32.mrf.mxu1 }
 0x54f   : > { %9436 = vrcp.f32 %v6414_v28  ;;  %v12161_v39 = vadd.f32 %v12132_v8, %v6252_v10 }
 0x550   : > { %v9425_v60 = vpop.eup %9424  ;;  %9438 = vpow2.f32 %v8879_v3  ;;  %v9173_v30 = vpop.f32.mrf.mxu1 }
 0x551   : > { %v9427_v42 = vpop.eup %9426  ;;  %v6486_v34 = vmul.f32 %v9425_v60, %v6213_v27  ;;  %v8880_v9 = vmul.f32 -1.442695, %v12161_v39 }
 0x552   : > { %v6415_v2 = vadd.f32 1.0, %v9427_v42  ;;  %v6257_v1 = vpop.f32.mrf.mxu1 }
 0x553   : > { %v12165_v29 = vadd.f32 %v12132_v8, %v6257_v1  ;;  %v6536_v33 = vcombine.high %v6486_v34, %v6486_v34  ;;  %9440 = vpow2.f32 %v8880_v9  ;;  %v6543_v11 = vrot.slane %v6486_v34, %v9900_v50 }
 0x554   : > { %v9429_v31 = vpop.eup %9428  ;;  %v9176_v36 = vpop.f32.mrf.mxu1  ;;  %9442 = vrcp.f32 %v6415_v2 }
 0x555   : > { %v9431_v56 = vpop.eup %9430  ;;  %v6487_v54 = vmul.f32 %v9429_v31, %v6218_v18  ;;  %v8881_v0 = vmul.f32 -1.442695, %v12165_v29  ;;  %v6550_v59 = vrot.slane %v6536_v33, %v9900_v50  ;;  %v6551_v35 = vcombine.high %v6543_v11, %v6543_v11 }
 0x556   : > { %v6416_v12 = vadd.f32 1.0, %v9431_v56  ;;  %v6262_v63 = vpop.f32.mrf.mxu1 }
 0x557   : > { %v6553_v5 = vcombine.high %v6487_v54, %v6487_v54  ;;  %9444 = vpow2.f32 %v8881_v0  ;;  %v12171_v32 = vadd.f32 %v12132_v8, %v6262_v63  ;;  %v6560_v23 = vrot.slane %v6487_v54, %v9900_v50 }
 0x558   : > { %v9433_v27 = vpop.eup %9432  ;;  %9446 = vrcp.f32 %v6416_v12  ;;  %v9179_v21 = vpop.f32.mrf.mxu1  ;;  %v6552_v49 = vcombine.high %v6550_v59, %v6550_v59 }
 0x559   : > { %v9435_v45 = vpop.eup %9434  ;;  %v6567_v18 = vrot.slane %v6553_v5, %v9900_v50  ;;  %v6488_v38 = vmul.f32 %v9433_v27, %v12137_v48  ;;  %v8882_v7 = vmul.f32 -1.442695, %v12171_v32  ;;  %v6568_v53 = vcombine.high %v6560_v23, %v6560_v23 }
 0x55a   : > { %v6417_v26 = vadd.f32 1.0, %v9435_v45  ;;  %v6267_v46 = vpop.f32.mrf.mxu1 }
 0x55b   : > { %v6569_v19 = vcombine.high %v6567_v18, %v6567_v18  ;;  %v6570_v40 = vcombine.high %v6488_v38, %v6488_v38  ;;  %v6577_v22 = vrot.slane %v6488_v38, %v9900_v50  ;;  %v12183_v52 = vadd.f32 %v12132_v8, %v6267_v46 }
 0x55c   : > { %v9437_v51 = vpop.eup %9436  ;;  %9448 = vrcp.f32 %v6417_v26  ;;  %v9182_v20 = vpop.f32.mrf.mxu1 }
 0x55d   : > { %v9439_v47 = vpop.eup %9438  ;;  %v12178_v16 = vadd.f32 %v6569_v19, %v6543_v11  ;;  %v6584_v48 = vrot.slane %v6570_v40, %v9900_v50  ;;  %v6585_v55 = vcombine.high %v6577_v22, %v6577_v22  ;;  %v7051_v62 = vadd.f32 %v6577_v22, %v6551_v35 }
 0x55e   : > { %v6489_v25 = vmul.f32 %v9437_v51, %v12141_v58  ;;  %v6418_v61 = vadd.f32 1.0, %v9439_v47  ;;  %9450 = vpow2.f32 %v8882_v7  ;;  %v6272_v17 = vpop.f32.mrf.mxu1  ;;  %v8883_v63 = vmul.f32 -1.442695, %v12183_v52 }
 0x55f   : > { %v6586_v43 = vcombine.high %v6584_v48, %v6584_v48  ;;  %v7052_v24 = vadd.f32 %v6585_v55, %v6550_v59  ;;  %v7053_v41 = vadd.f32 %v6584_v48, %v6552_v49  ;;  %v8898_v57 = vrot.slane %v7051_v62, 9 }
 0x560   : > { %v6587_v28 = vcombine.high %v6489_v25, %v6489_v25  ;;  %v6594_v3 = vrot.slane %v6489_v25, %v9900_v50  ;;  %9452 = vrcp.f32 %v6418_v61  ;;  %v9185_v10 = vpop.f32.mrf.mxu1  ;;  %v9441_v34 = vpop.eup %9440 }
 0x561   : > { %v7054_v60 = vadd.f32 %v6586_v43, %v6560_v23  ;;  %v8899_v30 = vrot.slane %v7052_v24, 9  ;;  %v8900_v42 = vrot.slane %v7053_v41, 9  ;;  %v7296_v58 = vadd.f32 %v8898_v57, %v7051_v62  ;;  %v9443_v33 = vpop.eup %9442 }
 0x562   : > { %v6601_v9 = vrot.slane %v6587_v28, %v9900_v50  ;;  %v6602_v2 = vcombine.high %v6594_v3, %v6594_v3  ;;  %v7055_v1 = vadd.f32 %v6594_v3, %v6568_v53  ;;  %v6277_v31 = vpop.f32.mrf.mxu1  ;;  %v6490_v23 = vmul.f32 %v9443_v33, %v12145_v13 }
 0x563   : > { %v8901_v36 = vrot.slane %v7054_v60, 9  ;;  %v7297_v56 = vadd.f32 %v8899_v30, %v7052_v24  ;;  %v7298_v54 = vadd.f32 %v8900_v42, %v7053_v41  ;;  %v7345_v27 = vmul.f32 0.25, %v7296_v58 }
 0x564   : > { %v9445_v0 = vpop.eup %9444  ;;  %v8902_v12 = vrot.slane %v7055_v1, 9  ;;  %v9188_v11 = vpop.f32.mrf.mxu1  ;;  %v6603_v59 = vcombine.high %v6601_v9, %v6601_v9  ;;  %v12190_v38 = vadd.f32 %v6602_v2, %v6567_v18  ;;  %v6419_v35 = vadd.f32 1.0, %v9441_v34 }
 0x565   : > { %v9447_v5 = vpop.eup %9446  ;;  %v12188_v21 = vadd.f32 %v8901_v36, %v7054_v60  ;;  %v7346_v45 = vmul.f32 0.25, %v7297_v56  ;;  %v12195_v7 = vmul.f32 0.25, %v7298_v54  ;;  %v6420_v19 = vadd.f32 1.0, %v9445_v0 }
 0x566   : > { %v12193_v26 = vpop.f32.mrf.mxu1  ;;  %v6491_v46 = vmul.f32 %v9447_v5, %v12149_v15  ;;  %v7300_v40 = vadd.f32 %v8902_v12, %v7055_v1  ;;  %v6604_v22 = vcombine.high %v6490_v23, %v6490_v23  ;;  %v6611_v51 = vrot.slane %v6490_v23, %v9900_v50 }
 0x567   : > { %9454 = vpow2.f32 %v8883_v63  ;;  %v12201_v13 = vadd.f32 %v12132_v8, %v6272_v17  ;;  %v12208_v24 = vadd.f32 %v12132_v8, %v6277_v31  ;;  %v12218_v23 = vrot.slane %v7345_v27, %v9820_v6 }
 0x568   : > { %v9191_v49 = vpop.f32.mrf.mxu1  ;;  %v6621_v47 = vcombine.high %v6491_v46, %v6491_v46  ;;  %v6628_v18 = vrot.slane %v6491_v46, %v9900_v50  ;;  %9456 = vrcp.f32 %v6419_v35  ;;  %v6618_v48 = vrot.slane %v6604_v22, %v9900_v50 }
 0x569   : > { %v9449_v20 = vpop.eup %9448  ;;  %v6619_v55 = vcombine.high %v6611_v51, %v6611_v51  ;;  %9458 = vrcp.f32 %v6420_v19  ;;  %v8884_v43 = vmul.f32 -1.442695, %v12201_v13  ;;  %v12224_v22 = vrot.slane %v7346_v45, %v9820_v6 }
 0x56a   : > { %v6492_v15 = vmul.f32 %v9449_v20, %v12153_v37  ;;  %v6287_v62 = vpop.f32.mrf.mxu1  ;;  %v6635_v25 = vrot.slane %v6621_v47, %v9900_v50  ;;  %v6636_v61 = vcombine.high %v6628_v18, %v6628_v18  ;;  %v6620_v41 = vcombine.high %v6618_v48, %v6618_v48 }
 0x56b   : > { %v9451_v53 = vpop.eup %9450  ;;  %9460 = vpow2.f32 %v8884_v43 }
 0x56c   : > { %v6638_v57 = vcombine.high %v6492_v15, %v6492_v15  ;;  %v6645_v17 = vrot.slane %v6492_v15, %v9900_v50  ;;  %v6421_v28 = vadd.f32 1.0, %v9451_v53  ;;  %v9194_v3 = vpop.f32.mrf.mxu1  ;;  %v6637_v60 = vcombine.high %v6635_v25, %v6635_v25 }
 0x56d   : > { %v9453_v10 = vpop.eup %9452  ;;  %v7057_v37 = vadd.f32 %v6636_v61, %v6601_v9  ;;  %v7058_v30 = vadd.f32 %v6635_v25, %v6603_v59 }
 0x56e   : > { %v6652_v42 = vrot.slane %v6638_v57, %v9900_v50  ;;  %v6653_v34 = vcombine.high %v6645_v17, %v6645_v17  ;;  %v7060_v58 = vadd.f32 %v6645_v17, %v6619_v55  ;;  %v6493_v2 = vmul.f32 %v9453_v10, %v12157_v44  ;;  %v12213_v1 = vpop.f32.mrf.mxu1 }
 0x56f   : > { %v7059_v31 = vadd.f32 %v6637_v60, %v6611_v51  ;;  %v8904_v33 = vrot.slane %v7057_v37, 9  ;;  %v8905_v36 = vrot.slane %v7058_v30, 9  ;;  %9462 = vrcp.f32 %v6421_v28 }
 0x570   : > { %v6654_v56 = vcombine.high %v6652_v42, %v6652_v42  ;;  %v12215_v54 = vadd.f32 %v6653_v34, %v6618_v48  ;;  %v7062_v0 = vadd.f32 %v6652_v42, %v6620_v41  ;;  %v8907_v12 = vrot.slane %v7060_v58, 9  ;;  %v9197_v9 = vpop.f32.mrf.mxu1 }
 0x571   : > { %v8906_v63 = vrot.slane %v7059_v31, 9  ;;  %v7302_v11 = vadd.f32 %v8904_v33, %v7057_v37  ;;  %v7303_v5 = vadd.f32 %v8905_v36, %v7058_v30  ;;  %v6655_v59 = vcombine.high %v6493_v2, %v6493_v2 }
 0x572   : > { %v8903_v44 = vrot.slane %v12190_v38, 9  ;;  %v8909_v46 = vrot.slane %v7062_v0, 9  ;;  %v7305_v35 = vadd.f32 %v8907_v12, %v7060_v58  ;;  %v12221_v19 = vpop.f32.mrf.mxu1  ;;  %v7349_v51 = vmul.f32 0.25, %v7300_v40 }
 0x573   : > { %v12226_v49 = vadd.f32 %v6654_v56, %v6628_v18  ;;  %v6662_v20 = vrot.slane %v6493_v2, %v9900_v50  ;;  %v7304_v47 = vadd.f32 %v8906_v63, %v7059_v31  ;;  %v8908_v48 = vrot.slane %v12215_v54, 9 }
 0x574   : > { %v6669_v27 = vrot.slane %v6655_v59, %v9900_v50  ;;  %v8885_v55 = vmul.f32 -1.442695, %v12208_v24  ;;  %v9200_v15 = vpop.f32.mrf.mxu1  ;;  %v9455_v53 = vpop.eup %9454  ;;  %v12232_v25 = vmul.f32 0.25, %v7302_v11  ;;  %v12234_v61 = vmul.f32 0.25, %v7303_v5 }
 0x575   : > { %v12236_v45 = vadd.f32 %v8909_v46, %v7062_v0  ;;  %v12238_v40 = vmul.f32 0.25, %v7305_v35  ;;  %v9457_v18 = vpop.eup %9456  ;;  %v6670_v43 = vcombine.high %v6662_v20, %v6662_v20  ;;  %v6422_v57 = vadd.f32 1.0, %v9455_v53 }
 0x576   : > { %v6671_v41 = vcombine.high %v6669_v27, %v6669_v27  ;;  %9464 = vpow2.f32 %v8885_v55  ;;  %v12240_v17 = vpop.f32.mrf.mxu1  ;;  %v9459_v28 = vpop.eup %9458  ;;  %v6494_v3 = vmul.f32 %v9457_v18, %v12161_v39  ;;  %v12245_v10 = vadd.f32 %v12132_v8, %v12193_v26 }
 0x577   : > { %v12248_v60 = vadd.f32 %v12132_v8, %v6287_v62  ;;  %v7348_v37 = vmul.f32 0.25, %v12188_v21  ;;  %v6495_v30 = vmul.f32 %v9459_v28, %v12165_v29  ;;  %9466 = vrcp.f32 %v6422_v57 }
 0x578   : > { %v12254_v42 = vrot.slane %v12195_v7, %v9820_v6  ;;  %v12257_v34 = vrot.slane %v7349_v51, %v9820_v6  ;;  %v9203_v39 = vpop.f32.mrf.mxu1  ;;  %v6672_v58 = vcombine.high %v6494_v3, %v6494_v3  ;;  %v6679_v26 = vrot.slane %v6494_v3, %v9900_v50  ;;  %v9461_v31 = vpop.eup %9460 }
 0x579   : > { %v8886_v2 = vmul.f32 -1.442695, %v12245_v10  ;;  %v8887_v62 = vmul.f32 -1.442695, %v12248_v60  ;;  %v6689_v21 = vcombine.high %v6495_v30, %v6495_v30  ;;  %v6696_v29 = vrot.slane %v6495_v30, %v9900_v50 }
 0x57a   : > { %v12264_v33 = vrot.slane %v7348_v37, %v9820_v6  ;;  %v7568_v7 = vsel %vm12971_vm3, %v12224_v22, %v12218_v23  ;;  %v12269_v36 = vpop.f32.mrf.mxu1  ;;  %v6686_v56 = vrot.slane %v6672_v58, %v9900_v50  ;;  %v6687_v0 = vcombine.high %v6679_v26, %v6679_v26  ;;  %vm12977_vm3 = vmmov %vm12973_vm6 }
 0x57b   : > { %v6423_v12 = vadd.f32 1.0, %v9461_v31  ;;  %9468 = vpow2.f32 %v8886_v2  ;;  %v6703_v63 = vrot.slane %v6689_v21, %v9900_v50  ;;  %v6704_v11 = vcombine.high %v6696_v29, %v6696_v29 }
 0x57c   : > { %v9463_v9 = vpop.eup %9462  ;;  %v7065_v5 = vadd.f32 %v6696_v29, %v6670_v43  ;;  %9470 = vpow2.f32 %v8887_v62  ;;  %v9206_v59 = vpop.f32.mrf.mxu1  ;;  %v6688_v46 = vcombine.high %v6686_v56, %v6686_v56  ;;  %v7569_v51 = vsel %vm12972_vm4, %v12254_v42, %v7568_v7  ;;  %vm12978_vm4 = vmmov %vm12974_vm7 }
 0x57d   : > { %v6496_v35 = vmul.f32 %v9463_v9, %v12171_v32  ;;  %9472 = vrcp.f32 %v6423_v12  ;;  %v6705_v55 = vcombine.high %v6703_v63, %v6703_v63  ;;  %v7066_v15 = vadd.f32 %v6704_v11, %v6669_v27 }
 0x57e   : > { %v7067_v53 = vadd.f32 %v6703_v63, %v6671_v41  ;;  %v8912_v18 = vrot.slane %v7065_v5, 9  ;;  %v12276_v57 = vpop.f32.mrf.mxu1  ;;  %v7064_v28 = vadd.f32 %v6688_v46, %v6662_v20  ;;  %v7570_v43 = vsel %vm12973_vm6, %v12264_v33, %v7569_v51  ;;  %vm12979_vm6 = vmmov %vm12975_vm8 }
 0x57f   : > { %v6706_v3 = vcombine.high %v6496_v35, %v6496_v35  ;;  %v6713_v37 = vrot.slane %v6496_v35, %v9900_v50  ;;  %v12281_v30 = vmul.f32 0.25, %v7304_v47  ;;  %v8913_v32 = vrot.slane %v7066_v15, 9 }
 0x580   : > { %v8914_v39 = vrot.slane %v7067_v53, 9  ;;  %v7310_v58 = vadd.f32 %v8912_v18, %v7065_v5  ;;  %v9209_v2 = vpop.f32.mrf.mxu1  ;;  %v8911_v62 = vrot.slane %v7064_v28, 9  ;;  %v7441_v20 = vrot.slane %v12232_v25, %v9820_v6 }
 0x581   : > { %v12284_v27 = vrot.slane %v6706_v3, %v9900_v50  ;;  %v6721_v41 = vcombine.high %v6713_v37, %v6713_v37  ;;  %v7069_v31 = vadd.f32 %v6713_v37, %v6687_v0  ;;  %v7311_v21 = vadd.f32 %v8913_v32, %v7066_v15 }
 0x582   : > { %v7312_v29 = vadd.f32 %v8914_v39, %v7067_v53  ;;  %v7571_v7 = vsel %vm12974_vm7, %v12257_v34, %v7570_v43  ;;  %v12290_v47 = vpop.f32.mrf.mxu1  ;;  %v12294_v9 = vrot.slane %v12234_v61, %v9820_v6  ;;  %v12297_v63 = vmul.f32 0.25, %v12236_v45  ;;  %vm12980_vm7 = vmmov %vm12976_vm0 }
 0x583   : > { %v9465_v12 = vpop.eup %9464  ;;  %v12299_v11 = vadd.f32 %v6705_v55, %v6679_v26  ;;  %v7359_v0 = vmul.f32 0.25, %v7310_v58  ;;  %7588 = vrot.lane.b32.xlu0 %v7571_v7, %s9637_s25  ;;  %v7309_v5 = vadd.f32 %v8911_v62, %v7064_v28  ;;  %v6722_v59 = vcombine.high %v12284_v27, %v12284_v27 }
 0x584   : > { %v12304_v46 = vadd.f32 %v6721_v41, %v6686_v56  ;;  %v6424_v35 = vadd.f32 1.0, %v9465_v12  ;;  %v9212_v51 = vpop.f32.mrf.mxu1  ;;  %v9467_v15 = vpop.eup %9466  ;;  %v12306_v53 = vmul.f32 0.25, %v7311_v21  ;;  %v12308_v61 = vmul.f32 0.25, %v7312_v29 }
 0x585   : > { %v8916_v45 = vrot.slane %v7069_v31, 9  ;;  %v7301_v26 = vadd.f32 %v8903_v44, %v12190_v38  ;;  %v6497_v55 = vmul.f32 %v9467_v15, %v12183_v52  ;;  %v7628_v56 = vsel %vm12975_vm8, %v12254_v42, %v12224_v22  ;;  %vm12981_vm8 = vmmov %vm12977_vm3 }
 0x586   : > { %9474 = vrcp.f32 %v6424_v35  ;;  %v12319_v18 = vadd.f32 %v12132_v8, %v12213_v1  ;;  %v12321_v28 = vpop.f32.mrf.mxu1  ;;  %v12324_v3 = vrot.slane %v7359_v0, %v9820_v6  ;;  %v7629_v38 = vsel %vm12976_vm0, %v12264_v33, %v7628_v56  ;;  %vm12982_vm0 = vmmov %vm12978_vm4 }
 0x587   : > { %v7350_v37 = vmul.f32 0.25, %v7301_v26  ;;  %v12330_v52 = vadd.f32 %v12132_v8, %v12221_v19  ;;  %v12332_v43 = vmul.f32 0.25, %v7309_v5  ;;  %v6723_v32 = vcombine.high %v6497_v55, %v6497_v55 }
 0x588   : > { %v9469_v44 = vpop.eup %9468  ;;  %v7630_v1 = vsel %vm12977_vm3, %v12257_v34, %v7629_v38  ;;  %v8888_v39 = vmul.f32 -1.442695, %v12319_v18  ;;  %v9215_v58 = vpop.f32.mrf.mxu1  ;;  %v12341_v19 = vadd.f32 %v12132_v8, %v12240_v17  ;;  %v12343_v7 = vadd.f32 %v8916_v45, %v7069_v31  ;;  %vm12983_vm3 = vmmov %vm12979_vm6 }
 0x589   : > { %v9471_v2 = vpop.eup %9470  ;;  %v6425_v62 = vadd.f32 1.0, %v9469_v44  ;;  %v7611_v41 = vrot.slane %v7350_v37, %v9820_v6  ;;  %v8889_v21 = vmul.f32 -1.442695, %v12330_v52  ;;  %v12346_v12 = vrot.slane %v6497_v55, %v9900_v50 }
 0x58a   : > { %v9473_v29 = vpop.eup %9472  ;;  %v6426_v34 = vadd.f32 1.0, %v9471_v2  ;;  %9476 = vpow2.f32 %v8888_v39  ;;  %v12348_v0 = vpop.f32.mrf.mxu1  ;;  %v8890_v51 = vmul.f32 -1.442695, %v12341_v19  ;;  %v12354_v17 = vrot.slane %v6723_v32, %v9900_v50 }
 0x58b   : > { %v6498_v5 = vmul.f32 %v9473_v29, %v12201_v13  ;;  %9478 = vrcp.f32 %v6425_v62  ;;  %v7631_v35 = vsel %vm12978_vm4, %v7611_v41, %v7630_v1  ;;  %v7306_v31 = vadd.f32 %v8908_v48, %v12215_v54  ;;  %vm12984_vm4 = vmmov %vm12983_vm3 }
 0x58c   : > { %9480 = vrcp.f32 %v6426_v34  ;;  %7648 = vrot.lane.b32.xlu1 %v7631_v35, %s9638_s19  ;;  %v7449_v15 = vrot.slane %v12281_v30, %v9820_v6  ;;  %v9218_v45 = vpop.f32.mrf.mxu1  ;;  %v7453_v55 = vrot.slane %v12238_v40, %v9820_v6  ;;  %v7522_v54 = vsel %vm12979_vm6, %v12294_v9, %v7441_v20  ;;  %vm12985_vm6 = vmmov %vm12980_vm7 }
 0x58d   : > { %v6740_v13 = vcombine.high %v6498_v5, %v6498_v5  ;;  %v12363_v26 = vrot.slane %v6498_v5, %v9900_v50  ;;  %9482 = vpow2.f32 %v8889_v21  ;;  %v7355_v56 = vmul.f32 0.25, %v7306_v31 }
 0x58e   : > { %9484 = vpow2.f32 %v8890_v51  ;;  %v12374_v48 = vadd.f32 %v12132_v8, %v12269_v36  ;;  %v12376_v30 = vpop.f32.mrf.mxu1  ;;  %v7523_v40 = vsel %vm12980_vm7, %v7449_v15, %v7522_v54  ;;  %v8910_v44 = vrot.slane %v12226_v49, 9  ;;  %vm12986_vm7 = vmmov %vm12981_vm8 }
 0x58f   : > { %v6754_v37 = vrot.slane %v6740_v13, %v9900_v50  ;;  %v6755_v38 = vcombine.high %v12363_v26, %v12363_v26  ;;  %v7457_v25 = vrot.slane %v7355_v56, %v9820_v6  ;;  %v7524_v32 = vsel %vm12981_vm8, %v7453_v55, %v7523_v40  ;;  %vm12987_vm8 = vmmov %vm12985_vm6 }
 0x590   : > { %v8891_v20 = vmul.f32 -1.442695, %v12374_v48  ;;  %v12388_v36 = vrot.slane %v12297_v63, %v9820_v6  ;;  %v9221_v1 = vpop.f32.mrf.mxu1  ;;  %v7308_v62 = vadd.f32 %v8910_v44, %v12226_v49  ;;  %v7632_v21 = vsel %vm12983_vm3, %v7453_v55, %v7449_v15  ;;  %vm12988_vm3 = vmmov %vm12986_vm7 }
 0x591   : > { %v6756_v39 = vcombine.high %v6754_v37, %v6754_v37  ;;  %v7071_v58 = vadd.f32 %v6755_v38, %v12284_v27  ;;  %v7072_v2 = vadd.f32 %v6754_v37, %v6722_v59  ;;  %v12396_v41 = vsel %vm12982_vm0, %v7457_v25, %v7524_v32 }
 0x592   : > { %9486 = vpow2.f32 %v8891_v20  ;;  %v7572_v63 = vsel %vm12984_vm4, %v7449_v15, %v12294_v9  ;;  %7692 = vrot.lane.b32.xlu1 %v12396_v41, %s9639_s28  ;;  %v7357_v27 = vmul.f32 0.25, %v7308_v62  ;;  %v6738_v49 = vcombine.high %v12346_v12, %v12346_v12  ;;  %vm12989_vm4 = vmmov %vm12982_vm0 }
 0x593   : > { %v9475_v29 = vpop.eup %9474  ;;  %v7073_v34 = vadd.f32 %v6756_v39, %v12346_v12  ;;  %v8918_v5 = vrot.slane %v7071_v58, 9  ;;  %v8919_v35 = vrot.slane %v7072_v2, 9  ;;  %v6739_v59 = vcombine.high %v12354_v17, %v12354_v17 }
 0x594   : > { %v6499_v51 = vmul.f32 %v9475_v29, %v12208_v24  ;;  %v7633_v31 = vsel %vm12985_vm6, %v7457_v25, %v7632_v21  ;;  %v7615_v13 = vrot.slane %v7357_v27, %v9820_v6  ;;  %v7573_v12 = vsel %vm12987_vm8, %v7453_v55, %v7572_v63 }
 0x595   : > { %v8920_v9 = vrot.slane %v7073_v34, 9  ;;  %v7316_v15 = vadd.f32 %v8918_v5, %v7071_v58  ;;  %v7317_v45 = vadd.f32 %v8919_v35, %v7072_v2  ;;  %v7634_v37 = vsel %vm12986_vm7, %v12388_v36, %v7633_v31  ;;  %vm12991_vm7 = vmmov %vm12987_vm8 }
 0x596   : > { %v6757_v56 = vcombine.high %v6499_v51, %v6499_v51  ;;  %v6764_v54 = vrot.slane %v6499_v51, %v9900_v50  ;;  %v12418_v32 = vsel %vm12982_vm0, %v7615_v13, %v7634_v37  ;;  %v8917_v55 = vrot.slane %v12304_v46, 9  ;;  %vm12992_vm8 = vmmov %vm12988_vm3 }
 0x597   : > { %v9477_v38 = vpop.eup %9476  ;;  %v7318_v40 = vadd.f32 %v8920_v9, %v7073_v34  ;;  %v12415_v44 = vmul.f32 0.25, %v7316_v15  ;;  %v7366_v24 = vmul.f32 0.25, %v7317_v45  ;;  %7740 = vrot.lane.b32.xlu0 %v12418_v32, %s9640_s14  ;;  %v7363_v21 = vmul.f32 0.25, %v12343_v7 }
 0x598   : > { %v9479_v20 = vpop.eup %9478  ;;  %v6771_v1 = vrot.slane %v6757_v56, %v9900_v50  ;;  %v6772_v39 = vcombine.high %v6764_v54, %v6764_v54  ;;  %v7074_v58 = vadd.f32 %v6764_v54, %v6738_v49  ;;  %v6427_v2 = vadd.f32 1.0, %v9477_v38 }
 0x599   : > { %v9481_v62 = vpop.eup %9480  ;;  %v6500_v63 = vmul.f32 %v9479_v20, %v12245_v10  ;;  %v12428_v29 = vadd.f32 %v12132_v8, %v12276_v57  ;;  %v7574_v7 = vsel %vm12988_vm3, %v7457_v25, %v7573_v12  ;;  %v12437_v10 = vmul.f32 0.25, %v7318_v40  ;;  %vm12994_vm3 = vmmov %vm12991_vm7 }
 0x59a   : > { %v9483_v34 = vpop.eup %9482  ;;  %v6773_v5 = vcombine.high %v6771_v1, %v6771_v1  ;;  %v12431_v35 = vadd.f32 %v6772_v39, %v12354_v17  ;;  %v12433_v27 = vadd.f32 %v6771_v1, %v6739_v59  ;;  %v8921_v49 = vrot.slane %v7074_v58, 9 }
 0x59b   : > { %v9485_v51 = vpop.eup %9484  ;;  %v6774_v31 = vcombine.high %v6500_v63, %v6500_v63  ;;  %v6501_v9 = vmul.f32 %v9481_v62, %v12248_v60  ;;  %9488 = vrcp.f32 %v6427_v2  ;;  %v7481_v57 = vrot.slane %v12415_v44, %v9820_v6 }
 0x59c   : > { %v12442_v15 = vrot.slane %v7366_v24, %v9820_v6  ;;  %v12445_v17 = vrot.slane %v6500_v63, %v9900_v50  ;;  %v12448_v59 = vadd.f32 %v6773_v5, %v12363_v26  ;;  %v8922_v45 = vrot.slane %v12431_v35, 9 }
 0x59d   : > { %v8923_v60 = vrot.slane %v12433_v27, 9  ;;  %v6791_v13 = vcombine.high %v6501_v9, %v6501_v9  ;;  %v7319_v25 = vadd.f32 %v8921_v49, %v7074_v58  ;;  %v6428_v56 = vadd.f32 1.0, %v9483_v34 }
 0x59e   : > { %v6429_v54 = vadd.f32 1.0, %v9485_v51  ;;  %v7575_v37 = vsel %vm12989_vm4, %v12388_v36, %v7574_v7  ;;  %v12455_v38 = vrot.slane %v6774_v31, %v9900_v50  ;;  %v12458_v40 = vrot.slane %v6501_v9, %v9900_v50 }
 0x59f   : > { %v9487_v12 = vpop.eup %9486  ;;  %v12461_v26 = vrot.slane %v6791_v13, %v9900_v50  ;;  %7590 = vrot.lane.b32.xlu1 %v7575_v37, %s9637_s25  ;;  %v8892_v24 = vmul.f32 -1.442695, %v12428_v29  ;;  %9490 = vrcp.f32 %v6428_v56  ;;  %v12467_v1 = vadd.f32 %v12132_v8, %v12290_v47 }
 0x5a0   : > { %v6430_v20 = vadd.f32 1.0, %v9487_v12  ;;  %v12471_v36 = vadd.f32 %v12132_v8, %v12321_v28  ;;  %9492 = vrcp.f32 %v6429_v54  ;;  %v8915_v58 = vrot.slane %v12299_v11, 9 }
 0x5a1   : > { %v6807_v39 = vcombine.high %v12461_v26, %v12461_v26  ;;  %v7461_v2 = vrot.slane %v12332_v43, %v9820_v6  ;;  %v8893_v62 = vmul.f32 -1.442695, %v12467_v1  ;;  %v7469_v47 = vrot.slane %v12306_v53, %v9820_v6 }
 0x5a2   : > { %9494 = vrcp.f32 %v6430_v20  ;;  %v8894_v63 = vmul.f32 -1.442695, %v12471_v36  ;;  %v7313_v34 = vadd.f32 %v8915_v58, %v12299_v11  ;;  %v7473_v5 = vrot.slane %v12308_v61, %v9820_v6 }
 0x5a3   : > { %v7078_v28 = vadd.f32 %v6807_v39, %v12445_v17  ;;  %9496 = vpow2.f32 %v8892_v24  ;;  %7716 = vrot.lane.b32.xlu1 %v7575_v37, %s9641_s16  ;;  %vm12990_vm6 = vcmask 1041409   ;;  %v12491_v49 = vadd.f32 %v12132_v8, %v12348_v0 }
 0x5a4   : > { %9498 = vpow2.f32 %v8893_v62  ;;  %v7526_v43 = vsel %vm12990_vm6, %v12324_v3, %v7461_v2  ;;  %v7559_v53 = vrot.slane %v7363_v21, %v9820_v6  ;;  %v7362_v31 = vmul.f32 0.25, %v7313_v34  ;;  %vm12993_vm0 = vmmov %vm12990_vm6 }
 0x5a5   : > { %v8925_v51 = vrot.slane %v7078_v28, 9  ;;  %9500 = vpow2.f32 %v8894_v63  ;;  %v7527_v9 = vsel %vm12991_vm7, %v7469_v47, %v7526_v43  ;;  %v8895_v7 = vmul.f32 -1.442695, %v12491_v49  ;;  %vm12995_vm4 = vmmov %vm12993_vm0 }
 0x5a6   : > { %v7528_v11 = vsel %vm12992_vm8, %v7473_v5, %v7527_v9  ;;  %v7576_v61 = vsel %vm12993_vm0, %v7469_v47, %v12324_v3  ;;  %v7315_v13 = vadd.f32 %v8917_v55, %v12304_v46  ;;  %v7477_v0 = vrot.slane %v7362_v31, %v9820_v6  ;;  %vm12997_vm7 = vmmov %vm12992_vm8 }
 0x5a7   : > { %v7323_v56 = vadd.f32 %v8925_v51, %v7078_v28  ;;  %7650 = vrot.lane.b32.xlu1 %v12418_v32, %s9638_s19  ;;  %v7577_v21 = vsel %vm12994_vm3, %v7473_v5, %v7576_v61  ;;  %v7636_v54 = vsel %vm12995_vm4, %v7473_v5, %v7469_v47  ;;  %9502 = vpow2.f32 %v8895_v7  ;;  %vm12998_vm8 = vmmov %vm12994_vm3 }
 0x5a8   : > { %v9489_v37 = vpop.eup %9488  ;;  %v7364_v12 = vmul.f32 0.25, %v7315_v13  ;;  %v12507_v24 = vadd.f32 %v12132_v8, %v12376_v30  ;;  %v7320_v3 = vadd.f32 %v8922_v45, %v12431_v35  ;;  %v7368_v46 = vmul.f32 0.25, %v7319_v25  ;;  %vm12999_vm0 = vmmov %vm12997_vm7 }
 0x5a9   : > { %v6789_v55 = vcombine.high %v12445_v17, %v12445_v17  ;;  %v6502_v32 = vmul.f32 %v9489_v37, %v12319_v18  ;;  %vm12996_vm6 = vcmask 1044484   ;;  %v7578_v39 = vsel %vm12997_vm7, %v7477_v0, %v7577_v21 }
 0x5aa   : > { %v12514_v20 = vsel %vm12996_vm6, %v7477_v0, %v7528_v11  ;;  %v7619_v58 = vrot.slane %v7364_v12, %v9820_v6  ;;  %v7637_v8 = vsel %vm12998_vm8, %v7477_v0, %v7636_v54  ;;  %v8896_v30 = vmul.f32 -1.442695, %v12507_v24  ;;  %vm13000_vm3 = vmmov %vm12996_vm6 }
 0x5ab   : > { %7694 = vrot.lane.b32.xlu0 %v12514_v20, %s9639_s28  ;;  %v6808_v35 = vcombine.high %v6502_v32, %v6502_v32  ;;  %v6815_v45 = vrot.slane %v6502_v32, %v9900_v50  ;;  %7784 = vrot.lane.b32.xlu1 %v12514_v20, %s9642_s17  ;;  %v7638_v18 = vsel %vm12999_vm0, %v7559_v53, %v7637_v8  ;;  %v7369_v17 = vmul.f32 0.25, %v7320_v3  ;;  %vm13001_vm4 = vmmov %vm13000_vm3 }
 0x5ac   : > { %v6790_v25 = vcombine.high %v12455_v38, %v12455_v38  ;;  %v6806_v2 = vcombine.high %v12458_v40, %v12458_v40  ;;  %v12530_v62 = vmul.f32 0.25, %v7323_v56  ;;  %9504 = vpow2.f32 %v8896_v30  ;;  %v9491_v63 = vpop.eup %9490 }
 0x5ad   : > { %v6822_v47 = vrot.slane %v6808_v35, %v9900_v50  ;;  %v6823_v28 = vcombine.high %v6815_v45, %v6815_v45  ;;  %v7079_v34 = vadd.f32 %v6815_v45, %v6789_v55  ;;  %v7579_v5 = vsel %vm13000_vm3, %v7559_v53, %v7578_v39  ;;  %v9493_v43 = vpop.eup %9492 }
 0x5ae   : > { %v6503_v51 = vmul.f32 %v9491_v63, %v12330_v52  ;;  %v12537_v31 = vsel %vm13001_vm4, %v7619_v58, %v7638_v18  ;;  %v12541_v9 = vrot.slane %v12437_v10, %v9820_v6  ;;  %v12544_v11 = vrot.slane %v7368_v46, %v9820_v6  ;;  %vm13005_vm4 = vmmov %vm12998_vm8 }
 0x5af   : > { %7592 = vrot.lane.b32.xlu0 %v7579_v5, %s9637_s25  ;;  %v9495_v7 = vpop.eup %9494  ;;  %v7080_v61 = vadd.f32 %v6823_v28, %v12455_v38  ;;  %v7081_v13 = vadd.f32 %v6822_v47, %v6790_v25  ;;  %v8926_v53 = vrot.slane %v7079_v34, 9  ;;  %7832 = vrot.lane.b32.xlu1 %v12537_v31, %s9643_s20  ;;  %v12550_v52 = vrot.slane %v7369_v17, %v9820_v6 }
 0x5b0   : > { %v9497_v56 = vpop.eup %9496  ;;  %v6824_v0 = vcombine.high %v6822_v47, %v6822_v47  ;;  %v6825_v21 = vcombine.high %v6503_v51, %v6503_v51  ;;  %v6832_v10 = vrot.slane %v6503_v51, %v9900_v50  ;;  %v6504_v54 = vmul.f32 %v9493_v43, %v12341_v19 }
 0x5b1   : > { %v9499_v37 = vpop.eup %9498  ;;  %v8927_v12 = vrot.slane %v7080_v61, 9  ;;  %v8928_v3 = vrot.slane %v7081_v13, 9  ;;  %v7324_v46 = vadd.f32 %v8926_v53, %v7079_v34  ;;  %v6505_v38 = vmul.f32 %v9495_v7, %v12374_v48 }
 0x5b2   : > { %v9501_v55 = vpop.eup %9500  ;;  %v6839_v32 = vrot.slane %v6825_v21, %v9900_v50  ;;  %v6840_v39 = vcombine.high %v6832_v10, %v6832_v10  ;;  %v7083_v58 = vadd.f32 %v6832_v10, %v6806_v2  ;;  %v6842_v8 = vcombine.high %v6504_v54, %v6504_v54 }
 0x5b3   : > { %7718 = vrot.lane.b32.xlu0 %v7579_v5, %s9641_s16  ;;  %v7325_v30 = vadd.f32 %v8927_v12, %v7080_v61  ;;  %v7326_v35 = vadd.f32 %v8928_v3, %v7081_v13  ;;  %v7373_v45 = vmul.f32 0.25, %v7324_v46  ;;  %vm13002_vm6 = vcmask 1041409  }
 0x5b4   : > { %v7530_v19 = vsel %vm13002_vm6, %v12442_v15, %v7481_v57  ;;  %v7082_v18 = vadd.f32 %v6824_v0, %v12458_v40  ;;  %v12564_v48 = vadd.f32 %v6840_v39, %v12461_v26  ;;  %v7321_v17 = vadd.f32 %v8923_v60, %v12433_v27  ;;  %vm13003_vm7 = vmmov %vm13002_vm6  ;;  %v9503_v2 = vpop.eup %9502 }
 0x5b5   : > { %v7580_v25 = vsel %vm13003_vm7, %v12541_v9, %v12442_v15  ;;  %v6841_v63 = vcombine.high %v6839_v32, %v6839_v32  ;;  %v8930_v47 = vrot.slane %v7083_v58, 9  ;;  %v12573_v44 = vrot.slane %v6504_v54, %v9900_v50  ;;  %vm13006_vm6 = vmmov %vm12999_vm0 }
 0x5b6   : > { %v12576_v57 = vrot.slane %v6842_v8, %v9900_v50  ;;  %v7374_v40 = vmul.f32 0.25, %v7325_v30  ;;  %v7375_v26 = vmul.f32 0.25, %v7326_v35  ;;  %v12579_v28 = vrot.slane %v7373_v45, %v9820_v6  ;;  %vm13007_vm7 = vmmov %vm13000_vm3 }
 0x5b7   : > { %v6859_v34 = vcombine.high %v6505_v38, %v6505_v38  ;;  %7808 = vrot.lane.b32.xlu0 %v7579_v5, %s13004_s23  ;;  %v12583_v27 = vrot.slane %v6505_v38, %v9900_v50  ;;  %v6431_v15 = vadd.f32 1.0, %v9497_v56  ;;  %v6432_v60 = vadd.f32 1.0, %v9499_v37 }
 0x5b8   : > { %v6433_v43 = vadd.f32 1.0, %v9501_v55  ;;  %v8931_v51 = vrot.slane %v12564_v48, 9  ;;  %v6434_v61 = vadd.f32 1.0, %v9503_v2  ;;  %v7531_v13 = vsel %vm12998_vm8, %v12541_v9, %v7530_v19 }
 0x5b9   : > { %v6873_v7 = vrot.slane %v6859_v34, %v9900_v50  ;;  %v9505_v53 = vpop.eup %9504  ;;  %v6874_v0 = vcombine.high %v12583_v27, %v12583_v27  ;;  %9506 = vrcp.f32 %v6431_v15  ;;  %v7532_v5 = vsel %vm12999_vm0, %v12544_v11, %v7531_v13  ;;  %vm13009_vm0 = vmmov %vm13005_vm4 }
 0x5ba   : > { %v7370_v21 = vmul.f32 0.25, %v7321_v17  ;;  %9508 = vrcp.f32 %v6432_v60  ;;  %v6435_v54 = vadd.f32 1.0, %v9505_v53  ;;  %v12597_v12 = vsel %vm13000_vm3, %v12550_v52, %v7532_v5  ;;  %vm13010_vm3 = vmmov %vm13006_vm6 }
 0x5bb   : > { %v6875_v56 = vcombine.high %v6873_v7, %v6873_v7  ;;  %v7086_v10 = vadd.f32 %v6873_v7, %v6841_v63  ;;  %7652 = vrot.lane.b32.xlu0 %v12537_v31, %s9638_s19  ;;  %v7085_v37 = vadd.f32 %v6874_v0, %v6839_v32  ;;  %9510 = vrcp.f32 %v6433_v43  ;;  %7786 = vrot.lane.b32.xlu1 %v12597_v12, %s9642_s17 }
 0x5bc   : > { %v7563_v3 = vrot.slane %v7370_v21, %v9820_v6  ;;  %9512 = vrcp.f32 %v6434_v61  ;;  %v7581_v55 = vsel %vm13005_vm4, %v12544_v11, %v7580_v25  ;;  %v7328_v39 = vadd.f32 %v8930_v47, %v7083_v58 }
 0x5bd   : > { %v7087_v46 = vadd.f32 %v6875_v56, %v12573_v44  ;;  %v8933_v38 = vrot.slane %v7086_v10, 9  ;;  %v8932_v8 = vrot.slane %v7085_v37, 9  ;;  %v7582_v32 = vsel %vm13006_vm6, %v12550_v52, %v7581_v55  ;;  %vm13012_vm6 = vmmov %vm13009_vm0 }
 0x5be   : > { %v8924_v30 = vrot.slane %v12448_v59, 9  ;;  %v7583_v19 = vsel %vm13007_vm7, %v7563_v3, %v7582_v32  ;;  %vm13008_vm8 = vcmask 1041409   ;;  %v8929_v63 = vrot.slane %v7082_v18, 9 }
 0x5bf   : > { %v8934_v35 = vrot.slane %v7087_v46, 9  ;;  %v7331_v45 = vadd.f32 %v8933_v38, %v7086_v10  ;;  %7742 = vrot.lane.b32.xlu0 %v12537_v31, %s9640_s14  ;;  %v7640_v17 = vsel %vm13008_vm8, %v12544_v11, %v12541_v9  ;;  %v7330_v2 = vadd.f32 %v8932_v8, %v7085_v37  ;;  %7594 = vrot.lane.b32.xlu1 %v7583_v19, %s9637_s25  ;;  %vm13011_vm4 = vmmov %vm13008_vm8 }
 0x5c0   : > { %v7322_v58 = vadd.f32 %v8924_v30, %v12448_v59  ;;  %v7641_v25 = vsel %vm13009_vm0, %v12550_v52, %v7640_v17  ;;  %9514 = vrcp.f32 %v6435_v54  ;;  %v7501_v15 = vrot.slane %v12530_v62, %v9820_v6  ;;  %vm13013_vm7 = vmmov %vm13011_vm4 }
 0x5c1   : > { %v7332_v47 = vadd.f32 %v8934_v35, %v7087_v46  ;;  %v7380_v34 = vmul.f32 0.25, %v7331_v45  ;;  %v7379_v31 = vmul.f32 0.25, %v7330_v2  ;;  %v7327_v43 = vadd.f32 %v8929_v63, %v7082_v18  ;;  %vm13014_vm8 = vmmov %vm13010_vm3 }
 0x5c2   : > { %v7371_v60 = vmul.f32 0.25, %v7322_v58  ;;  %v7509_v9 = vrot.slane %v7374_v40, %v9820_v6  ;;  %v7377_v11 = vmul.f32 0.25, %v7328_v39  ;;  %v7642_v59 = vsel %vm13010_vm3, %v7563_v3, %v7641_v25  ;;  %vm13015_vm3 = vmmov %vm13011_vm4 }
 0x5c3   : > { %7696 = vrot.lane.b32.xlu0 %v12597_v12, %s9639_s28  ;;  %v7513_v52 = vrot.slane %v7375_v26, %v9820_v6  ;;  %v7534_v7 = vsel %vm13011_vm4, %v12579_v28, %v7501_v15  ;;  %v7381_v61 = vmul.f32 0.25, %v7332_v47  ;;  %v7376_v62 = vmul.f32 0.25, %v7327_v43  ;;  %7720 = vrot.lane.b32.xlu1 %v7583_v19, %s9641_s16 }
 0x5c4   : > { %v7623_v13 = vrot.slane %v7371_v60, %v9820_v6  ;;  %v7535_v53 = vsel %vm13012_vm6, %v7509_v9, %v7534_v7  ;;  %v7671_v18 = vrot.slane %v7379_v31, %v9820_v6  ;;  %v12631_v40 = vrot.slane %v7380_v34, %v9820_v6  ;;  %vm13017_vm6 = vmmov %vm13014_vm8 }
 0x5c5   : > { %v7584_v0 = vsel %vm13013_vm7, %v7509_v9, %v12579_v28  ;;  %v7329_v26 = vadd.f32 %v8931_v51, %v12564_v48  ;;  %v7517_v5 = vrot.slane %v7376_v62, %v9820_v6  ;;  %v7536_v21 = vsel %vm13014_vm8, %v7513_v52, %v7535_v53  ;;  %vm13019_vm8 = vmmov %vm13015_vm3 }
 0x5c6   : > { %v7585_v56 = vsel %vm13009_vm0, %v7513_v52, %v7584_v0  ;;  %v9507_v10 = vpop.eup %9506  ;;  %v6857_v54 = vcombine.high %v12573_v44, %v12573_v44  ;;  %v6858_v37 = vcombine.high %v12576_v57, %v12576_v57  ;;  %v7567_v3 = vrot.slane %v7377_v11, %v9820_v6 }
 0x5c7   : > { %7810 = vrot.lane.b32.xlu0 %v7583_v19, %s13004_s23  ;;  %v7644_v28 = vsel %vm13015_vm3, %v7513_v52, %v7509_v9  ;;  %v9509_v48 = vpop.eup %9508  ;;  %v6506_v51 = vmul.f32 %v9507_v10, %v12428_v29  ;;  %vm13016_vm4 = vcmask 1044484   ;;  %v7586_v38 = vsel %vm13017_vm6, %v7517_v5, %v7585_v56 }
 0x5c8   : > { %v7643_v46 = vsel %vm13016_vm4, %v7623_v13, %v7642_v59  ;;  %v12650_v55 = vmul.f32 0.25, %v7329_v26  ;;  %v9511_v39 = vpop.eup %9510  ;;  %v6507_v44 = vmul.f32 %v9509_v48, %v12467_v1  ;;  %vm13018_vm7 = vmmov %vm13016_vm4  ;;  %v12658_v32 = vrot.slane %v7381_v61, %v9820_v6 }
 0x5c9   : > { %7654 = vrot.lane.b32.xlu1 %v7643_v46, %s9638_s19  ;;  %v12655_v8 = vsel %vm13018_vm7, %v7517_v5, %v7536_v21  ;;  %v7688_v29 = vsel %vm13019_vm8, %v12631_v40, %v7671_v18  ;;  %v9513_v30 = vpop.eup %9512  ;;  %v6876_v35 = vcombine.high %v6506_v51, %v6506_v51  ;;  %v6883_v45 = vrot.slane %v6506_v51, %v9900_v50  ;;  %vm13020_vm3 = vmmov %vm13016_vm4 }
 0x5ca   : > { %v6508_v19 = vmul.f32 %v9511_v39, %v12471_v36  ;;  %v7645_v17 = vsel %vm13009_vm0, %v7517_v5, %v7644_v28  ;;  %v6893_v1 = vcombine.high %v6507_v44, %v6507_v44  ;;  %v6900_v2 = vrot.slane %v6507_v44, %v9900_v50  ;;  %vm13021_vm4 = vmmov %vm13017_vm6 }
 0x5cb   : > { %v6509_v58 = vmul.f32 %v9513_v30, %v12491_v49  ;;  %7744 = vrot.lane.b32.xlu0 %v7643_v46, %s9640_s14  ;;  %v7587_v25 = vsel %vm13020_vm3, %v7567_v3, %v7586_v38  ;;  %v6890_v63 = vrot.slane %v6876_v35, %v9900_v50  ;;  %v6891_v47 = vcombine.high %v6883_v45, %v6883_v45  ;;  %vm13022_vm6 = vmmov %vm13009_vm0 }
 0x5cc   : > { %v7088_v34 = vadd.f32 %v6883_v45, %v6857_v54  ;;  %v6910_v15 = vcombine.high %v6508_v19, %v6508_v19  ;;  %v6907_v31 = vrot.slane %v6893_v1, %v9900_v50  ;;  %v7627_v36 = vrot.slane %v12650_v55, %v9820_v6  ;;  %vm13023_vm7 = vmmov %vm13020_vm3 }
 0x5cd   : > { %v6927_v60 = vcombine.high %v6509_v58, %v6509_v58  ;;  %7834 = vrot.lane.b32.xlu1 %v7643_v46, %s9643_s20  ;;  %v7646_v43 = vsel %vm13021_vm4, %v7567_v3, %v7645_v17  ;;  %v9515_v49 = vpop.eup %9514  ;;  %v7089_v9 = vadd.f32 %v6891_v47, %v12576_v57  ;;  %v7090_v11 = vadd.f32 %v6890_v63, %v6858_v37  ;;  %vm13024_vm8 = vmmov %vm13021_vm4 }
 0x5ce   : > { %v8935_v59 = vrot.slane %v7088_v34, 9  ;;  %v7689_v52 = vsel %vm13022_vm6, %v12658_v32, %v7688_v29  ;;  %v6908_v7 = vcombine.high %v6900_v2, %v6900_v2  ;;  %v6917_v61 = vrot.slane %v6508_v19, %v9900_v50  ;;  %vm13026_vm4 = vmmov %vm13022_vm6 }
 0x5cf   : > { %v6924_v13 = vrot.slane %v6910_v15, %v9900_v50  ;;  %v6934_v62 = vrot.slane %v6509_v58, %v9900_v50  ;;  %7698 = vrot.lane.b32.xlu0 %v12655_v8, %s9639_s28  ;;  %v6892_v53 = vcombine.high %v6890_v63, %v6890_v63  ;;  %v8936_v18 = vrot.slane %v7089_v9, 9 }
 0x5d0   : > { %v7333_v0 = vadd.f32 %v8935_v59, %v7088_v34  ;;  %v6909_v26 = vcombine.high %v6907_v31, %v6907_v31  ;;  %v6941_v5 = vrot.slane %v6927_v60, %v9900_v50  ;;  %v8937_v10 = vrot.slane %v7090_v11, 9 }
 0x5d1   : > { %v6926_v57 = vcombine.high %v6924_v13, %v6924_v13  ;;  %v6942_v21 = vcombine.high %v6934_v62, %v6934_v62  ;;  %v7093_v56 = vadd.f32 %v6934_v62, %v6908_v7  ;;  %7788 = vrot.lane.b32.xlu1 %v12655_v8, %s9642_s17  ;;  %v6510_v37 = vmul.f32 %v9515_v49, %v12507_v24 }
 0x5d2   : > { %v7382_v54 = vmul.f32 0.25, %v7333_v0  ;;  %v7334_v3 = vadd.f32 %v8936_v18, %v7089_v9  ;;  %v6943_v48 = vcombine.high %v6941_v5, %v6941_v5  ;;  %v7095_v46 = vadd.f32 %v6941_v5, %v6909_v26 }
 0x5d3   : > { %v7092_v28 = vadd.f32 %v6926_v57, %v6900_v2  ;;  %v7094_v51 = vadd.f32 %v6942_v21, %v6907_v31  ;;  %7812 = vrot.lane.b32.xlu0 %v7587_v25, %s13004_s23  ;;  %v6925_v38 = vcombine.high %v6917_v61, %v6917_v61  ;;  %v8940_v55 = vrot.slane %v7093_v56, 9 }
 0x5d4   : > { %v6950_v39 = vrot.slane %v6510_v37, %v9900_v50  ;;  %v7383_v44 = vmul.f32 0.25, %v7334_v3  ;;  %v8942_v35 = vrot.slane %v7095_v46, 9  ;;  %v7683_v45 = vrot.slane %v7382_v54, %v9820_v6 }
 0x5d5   : > { %v8939_v29 = vrot.slane %v7092_v28, 9  ;;  %v8941_v30 = vrot.slane %v7094_v51, 9  ;;  %7596 = vrot.lane.b32.xlu1 %v7587_v25, %s9637_s25  ;;  %v7338_v24 = vadd.f32 %v8940_v55, %v7093_v56  ;;  %v7647_v17 = vsel %vm13023_vm7, %v7627_v36, %v7646_v43  ;;  %vm13028_vm7 = vmmov %vm13024_vm8 }
 0x5d6   : > { %v6951_v19 = vcombine.high %v6950_v39, %v6950_v39  ;;  %v7335_v1 = vadd.f32 %v8937_v10, %v7090_v11  ;;  %v7096_v58 = vadd.f32 %v6943_v48, %v6917_v61  ;;  %v7097_v47 = vadd.f32 %v6950_v39, %v6925_v38 }
 0x5d7   : > { %v7337_v2 = vadd.f32 %v8939_v29, %v7092_v28  ;;  %v7339_v63 = vadd.f32 %v8941_v30, %v7094_v51  ;;  %7656 = vrot.lane.b32.xlu0 %v7647_v17, %s9638_s19  ;;  %v7387_v50 = vmul.f32 0.25, %v7338_v24  ;;  %v7687_v34 = vrot.slane %v7383_v44, %v9820_v6 }
 0x5d8   : > { %v7091_v15 = vadd.f32 %v6892_v53, %v12583_v27  ;;  %v7340_v60 = vadd.f32 %v8942_v35, %v7095_v46  ;;  %v7690_v49 = vsel %vm13024_vm8, %v7683_v45, %v7689_v52  ;;  %v7098_v36 = vadd.f32 %v6951_v19, %v6924_v13 }
 0x5d9   : > { %v7386_v31 = vmul.f32 0.25, %v7337_v2  ;;  %7722 = vrot.lane.b32.xlu1 %v7587_v25, %s9641_s16  ;;  %v7388_v9 = vmul.f32 0.25, %v7339_v63  ;;  %v7384_v43 = vmul.f32 0.25, %v7335_v1  ;;  %vm13025_vm0 = vcmask 1041409  }
 0x5da   : > { %v7712_v11 = vsel %vm13025_vm0, %v12658_v32, %v12631_v40  ;;  %v7767_v59 = vrot.slane %v7387_v50, %v9820_v6  ;;  %v8944_v7 = vrot.slane %v7097_v47, 9  ;;  %v8943_v61 = vrot.slane %v7096_v58, 9  ;;  %vm13027_vm6 = vmmov %vm13025_vm0 }
 0x5db   : > { %7746 = vrot.lane.b32.xlu0 %v7647_v17, %s9640_s14  ;;  %v7763_v27 = vrot.slane %v7386_v31, %v9820_v6  ;;  %v7691_v62 = vsel %vm13020_vm3, %v7687_v34, %v7690_v49  ;;  %v7713_v25 = vsel %vm13026_vm4, %v7683_v45, %v7712_v11  ;;  %v7389_v52 = vmul.f32 0.25, %v7340_v60  ;;  %vm13029_vm8 = vmmov %vm13025_vm0 }
 0x5dc   : > { %v7341_v13 = vadd.f32 %v8943_v61, %v7096_v58  ;;  %v8938_v53 = vrot.slane %v7091_v15, 9  ;;  %v8945_v18 = vrot.slane %v7098_v36, 9  ;;  %v7711_v40 = vrot.slane %v7384_v43, %v9820_v6  ;;  %vm13030_vm0 = vmmov %vm13026_vm4 }
 0x5dd   : > { %7700 = vrot.lane.b32.xlu1 %v7691_v62, %s9639_s28  ;;  %v7771_v0 = vrot.slane %v7388_v9, %v9820_v6  ;;  %v7736_v26 = vsel %vm13027_vm6, %v7683_v45, %v12658_v32  ;;  %v7342_v57 = vadd.f32 %v8944_v7, %v7097_v47  ;;  %v7714_v5 = vsel %vm13028_vm7, %v7687_v34, %v7713_v25  ;;  %vm13031_vm4 = vmmov %vm13030_vm0  ;;  %s9646_s28 = smov [#allocation5]  }
 0x5de   : > { %v7780_v21 = vsel %vm13029_vm8, %v7767_v59, %v7763_v27  ;;  %v7336_v56 = vadd.f32 %v8938_v53, %v7091_v15  ;;  %v7390_v10 = vmul.f32 0.25, %v7341_v13  ;;  %v7737_v54 = vsel %vm13030_vm0, %v7687_v34, %v7736_v26  ;;  %vm13032_vm6 = vmmov %vm13028_vm7 }
 0x5df   : > { %7836 = vrot.lane.b32.xlu0 %v7647_v17, %s9643_s20  ;;  %v7775_v37 = vrot.slane %v7389_v52, %v9820_v6  ;;  %v7715_v28 = vsel %vm13020_vm3, %v7711_v40, %v7714_v5  ;;  %v7781_v32 = vsel %vm13031_vm4, %v7771_v0, %v7780_v21  ;;  %v7343_v48 = vadd.f32 %v8945_v18, %v7098_v36  ;;  %vm13033_vm7 = vmmov %vm13029_vm8 }
 0x5e0   : > { %v7385_v3 = vmul.f32 0.25, %v7336_v56  ;;  %v7391_v51 = vmul.f32 0.25, %v7342_v57  ;;  %v7738_v38 = vsel %vm13032_vm6, %v7711_v40, %v7737_v54  ;;  %v7804_v55 = vsel %vm13033_vm7, %v7771_v0, %v7767_v59  ;;  %vm13034_vm8 = vmmov %vm13032_vm6 }
 0x5e1   : > { %7790 = vrot.lane.b32.xlu1 %v7691_v62, %s9642_s17  ;;  %v7779_v39 = vrot.slane %v7390_v10, %v9820_v6  ;;  %v7782_v44 = vsel %vm13034_vm8, %v7775_v37, %v7781_v32  ;;  %vm13035_vm0 = vmmov %vm13033_vm7  ;;  %v7805_v35 = vsel %vm13031_vm4, %v7775_v37, %v7804_v55  ;;  %v7392_v45 = vmul.f32 0.25, %v7343_v48 }
 0x5e2   : > { %v7735_v46 = vrot.slane %v7385_v3, %v9820_v6  ;;  %v7828_v29 = vsel %vm13035_vm0, %v7775_v37, %v7771_v0  ;;  %v7803_v24 = vrot.slane %v7391_v51, %v9820_v6  ;;  %vm13036_vm6 = vmmov %vm13020_vm3  ;;  %v8897_v34 = vrot.slane %v12178_v16, 9 }
 0x5e3   : > { %7724 = vrot.lane.b32.xlu0 %v7715_v28, %s9641_s16  ;;  %v7783_v19 = vsel %vm13036_vm6, %v7779_v39, %v7782_v44  ;;  %vm13037_vm7 = vmmov %vm13031_vm4  ;;  %v7827_v2 = vrot.slane %v7392_v45, %v9820_v6 }
 0x5e4   : > { %v7739_v30 = vsel %vm13020_vm3, %v7735_v46, %v7738_v38  ;;  %v7829_v17 = vsel %vm13037_vm7, %v7779_v39, %v7828_v29  ;;  %vm13038_vm2 = vmmov %vm13034_vm8  ;;  %v7295_v31 = vadd.f32 %v8897_v34, %v12178_v16 }
 0x5e5   : > { %7814 = vrot.lane.b32.xlu1 %v7715_v28, %s13004_s23  ;;  %v7806_v1 = vsel %vm13038_vm2, %v7779_v39, %v7805_v35  ;;  %vm13039_vm8 = vmmov %vm13038_vm2  ;;  %vm13042_vm2 = vcmask 1041409  }
 0x5e6   : > { %v7830_v58 = vsel %vm13039_vm8, %v7803_v24, %v7829_v17  ;;  %vm13040_vm0 = vmmov %vm13020_vm3  ;;  %v7344_v60 = vmul.f32 0.25, %v7295_v31 }
 0x5e7   : > { %7748 = vrot.lane.b32.xlu0 %v7739_v30, %s9640_s14  ;;  %v7807_v63 = vsel %vm13040_vm0, %v7803_v24, %v7806_v1  ;;  %vm13041_vm3 = vmmov %vm13040_vm0  ;;  %s9569_s14 = sshll.u32 %s9646_s28, 4  ;;  %s9570_s14 = int_to_ptr.vmem [resolvable:$false] %s9569_s14 }
 0x5e8   : > { %v7831_v47 = vsel %vm13041_vm3, %v7827_v2, %v7830_v58  ;;  %v7421_v36 = vrot.slane %v7344_v60, %v9820_v6  ;;  %vm13043_vm6 = vmmov %vm13039_vm8  ;;  %vm13045_vm8 = vcmask 293888   ;;  %s9571_s16 = scalar_lea.vmem %s9570_s14, 128 }
 0x5e9   : > { %7792 = vrot.lane.b32.xlu1 %v7783_v19, %s9642_s17  ;;  %vm13044_vm7 = vmmov %vm13040_vm0  ;;  %s8644_s17 = sshll.u32 %s12125_s29, 4  ;;  %s12877_s17 = int_to_ptr.vmem [resolvable:$true] %s8644_s17 }
 0x5ea   : > { %v7518_v59 = vsel %vm13042_vm2, %v12218_v23, %v7421_v36  ;;  %s9565_s19 = scalar_lea.vmem %s12877_s17, 64  ;;  %p9572_p5 = scmp.lt.s32.totalorder %s12877_s17, %s9570_s14 }
 0x5eb   : > { %7838 = vrot.lane.b32.xlu0 %v7739_v30, %s9643_s20  ;;  %v7519_v7 = vsel %vm13031_vm4, %v12224_v22, %v7518_v59  ;;  %p9566_p11 = scmp.ne.s32.totalorder %s12877_s17, %s9565_s19  ;;  %p9573_p7 = scmp.lt.s32.totalorder %s9571_s16, %s9565_s19 }
 0x5ec   : > { %v7520_v62 = vsel %vm13043_vm6, %v12254_v42, %v7519_v7 }
 0x5ed   : > { %7816 = vrot.lane.b32.xlu1 %v7807_v63, %s13004_s23  ;;  %v7521_v16 = vsel %vm13044_vm7, %v12264_v33, %v7520_v62  ;;  %s12885_s23 = scalar_lea.hbm %s12941_s9, %s8966_s18  ;;  %p9567_p13 = pnand %p9566_p11, %p13050_p12 }
 0x5ee   : > { %p9574_p8 = por %p9573_p7, %p9572_p5 }
 0x5ef   : > { %7840 = vrot.lane.b32.xlu0 %v7831_v47, %s9643_s20  ;;  %p9568_p4 = pneg %p9567_p13 }
 0x5f1   : > { %p9575_p10 = pnand %p9574_p8, %p9568_p4 }
 0x5f5   : > { %v7589_v9 = vpop.permute.xlu0 %7588 }
 0x5f6   : > { %v7847_v52 = vsel %vm904_vm5, %v7521_v16, %v7589_v9 }
 0x5fe   : > { %v7649_v50 = vpop.permute.xlu1 %7648 }
 0x5ff   : > { %v7852_v53 = vsel %vm1020_vm9, %v7847_v52, %v7649_v50 }
 0x604   : > { %v7693_v15 = vpop.permute.xlu1 %7692 }
 0x605   : > { %v7857_v23 = vsel %vm3731_vm15, %v7852_v53, %v7693_v15 }
 0x609   : > { %v7741_v43 = vpop.permute.xlu0 %7740 }
 0x611   : > { %v7591_v49 = vpop.permute.xlu1 %7590 }
 0x612   : > { %v7848_v56 = vsel %vm904_vm5, %v12396_v41, %v7591_v49 }
 0x615   : > { %v7717_v11 = vpop.permute.xlu1 %7716 }
 0x616   : > { %v7862_v18 = vsel %vm3737_vm14, %v7857_v23, %v7717_v11 }
 0x617   : > { %v7867_v0 = vsel %vm3743_vm13, %v7862_v18, %v7741_v43 }
 0x619   : > { %v7651_v27 = vpop.permute.xlu1 %7650 }
 0x61a   : > { %v7853_v54 = vsel %vm1020_vm9, %v7848_v56, %v7651_v27 }
 0x61d   : > { %v7695_v61 = vpop.permute.xlu0 %7694  ;;  %v7785_v6 = vpop.permute.xlu1 %7784 }
 0x61e   : > { %v7872_v42 = vsel %vm3749_vm12, %v7867_v0, %v7785_v6  ;;  %v7858_v28 = vsel %vm3731_vm15, %v7853_v54, %v7695_v61 }
 0x621   : > { %v7593_v25 = vpop.permute.xlu0 %7592  ;;  %v7833_v40 = vpop.permute.xlu1 %7832 }
 0x622   : > { %v7849_v43 = vsel %vm904_vm5, %v12514_v20, %v7593_v25 }
 0x625   : > { %v7719_v13 = vpop.permute.xlu0 %7718 }
 0x626   : > { %v7863_v48 = vsel %vm3737_vm14, %v7858_v28, %v7719_v13 }
 0x629   : > { %v7809_v22 = vpop.permute.xlu0 %7808 }
 0x62a   : > { %v7877_v57 = vsel %vm3755_vm11, %v7872_v42, %v7809_v22 }
 0x62b   : > { %v7882_v5 = vsel %vm3761_vm10, %v7877_v57, %v7833_v40 }
 0x62c   : > { %v7899_v37 = vrot.slane %v7882_v5, %v11078_v4  ;;  %v7892_v55 = vcombine.high %v7882_v5, %v7882_v5 }
 0x62d   : > { %v7653_v26 = vpop.permute.xlu0 %7652  ;;  %v7787_v33 = vpop.permute.xlu1 %7786 }
 0x62e   : > { %v7907_v51 = vcombine.high %v7899_v37, %v7899_v37  ;;  %v7914_v35 = vrot.slane %v7899_v37, %v11078_v4  ;;  %v7906_v45 = vrot.slane %v7892_v55, %v11078_v4  ;;  %v7854_v7 = vsel %vm1020_vm9, %v7849_v43, %v7653_v26 }
 0x630   : > { %v7928_v44 = vrot.slane %v7907_v51, %v11078_v4  ;;  %v7921_v63 = vrot.slane %v7906_v45, %v11078_v4 }
 0x631   : > { %v7743_v21 = vpop.permute.xlu0 %7742  ;;  %v7595_v10 = vpop.permute.xlu1 %7594 }
 0x632   : > { %v7868_v46 = vsel %vm3743_vm13, %v7863_v48, %v7743_v21  ;;  %v8087_v19 = vcombine.low %v7914_v35, %v7928_v44  ;;  %v8946_v1 = vcombine.high %v7914_v35, %v7928_v44  ;;  %v7850_v21 = vsel %vm904_vm5, %v12597_v12, %v7595_v10 }
 0x633   : > { %v7873_v41 = vsel %vm3749_vm12, %v7868_v46, %v7787_v33 }
 0x634   : > { %v8097_v15 = vrot.slane %v8087_v19, %v11078_v4  ;;  %v8104_v31 = vrot.slane %v8946_v1, %v11078_v4 }
 0x635   : > { %v7697_v3 = vpop.permute.xlu0 %7696  ;;  %v7721_v32 = vpop.permute.xlu1 %7720 }
 0x636   : > { %v7859_v61 = vsel %vm3731_vm15, %v7854_v7, %v7697_v3  ;;  %v8119_v52 = vcombine.low %v8097_v15, %v8104_v31 }
 0x637   : > { %v7864_v53 = vsel %vm3737_vm14, %v7859_v61, %v7721_v32 }
 0x638   : > { %v8127_v20 = vrot.slane %v8119_v52, %v11078_v4 }
 0x639   : > { %v7811_v38 = vpop.permute.xlu0 %7810 }
 0x63a   : > { %v7878_v29 = vsel %vm3755_vm11, %v7873_v41, %v7811_v38 }
 0x63b   : > { %v7655_v39 = vpop.permute.xlu1 %7654 }
 0x63c   : > { %v7855_v28 = vsel %vm1020_vm9, %v7850_v21, %v7655_v39 }
 0x63d   : > { %v7745_v30 = vpop.permute.xlu0 %7744 }
 0x63e   : > { %v7869_v23 = vsel %vm3743_vm13, %v7864_v53, %v7745_v30 }
 0x63f   : > { %v7835_v24 = vpop.permute.xlu1 %7834 }
 0x640   : > { %v7883_v17 = vsel %vm3761_vm10, %v7878_v29, %v7835_v24 }
 0x641   : > { %v7938_v2 = vrot.slane %v7883_v17, %v11078_v4  ;;  %v7699_v58 = vpop.permute.xlu0 %7698  ;;  %v7931_v56 = vcombine.high %v7883_v17, %v7883_v17 }
 0x642   : > { %v7860_v48 = vsel %vm3731_vm15, %v7855_v28, %v7699_v58 }
 0x643   : > { %v7946_v47 = vcombine.high %v7938_v2, %v7938_v2  ;;  %v7953_v50 = vrot.slane %v7938_v2, %v11078_v4  ;;  %v7789_v34 = vpop.permute.xlu1 %7788  ;;  %v7945_v12 = vrot.slane %v7931_v56, %v11078_v4 }
 0x644   : > { %v7874_v0 = vsel %vm3749_vm12, %v7869_v23, %v7789_v34 }
 0x645   : > { %v7967_v60 = vrot.slane %v7946_v47, %v11078_v4  ;;  %v7968_v49 = vcombine.high %v7953_v50, %v7953_v50  ;;  %v8089_v9 = vcombine.low %v7921_v63, %v7953_v50  ;;  %v7813_v36 = vpop.permute.xlu0 %7812  ;;  %v7960_v17 = vrot.slane %v7945_v12, %v11078_v4 }
 0x646   : > { %v7879_v42 = vsel %vm3755_vm11, %v7874_v0, %v7813_v36 }
 0x647   : > { %v8090_v11 = vcombine.low %v7967_v60, %v7968_v49  ;;  %v7597_v59 = vpop.permute.xlu1 %7596  ;;  %v8111_v27 = vrot.slane %v8089_v9, %v11078_v4  ;;  %v7969_v29 = vcombine.high %v7967_v60, %v7967_v60 }
 0x648   : > { %v7851_v54 = vsel %vm904_vm5, %v12655_v8, %v7597_v59 }
 0x649   : > { %v8118_v62 = vrot.slane %v8090_v11, %v11078_v4  ;;  %v7657_v16 = vpop.permute.xlu0 %7656  ;;  %v8136_v47 = vcombine.low %v7969_v29, %v7960_v17 }
 0x64a   : > { %v7856_v32 = vsel %vm1020_vm9, %v7851_v54, %v7657_v16 }
 0x64b   : > { %v8120_v6 = vcombine.low %v8111_v27, %v8118_v62  ;;  %v7723_v13 = vpop.permute.xlu1 %7722  ;;  %v8146_v61 = vrot.slane %v8136_v47, %v11078_v4 }
 0x64c   : > { %v7865_v46 = vsel %vm3737_vm14, %v7860_v48, %v7723_v13 }
 0x64d   : > { %v8134_v25 = vrot.slane %v8120_v6, %v11078_v4  ;;  %v7747_v18 = vpop.permute.xlu0 %7746 }
 0x64e   : > { %v7870_v8 = vsel %vm3743_vm13, %v7865_v46, %v7747_v18 }
 0x64f   : > { %v7701_v22 = vpop.permute.xlu1 %7700  ;;  %v8135_v40 = vcombine.low %v8127_v20, %v8134_v25 }
 0x650   : > { %v7861_v10 = vsel %vm3731_vm15, %v7856_v32, %v7701_v22 }
 0x651   : > { %9232 = vmatprep.mubr.msk.f32.mxu0 %vm13045_vm8, %v8135_v40  ;;  %v7837_v26 = vpop.permute.xlu0 %7836 }
 0x652   : > { %v7884_v57 = vsel %vm3761_vm10, %v7879_v42, %v7837_v26 }
 0x653   : > { %v7791_v33 = vpop.permute.xlu1 %7790  ;;  %v7977_v5 = vrot.slane %v7884_v57, %v11078_v4  ;;  %v7970_v38 = vcombine.high %v7884_v57, %v7884_v57 }
 0x654   : > { %v7875_v45 = vsel %vm3749_vm12, %v7870_v8, %v7791_v33 }
 0x655   : > { %v7985_v37 = vcombine.high %v7977_v5, %v7977_v5  ;;  %v7725_v3 = vpop.permute.xlu0 %7724  ;;  %v7992_v41 = vrot.slane %v7977_v5, %v11078_v4  ;;  %v7984_v24 = vrot.slane %v7970_v38, %v11078_v4  ;;  %v9534_v38 = vld [vmem:[%s12939_s7] sm:$0xff] }
 0x656   : > { %v7866_v39 = vsel %vm3737_vm14, %v7861_v10, %v7725_v3 }
 0x657   : > { %v7815_v51 = vpop.permute.xlu1 %7814  ;;  %v8006_v55 = vrot.slane %v7985_v37, %v11078_v4  ;;  %v7999_v31 = vrot.slane %v7984_v24, %v11078_v4 }
 0x658   : > { %v7880_v1 = vsel %vm3755_vm11, %v7875_v45, %v7815_v51 }
 0x659   : > { %v7749_v44 = vpop.permute.xlu0 %7748  ;;  %v8137_v19 = vcombine.low %v7992_v41, %v8006_v55  ;;  %v8947_v60 = vcombine.high %v7992_v41, %v8006_v55 }
 0x65a   : > { %v7871_v35 = vsel %vm3743_vm13, %v7866_v39, %v7749_v44  ;;  %v9535_v39 = vld [vmem:[%s12938_s6] ss:$0 sm:$0xff] }
 0x65b   : > { %v7793_v30 = vpop.permute.xlu1 %7792  ;;  %v8153_v49 = vrot.slane %v8137_v19, %v11078_v4  ;;  %v8160_v52 = vrot.slane %v8947_v60, %v11078_v4 }
 0x65c   : > { %v7876_v58 = vsel %vm3749_vm12, %v7871_v35, %v7793_v30  ;;  %vm13048_vm12 = vmmov %vm13045_vm8 }
 0x65d   : > { %v7839_v2 = vpop.permute.xlu0 %7838  ;;  %v8168_v53 = vcombine.low %v8146_v61, %v8153_v49 }
 0x65e   : > { %v7885_v63 = vsel %vm3761_vm10, %v7880_v1, %v7839_v2 }
 0x65f   : > { %v7817_v50 = vpop.permute.xlu1 %7816  ;;  %v8009_v34 = vcombine.high %v7885_v63, %v7885_v63  ;;  %v8016_v15 = vrot.slane %v7885_v63, %v11078_v4  ;;  %v8176_v33 = vrot.slane %v8168_v53, %v11078_v4 }
 0x660   : > { %v7881_v9 = vsel %vm3755_vm11, %v7876_v58, %v7817_v50  ;;  %vm13047_vm11 = vmmov %vm13045_vm8 }
 0x661   : > { %v8023_v36 = vrot.slane %v8009_v34, %v11078_v4  ;;  %v8024_v43 = vcombine.high %v8016_v15, %v8016_v15  ;;  %v8031_v11 = vrot.slane %v8016_v15, %v11078_v4  ;;  %v7841_v59 = vpop.permute.xlu0 %7840 }
 0x662   : > { %v7886_v7 = vsel %vm3761_vm10, %v7881_v9, %v7841_v59  ;;  %vm13046_vm10 = vmmov %vm13045_vm8 }
 0x663   : > { %v8045_v27 = vrot.slane %v8024_v43, %v11078_v4  ;;  %v8046_v62 = vcombine.high %v8031_v11, %v8031_v11  ;;  %v8139_v16 = vcombine.low %v7999_v31, %v8031_v11  ;;  %v8048_v6 = vcombine.high %v7886_v7, %v7886_v7 }
 0x664   : > { %v8055_v13 = vrot.slane %v7886_v7, %v11078_v4  ;;  %v8038_v23 = vrot.slane %v8023_v36, %v11078_v4 }
 0x665   : > { %v8047_v20 = vcombine.high %v8045_v27, %v8045_v27  ;;  %v8167_v25 = vrot.slane %v8139_v16, %v11078_v4  ;;  %v8185_v18 = vcombine.low %v8045_v27, %v8046_v62  ;;  %v8062_v42 = vrot.slane %v8048_v6, %v11078_v4 }
 0x666   : > { %v8063_v22 = vcombine.high %v8055_v13, %v8055_v13  ;;  %v8070_v26 = vrot.slane %v8055_v13, %v11078_v4 }
 0x667   : > { %v8169_v40 = vcombine.low %v8160_v52, %v8167_v25  ;;  %v8186_v0 = vcombine.low %v8047_v20, %v8038_v23  ;;  %v8195_v56 = vrot.slane %v8185_v18, %v11078_v4  ;;  %v8077_v28 = vrot.slane %v8062_v42, %v11078_v4 }
 0x668   : > { %v8084_v57 = vrot.slane %v8063_v22, %v11078_v4 }
 0x669   : > { %v8183_v5 = vrot.slane %v8169_v40, %v11078_v4  ;;  %v8202_v21 = vrot.slane %v8186_v0, %v11078_v4  ;;  %v8240_v55 = vrot.slane %v8077_v28, %v11078_v4 }
 0x66a   : > { %v8187_v54 = vcombine.low %v8070_v26, %v8084_v57  ;;  %v8948_v37 = vcombine.high %v8070_v26, %v8084_v57 }
 0x66b   : > { %v8184_v3 = vcombine.low %v8176_v33, %v8183_v5  ;;  %v8217_v51 = vcombine.low %v8195_v56, %v8202_v21  ;;  %v8247_v44 = vrot.slane %v8240_v55, %v11078_v4 }
 0x66c   : > { %v8209_v32 = vrot.slane %v8187_v54, %v11078_v4  ;;  %v8216_v48 = vrot.slane %v8948_v37, %v11078_v4 }
 0x66d   : > { %9233 = vmatmul.mubr.msk.f32.vlgmr.msra.gmra.mxu0 %vm13046_vm10, %v8184_v3  ;;  %v8225_v12 = vrot.slane %v8217_v51, %v11078_v4 }
 0x66e   : > { %v8218_v46 = vcombine.low %v8209_v32, %v8216_v48  ;;  %9239 = vmatpush3.msra.mxu0 %v9534_v38 }
 0x670   : > { %v8232_v10 = vrot.slane %v8218_v46, %v11078_v4 }
 0x672   : > { %v8233_v8 = vcombine.low %v8225_v12, %v8232_v10 }
 0x674   : > { %9235 = vmatprep.mubr.msk.f32.mxu0 %vm13047_vm11, %v8233_v8 }
 0x675   : > { %9236 = vmatmul.mubr.msk.f32.gmra.mxu0 %vm13048_vm12, %v8247_v44 }
 0x676   : > { %9240 = vmatprep.mubr.msk.f32.mxu0 %vm9635_vm1, %v9634_v14  ;;  %vm13049_vm1 = vcmask 254976  }
 0x72d   : > { %v9234_v41 = vpop.f32.mrf.mxu0 }
 0x72e   : > { %v8328_v29 = vadd.f32 %v9535_v39, %v9234_v41 }
 0x72f   : > { %v8322_v30 = vpop.f32.mrf.mxu0 }
 0x730   : > { %v8955_v35 = vmul.f32 -1.442695, %v8328_v29  ;;  %v8323_v45 = vadd.f32 %v9535_v39, %v8322_v30 }
 0x732   : > { %9516 = vpow2.f32 %v8955_v35  ;;  %v8954_v24 = vmul.f32 -1.442695, %v8323_v45 }
 0x734   : > { %9518 = vpow2.f32 %v8954_v24 }
 0x735   : > { %v9237_v19 = vpop.f32.mrf.mxu0 }
 0x737   : > { %v8332_v17 = vpop.f32.mrf.mxu0 }
 0x738   : > { %v8333_v1 = vadd.f32 %v9535_v39, %v8332_v17 }
 0x73a   : > { %v8956_v2 = vmul.f32 -1.442695, %v8333_v1 }
 0x73c   : > { %9520 = vpow2.f32 %v8956_v2 }
 0x73f   : > { %v9517_v58 = vpop.eup %9516 }
 0x740   : > { %v8350_v63 = vadd.f32 1.0, %v9517_v58 }
 0x741   : > { %v9519_v14 = vpop.eup %9518 }
 0x742   : > { %9522 = vrcp.f32 %v8350_v63  ;;  %v8349_v47 = vadd.f32 1.0, %v9519_v14 }
 0x744   : > { %9524 = vrcp.f32 %v8349_v47 }
 0x749   : > { %v9521_v50 = vpop.eup %9520 }
 0x74a   : > { %v8351_v34 = vadd.f32 1.0, %v9521_v50  ;;  %v9536_v50 = vld [vmem:[%s12940_s8] ss:$0 sm:$0xff] }
 0x74c   : > { %9526 = vrcp.f32 %v8351_v34 }
 0x74f   : > { %v9523_v15 = vpop.eup %9522 }
 0x750   : > { %v8359_v31 = vmul.f32 %v9523_v15, %v8328_v29 }
 0x751   : > { %v9525_v60 = vpop.eup %9524 }
 0x752   : > { %v8413_v49 = vcombine.high %v8359_v31, %v8359_v31  ;;  %v8420_v9 = vrot.slane %v8359_v31, %v11078_v4  ;;  %v8358_v36 = vmul.f32 %v9525_v60, %v8323_v45 }
 0x754   : > { %v8427_v43 = vrot.slane %v8413_v49, %v11078_v4  ;;  %v8364_v11 = vcombine.high %v8358_v36, %v8358_v36  ;;  %v8371_v59 = vrot.slane %v8358_v36, %v11078_v4  ;;  %v8428_v7 = vcombine.high %v8420_v9, %v8420_v9 }
 0x755   : > { %v8436_v27 = vrot.slane %v8420_v9, %v11078_v4 }
 0x756   : > { %v8429_v61 = vcombine.high %v8427_v43, %v8427_v43  ;;  %v8378_v62 = vrot.slane %v8364_v11, %v11078_v4  ;;  %v8379_v16 = vcombine.high %v8371_v59, %v8371_v59  ;;  %v8387_v53 = vrot.slane %v8371_v59, %v11078_v4 }
 0x757   : > { %v8450_v25 = vrot.slane %v8428_v7, %v11078_v4  ;;  %v8458_v18 = vcombine.high %v8436_v27, %v8436_v27  ;;  %v8443_v32 = vrot.slane %v8427_v43, %v11078_v4 }
 0x758   : > { %v8457_v52 = vrot.slane %v8429_v61, %v11078_v4  ;;  %v8380_v13 = vcombine.high %v8378_v62, %v8378_v62  ;;  %v8394_v23 = vrot.slane %v8378_v62, %v11078_v4  ;;  %v8401_v20 = vrot.slane %v8379_v16, %v11078_v4 }
 0x759   : > { %v9527_v6 = vpop.eup %9526  ;;  %v8409_v5 = vcombine.high %v8387_v53, %v8387_v53  ;;  %v8459_v37 = vcombine.high %v8450_v25, %v8450_v25 }
 0x75a   : > { %v8460_v22 = vcombine.high %v8457_v52, %v8457_v52  ;;  %v8360_v40 = vmul.f32 %v9527_v6, %v8333_v1  ;;  %v8408_v0 = vrot.slane %v8380_v13, %v11078_v4  ;;  %v8410_v42 = vcombine.high %v8394_v23, %v8394_v23 }
 0x75b   : > { %v8411_v57 = vcombine.high %v8401_v20, %v8401_v20 }
 0x75c   : > { %v8504_v26 = vadd.f32 %v8460_v22, %v8458_v18  ;;  %v8467_v33 = vrot.slane %v8360_v40, %v11078_v4  ;;  %v8412_v21 = vcombine.high %v8408_v0, %v8408_v0  ;;  %v8500_v56 = vadd.f32 %v8408_v0, %v8387_v53 }
 0x75d   : > { %v8501_v54 = vadd.f32 %v8410_v42, %v8401_v20  ;;  %v8503_v46 = vadd.f32 %v8436_v27, %v8411_v57 }
 0x75e   : > { %v8468_v3 = vcombine.high %v8467_v33, %v8467_v33  ;;  %v8475_v28 = vrot.slane %v8467_v33, %v11078_v4  ;;  %v8502_v48 = vadd.f32 %v8412_v21, %v8409_v5 }
 0x75f   : > { %v8508_v51 = vadd.f32 %v8501_v54, %v8500_v56 }
 0x760   : > { %v8482_v38 = vrot.slane %v8468_v3, %v11078_v4  ;;  %v8483_v55 = vcombine.high %v8475_v28, %v8475_v28  ;;  %v8505_v12 = vadd.f32 %v8475_v28, %v8459_v37  ;;  %v8509_v10 = vadd.f32 %v8503_v46, %v8502_v48 }
 0x761   : > { %v8512_v39 = vmul.f32 0.25, %v8508_v51 }
 0x762   : > { %v8506_v8 = vadd.f32 %v8482_v38, %v8443_v32  ;;  %v8507_v44 = vadd.f32 %v8483_v55, %v8457_v52  ;;  %v8510_v41 = vadd.f32 %v8505_v12, %v8504_v26  ;;  %v8513_v35 = vmul.f32 0.25, %v8509_v10 }
 0x764   : > { %v8511_v29 = vadd.f32 %v8507_v44, %v8506_v8  ;;  %v8514_v30 = vmul.f32 0.25, %v8510_v41 }
 0x766   : > { %v8515_v45 = vmul.f32 0.25, %v8511_v29  ;;  %v8518_v24 = vcombine.low %v8512_v39, %v8514_v30 }
 0x768   : > { %v8536_v19 = vcombine.low %v8513_v35, %v8515_v45  ;;  %v8525_v2 = vrot.slane %v8518_v24, %v11078_v4 }
 0x76a   : > { %v8543_v17 = vrot.slane %v8536_v19, %v11078_v4  ;;  %v8532_v58 = vrot.slane %v8525_v2, %v11078_v4 }
 0x76c   : > { %v8550_v1 = vrot.slane %v8543_v17, %v11078_v4 }
 0x76e   : > { %8551 = vrot.lane.b32.xlu1 %v8550_v1, %s9637_s25 }
 0x7e0   : > { %v8552_v63 = vpop.permute.xlu1 %8551 }
 0x7e1   : > { %v8554_v14 = vsel %vm904_vm5, %v8532_v58, %v8552_v63 }
 0x7e2   : > { %9241 = vmatmul.mubr.msk.f32.vlgmr.msra.gmra.mxu0 %vm1020_vm9, %v8554_v14 }
 0x8a2   : > { %v8624_v47 = vpop.f32.mrf.mxu0 }
 0x8a3   : > { %v8625_v34 = vadd.f32 %v9536_v50, %v8624_v47 }
 0x8a4   : > { %v9242_v4 = vpop.f32.mrf.mxu0 }
 0x8a5   : > { %8958 = vst.msk [vmem:[%s12125_s29 + $0x2] sm:$0x3] %vm13049_vm1, %v8625_v34 }
 0x8a6   : > { %9578 = shalt.err (!%p9575_p10)
}
 0x8a7   : > { %s9579_s29 = scalar_lea.hbm %s12885_s23, 64  ;;  %s9583_s25 = scalar_lea.hbm %s12941_s9, 128 }
 0x8a8   : > { %p9580_p0 = scmp.ne.s32.totalorder %s12885_s23, %s9579_s29  ;;  %p9584_p1 = scmp.lt.s32.totalorder %s12885_s23, %s12941_s9 }
 0x8a9   : > { %p9585_p3 = scmp.lt.s32.totalorder %s9583_s25, %s9579_s29 }
 0x8aa   : > { %p9581_p2 = pnand %p9580_p0, %p13050_p12 }
 0x8ab   : > { %p9586_p6 = por %p9585_p3, %p9584_p1 }
 0x8ac   : > { %p9582_p9 = pneg %p9581_p2 }
 0x8ae   : > { %p9587_p11 = pnand %p9586_p6, %p9582_p9 }
 0x8b0   : > { %9590 = shalt.err (!%p9587_p11)
}
 0x8b1   : > { %s9647_s19 = smov 2  }
 0x8b2   : > { %9245 = dma.vmem_to_hbm [thread:$0]  (%p13050_p12), %s12877_s17, 64, %s12885_s23, %s8631_s13, %s9643_s20, %s9643_s20, %s9647_s19  }
 0x8b3 PF: > { %s8659_s28 = sand.u32 1, %s9617_s30   ;;  %p13051_p13 = scmp.ne.s32.totalorder %s12960_s22, 0 }
 0x8b4   : > { %p13052_p4 = scmp.ge.s32.totalorder %s9629_s12, 2  ;;  %s8660_s14 = scalar_lea.sflag [#allocation4], %s8659_s28 }
 0x8b6   : > { %p9252_p5 = pnand %p13052_p4, %p13051_p13 }
 0x8b8   : > { %p9253_p7 = pneg %p9252_p5 }
 0x8ba   : > { %9612 = dma.done.wait (%p9253_p7), %s8660_s14, 64  }
 0x8bb   : > { %9614 = vsyncadd (%p9253_p7), %s8660_s14, 4294967232  ;;  %s13053_s21 = sld [smem:[#allocation8_spill]]  ;;  %p22_p8 = scmp.ge.s32.totalorder %s9723_s15, 4  }
 0x8bc   : > { %s13054_s11 = sld [smem:[#allocation9_spill]]  ;;  %s13055_s30 = smov %s9621_s10 }
 0x8bd   : > { %s13057_s12 = smov %s9723_s15  ;;  %24 = sbr.rel (!%p22_p8) target bundleno = 5 (0x5), region = 103 }
 0x8c1   : > { %s13056_s10 = smov %s13053_s21 }
 0x8c2   :  { %8665 = vsyncpa [#allocation3], 1 }
 0x8c3   :  { %8667 = vsyncpa [#allocation3 + $0x1], 1 }
 0x8c4   :  { %8668 = vsyncpa [#allocation4], 1 }
 0x8c5   :  { %8670 = vsyncpa [#allocation4 + $0x1], 1 }

</bundles_post_ra>
